<compile_context>
chip_gen: v7x
topology: tpu7x:2x2x1
jax: 0.10.0
libtpu: 0.0.40
codegen_flags: <defaults>
</compile_context>

<pallas_src>
import jax
import jax.numpy as jnp
from jax import lax
from jax.experimental import pallas as pl
from jax.experimental.pallas import tpu as pltpu

LANE = 128          # feature padding (lane axis)
NPAD = 128          # node-count padding (sublane axis)
HIDDEN = 32         # hidden_channels
IN_GAME = 5         # TAGConv(5, H, K=2)
IN_STATE = 6        # TAGConv(6, H, K=3)
K_TAG1 = 2
K_TAG2 = 3
NEG_INF = -1e30

VMEM = pl.BlockSpec(memory_space=pltpu.MemorySpace.VMEM)


# ----------------------------------------------------------------------------- in-kernel blocks
def _mm(a, b):
    """MXU matmul: bf16 operands, f32 accumulation."""
    return jnp.dot(a.astype(jnp.bfloat16), b.astype(jnp.bfloat16),
                   preferred_element_type=jnp.float32)


def _tag_block(adj, x, w, bias, K):
    """TAGConv: relu( sum_k (A_norm^k x) W_k + b ) as ONE wide matmul.

    H = [x | A x | ... | A^K x]  (N, (K+1)*LANE);  w is ((K+1)*LANE, LANE)."""
    hs = [x.astype(jnp.bfloat16)]
    h = hs[0]
    for _ in range(K):
        h = _mm(adj, h).astype(jnp.bfloat16)
        hs.append(h)
    big = jnp.concatenate(hs, axis=-1)
    return jnp.maximum(_mm(big, w) + bias, 0.0)


def _sage_block(adj_row, x_src, x_dst, w_lr, bl):
    """SAGEConv (mean aggr): relu( [mean_nbr(x_src) | x_dst] @ [Wl ; Wr] + bl ).

    adj_row is pre-row-normalized so mean aggregation is a single matmul, and the
    two projection matmuls are fused into one 256-deep contraction."""
    agg = _mm(adj_row, x_src)
    both = jnp.concatenate([agg.astype(jnp.bfloat16),
                            x_dst.astype(jnp.bfloat16)], axis=-1)      # (N, 2*LANE)
    return jnp.maximum(_mm(both, w_lr) + bl, 0.0)


def _gat_block(adj, x_src, x_dst, ws, wd, att_src, att_dst, bias):
    """GATConv (1 head, no self loops): masked softmax attention over src neighbors."""
    h_src = _mm(x_src, ws)                                             # (Ns, LANE) f32
    h_dst = _mm(x_dst, wd)                                             # (Nd, LANE) f32
    # alpha_src as a (1, Ns) row via transposed-contraction matmul (f32, tiny)
    a_src = lax.dot_general(att_src, h_src, (((1,), (1,)), ((), ())),
                            preferred_element_type=jnp.float32)        # (1, Ns)
    a_dst = jnp.sum(h_dst * att_dst, axis=-1, keepdims=True)           # (Nd, 1)
    logits = a_dst + a_src                                             # (Nd, Ns)
    logits = jnp.where(logits > 0, logits, 0.2 * logits)               # LeakyReLU(0.2)
    mask = adj > 0
    masked = jnp.where(mask, logits, NEG_INF)                          # f32 mask path
    m = jnp.max(masked, axis=-1, keepdims=True)
    e = jnp.where(mask, jnp.exp(masked - m), 0.0)
    s = jnp.sum(e, axis=-1, keepdims=True)
    inv = jnp.where(s > 0, pl.reciprocal(s, approx=True), 0.0)
    attn = e * inv
    out = _mm(attn, h_src) + bias
    return jnp.maximum(out, 0.0)


# ----------------------------------------------------------------------------- fused kernel
def fused_kernel(xg_ref, xs_ref,
                 adj_gg_gcn_ref, adj_gg_row_ref,
                 adj_ss_gcn_ref, adj_ss_row_ref,
                 adj_hist_ref, adj_in_row_ref,
                 tag_w_ref, sage_w_ref,
                 gat_w_ref, mlp_w_ref, bias_ref,
                 out_ref):
    # bias/attention rows (f32): 0 tag1_b, 1 tag2_b, 2-3 gv sage bl, 4-5 sv sage bl,
    # 6 in1 bl, 7 gat att_src, 8 gat att_dst, 9 gat bias, 10 mlp bias
    b = lambda i: bias_ref[i:i + 1, :]

    # ---- gv branch: TAGConv(K=2) + 2 x SAGEConv (relu fused) -----------------
    game_x = _tag_block(adj_gg_gcn_ref[...], xg_ref[...],
                        tag_w_ref[0:(K_TAG1 + 1) * LANE, :], b(0), K_TAG1)
    for i in range(2):
        game_x = _sage_block(adj_gg_row_ref[...], game_x, game_x,
                             sage_w_ref[i], b(2 + i))

    # ---- sv branch: TAGConv(K=3) + 2 x SAGEConv -------------------------------
    state_x = _tag_block(adj_ss_gcn_ref[...], xs_ref[...],
                         tag_w_ref[(K_TAG1 + 1) * LANE:, :], b(1), K_TAG2)
    for i in range(2):
        state_x = _sage_block(adj_ss_row_ref[...], state_x, state_x,
                              sage_w_ref[2 + i], b(4 + i))

    # ---- history GAT: bipartite (game -> state) -------------------------------
    # TODO(synk): reference passes edge_attr_dict, but GATConv is built with
    # edge_dim=None so edge attributes cannot contribute; they are ignored here.
    history_x = _gat_block(adj_hist_ref[...], game_x, state_x,
                           gat_w_ref[0], gat_w_ref[1], b(7), b(8), b(9))

    # ---- in1 SAGEConv: bipartite, src=game_x, dst=history_x -------------------
    in_x = _sage_block(adj_in_row_ref[...], game_x, history_x,
                       sage_w_ref[4], b(6))

    # sv_layers2 output is dead code in the reference forward (its result is
    # discarded; only mlp(in_x) is returned), so it is skipped here.

    # ---- MLP head --------------------------------------------------------------
    out_ref[...] = _mm(in_x, mlp_w_ref[...]) + b(10)


# ----------------------------------------------------------------------------- glue (XLA side)
def pad2d(x, rows=NPAD, cols=LANE):
    return jnp.zeros((rows, cols), jnp.float32).at[:x.shape[0], :x.shape[1]].set(
        x.astype(jnp.float32))


def pad_w(w):
    return jnp.zeros((LANE, LANE), jnp.float32).at[:w.shape[0], :w.shape[1]].set(w)


def pad_row(v):
    return jnp.zeros((1, LANE), jnp.float32).at[0, :v.shape[0]].set(v)


def dense_adj(edge_index):
    """Dense [dst, src] adjacency, zero-padded to (NPAD, NPAD)."""
    src, dst = edge_index
    return jnp.zeros((NPAD, NPAD), jnp.float32).at[dst, src].add(1.0)


def gcn_norm_dense(adj):
    """PyG gcn_norm (add_self_loops=False): norm_ij = d(i)^-1/2 * d(j)^-1/2."""
    deg = jnp.sum(adj, axis=1)
    dinv = jnp.where(deg > 0, lax.rsqrt(deg), 0.0)
    return adj * dinv[:, None] * dinv[None, :]


def row_norm_dense(adj):
    """Row-normalize once so SAGE mean-aggregation is a plain matmul."""
    deg = jnp.sum(adj, axis=1, keepdims=True)
    return adj * jnp.where(deg > 0, 1.0 / deg, 0.0)


def init_params(key):
    ks = iter(jax.random.split(key, 64))

    def lin(fin, fout):
        return jax.random.normal(next(ks), (fin, fout), jnp.float32) / jnp.sqrt(float(fin))

    def small(fout):
        return 0.01 * jax.random.normal(next(ks), (fout,), jnp.float32)

    # TAGConv weights: tag1 (K=2) -> 3 mats (5->32); tag2 (K=3) -> 4 mats (6->32)
    tag1 = [pad_w(lin(IN_GAME, HIDDEN)) for _ in range(K_TAG1 + 1)]
    tag2 = [pad_w(lin(IN_STATE, HIDDEN)) for _ in range(K_TAG2 + 1)]
    tag_w = jnp.concatenate(tag1 + tag2, axis=0).astype(jnp.bfloat16)        # (896, 128)

    # 5 SAGE layers: gv0, gv1, sv0, sv1, in1 -- each stored as stacked [Wl ; Wr]
    # so the kernel does one 256-deep contraction per layer.
    sage_w = jnp.stack([
        jnp.concatenate([pad_w(lin(HIDDEN, HIDDEN)), pad_w(lin(HIDDEN, HIDDEN))], axis=0)
        for _ in range(5)
    ]).astype(jnp.bfloat16)                                                   # (5, 256, 128)

    gat_w = jnp.stack([pad_w(lin(HIDDEN, HIDDEN)) for _ in range(2)]).astype(jnp.bfloat16)
    mlp_w = pad_w(lin(HIDDEN, 1)).astype(jnp.bfloat16)

    rows = [
        pad_row(small(HIDDEN)),                                   # 0: tag1 bias
        pad_row(small(HIDDEN)),                                   # 1: tag2 bias
        pad_row(small(HIDDEN)), pad_row(small(HIDDEN)),           # 2-3: gv sage bl
        pad_row(small(HIDDEN)), pad_row(small(HIDDEN)),           # 4-5: sv sage bl
        pad_row(small(HIDDEN)),                                   # 6: in1 bl
        pad_row(0.1 * jax.random.normal(next(ks), (HIDDEN,))),    # 7: gat att_src
        pad_row(0.1 * jax.random.normal(next(ks), (HIDDEN,))),    # 8: gat att_dst
        pad_row(small(HIDDEN)),                                   # 9: gat bias
        pad_row(small(1)),                                        # 10: mlp bias
    ]
    bias = jnp.concatenate(
        rows + [jnp.zeros((16 - len(rows), LANE), jnp.float32)], axis=0)      # (16, 128) f32

    return dict(tag_w=tag_w, sage_w=sage_w,
                gat_w=gat_w, mlp_w=mlp_w, bias=bias)


@jax.jit
def common_model_forward(params, x_game, x_state, adj_gg, adj_ss, adj_hist, adj_in):
    n_state = x_state.shape[0]                       # static at trace time

    xg = pad2d(x_game).astype(jnp.bfloat16)
    xs = pad2d(x_state).astype(jnp.bfloat16)
    adj_gg_gcn = gcn_norm_dense(adj_gg).astype(jnp.bfloat16)
    adj_gg_row = row_norm_dense(adj_gg).astype(jnp.bfloat16)
    adj_ss_gcn = gcn_norm_dense(adj_ss).astype(jnp.bfloat16)
    adj_ss_row = row_norm_dense(adj_ss).astype(jnp.bfloat16)
    adj_hist_b = adj_hist.astype(jnp.bfloat16)
    adj_in_row = row_norm_dense(adj_in).astype(jnp.bfloat16)

    out = pl.pallas_call(
        fused_kernel,
        out_shape=jax.ShapeDtypeStruct((NPAD, LANE), jnp.float32),
        in_specs=[VMEM] * 13,
        out_specs=VMEM,
    )(xg, xs, adj_gg_gcn, adj_gg_row, adj_ss_gcn, adj_ss_row,
      adj_hist_b, adj_in_row,
      params["tag_w"], params["sage_w"],
      params["gat_w"], params["mlp_w"], params["bias"])

    return out[:n_state, :1]                         # un-pad to real MLP output (num_state, 1)


# ----------------------------------------------------------------------------- main
if __name__ == "__main__":
    key = jax.random.PRNGKey(0)
    k_feat_g, k_feat_s, k_params = jax.random.split(key, 3)

    N_GAME, N_STATE = 16, 8
    x_game = jax.random.normal(k_feat_g, (N_GAME, IN_GAME), jnp.float32)
    x_state = jax.random.normal(k_feat_s, (N_STATE, IN_STATE), jnp.float32)

    # game-game ring (both directions)
    g = jnp.arange(N_GAME)
    ei_gg = jnp.concatenate([jnp.stack([g, (g + 1) % N_GAME]),
                             jnp.stack([(g + 1) % N_GAME, g])], axis=1)
    # state-state ring (both directions)
    s = jnp.arange(N_STATE)
    ei_ss = jnp.concatenate([jnp.stack([s, (s + 1) % N_STATE]),
                             jnp.stack([(s + 1) % N_STATE, s])], axis=1)
    # game -> state "history": each state gets two game neighbors
    ei_hist = jnp.stack([jnp.arange(N_GAME), jnp.arange(N_GAME) % N_STATE])
    # game -> state "in": one game vertex per state
    ei_in = jnp.stack([jnp.arange(N_STATE) * 2, jnp.arange(N_STATE)])

    adj_gg = dense_adj(ei_gg)
    adj_ss = dense_adj(ei_ss)
    adj_hist = dense_adj(ei_hist)
    adj_in = dense_adj(ei_in)

    params = init_params(k_params)

    out = common_model_forward(params, x_game, x_state, adj_gg, adj_ss, adj_hist, adj_in)
    out = jax.block_until_ready(out)
    assert out.shape == (N_STATE, 1), out.shape
    assert bool(jnp.all(jnp.isfinite(out)))
    print("KERNEL_OK")
</pallas_src>

<mosaic_0001>
module attributes {stable_mosaic.version = 11 : i64} {
  func.func @fused_kernel(%arg0: memref<128x128xbf16, #tpu.memory_space<vmem>>, %arg1: memref<128x128xbf16, #tpu.memory_space<vmem>>, %arg2: memref<128x128xbf16, #tpu.memory_space<vmem>>, %arg3: memref<128x128xbf16, #tpu.memory_space<vmem>>, %arg4: memref<128x128xbf16, #tpu.memory_space<vmem>>, %arg5: memref<128x128xbf16, #tpu.memory_space<vmem>>, %arg6: memref<128x128xbf16, #tpu.memory_space<vmem>>, %arg7: memref<128x128xbf16, #tpu.memory_space<vmem>>, %arg8: memref<896x128xbf16, #tpu.memory_space<vmem>>, %arg9: memref<5x256x128xbf16, #tpu.memory_space<vmem>>, %arg10: memref<2x128x128xbf16, #tpu.memory_space<vmem>>, %arg11: memref<128x128xbf16, #tpu.memory_space<vmem>>, %arg12: memref<16x128xf32, #tpu.memory_space<vmem>>, %arg13: memref<128x128xf32, #tpu.memory_space<vmem>>) attributes {dimension_semantics = [], scalar_prefetch = 0 : i64, scratch_operands = 0 : i64, tpu.core_type = #tpu.core_type<tc>} {
    %c0 = arith.constant 0 : index
    %c0_0 = arith.constant 0 : index
    %0 = vector.load %arg2[%c0, %c0_0] : memref<128x128xbf16, #tpu.memory_space<vmem>>, vector<128x128xbf16>
    %c0_1 = arith.constant 0 : index
    %c0_2 = arith.constant 0 : index
    %1 = vector.load %arg0[%c0_1, %c0_2] : memref<128x128xbf16, #tpu.memory_space<vmem>>, vector<128x128xbf16>
    %c0_3 = arith.constant 0 : index
    %c0_4 = arith.constant 0 : index
    %2 = vector.load %arg8[%c0_3, %c0_4] : memref<896x128xbf16, #tpu.memory_space<vmem>>, vector<384x128xbf16>
    %c0_5 = arith.constant 0 : index
    %c0_6 = arith.constant 0 : index
    %3 = vector.load %arg12[%c0_5, %c0_6] : memref<16x128xf32, #tpu.memory_space<vmem>>, vector<1x128xf32>
    %cst = arith.constant dense<0.000000e+00> : vector<128x128xf32>
    %4 = tpu.matmul %0, %1, %cst {dimension_numbers = #tpu.dot_dimension_numbers<[1], [0], [0], [1], [0, 0, 1, 1], [], []>} : vector<128x128xbf16>, vector<128x128xbf16>, vector<128x128xf32> -> vector<128x128xf32>
    %5 = arith.truncf %4 : vector<128x128xf32> to vector<128x128xbf16>
    %cst_7 = arith.constant dense<0.000000e+00> : vector<128x128xf32>
    %6 = tpu.matmul %0, %5, %cst_7 {dimension_numbers = #tpu.dot_dimension_numbers<[1], [0], [0], [1], [0, 0, 1, 1], [], []>} : vector<128x128xbf16>, vector<128x128xbf16>, vector<128x128xf32> -> vector<128x128xf32>
    %7 = arith.truncf %6 : vector<128x128xf32> to vector<128x128xbf16>
    %8 = tpu.concatenate %1, %5, %7 in 1 : vector<128x128xbf16>, vector<128x128xbf16>, vector<128x128xbf16> -> vector<128x384xbf16>
    %cst_8 = arith.constant dense<0.000000e+00> : vector<128x128xf32>
    %9 = tpu.matmul %8, %2, %cst_8 {dimension_numbers = #tpu.dot_dimension_numbers<[1], [0], [0], [1], [0, 0, 1, 1], [], []>} : vector<128x384xbf16>, vector<384x128xbf16>, vector<128x128xf32> -> vector<128x128xf32>
    %10 = vector.broadcast %3 : vector<1x128xf32> to vector<128x128xf32>
    %11 = arith.addf %9, %10 : vector<128x128xf32>
    %cst_9 = arith.constant 0.000000e+00 : f32
    %12 = vector.broadcast %cst_9 : f32 to vector<128x128xf32>
    %13 = arith.maximumf %11, %12 : vector<128x128xf32>
    %c0_10 = arith.constant 0 : index
    %c0_11 = arith.constant 0 : index
    %14 = vector.load %arg3[%c0_10, %c0_11] : memref<128x128xbf16, #tpu.memory_space<vmem>>, vector<128x128xbf16>
    %c0_12 = arith.constant 0 : index
    %c0_13 = arith.constant 0 : index
    %c0_14 = arith.constant 0 : index
    %15 = vector.load %arg9[%c0_12, %c0_13, %c0_14] : memref<5x256x128xbf16, #tpu.memory_space<vmem>>, vector<1x256x128xbf16>
    %16 = vector.shape_cast %15 : vector<1x256x128xbf16> to vector<256x128xbf16>
    %c2 = arith.constant 2 : index
    %c0_15 = arith.constant 0 : index
    %17 = vector.load %arg12[%c2, %c0_15] : memref<16x128xf32, #tpu.memory_space<vmem>>, vector<1x128xf32>
    %18 = arith.truncf %13 : vector<128x128xf32> to vector<128x128xbf16>
    %cst_16 = arith.constant dense<0.000000e+00> : vector<128x128xf32>
    %19 = tpu.matmul %14, %18, %cst_16 {dimension_numbers = #tpu.dot_dimension_numbers<[1], [0], [0], [1], [0, 0, 1, 1], [], []>} : vector<128x128xbf16>, vector<128x128xbf16>, vector<128x128xf32> -> vector<128x128xf32>
    %20 = arith.truncf %19 : vector<128x128xf32> to vector<128x128xbf16>
    %21 = arith.truncf %13 : vector<128x128xf32> to vector<128x128xbf16>
    %22 = tpu.concatenate %20, %21 in 1 : vector<128x128xbf16>, vector<128x128xbf16> -> vector<128x256xbf16>
    %cst_17 = arith.constant dense<0.000000e+00> : vector<128x128xf32>
    %23 = tpu.matmul %22, %16, %cst_17 {dimension_numbers = #tpu.dot_dimension_numbers<[1], [0], [0], [1], [0, 0, 1, 1], [], []>} : vector<128x256xbf16>, vector<256x128xbf16>, vector<128x128xf32> -> vector<128x128xf32>
    %24 = vector.broadcast %17 : vector<1x128xf32> to vector<128x128xf32>
    %25 = arith.addf %23, %24 : vector<128x128xf32>
    %cst_18 = arith.constant 0.000000e+00 : f32
    %26 = vector.broadcast %cst_18 : f32 to vector<128x128xf32>
    %27 = arith.maximumf %25, %26 : vector<128x128xf32>
    %c0_19 = arith.constant 0 : index
    %c0_20 = arith.constant 0 : index
    %28 = vector.load %arg3[%c0_19, %c0_20] : memref<128x128xbf16, #tpu.memory_space<vmem>>, vector<128x128xbf16>
    %c1 = arith.constant 1 : index
    %c0_21 = arith.constant 0 : index
    %c0_22 = arith.constant 0 : index
    %29 = vector.load %arg9[%c1, %c0_21, %c0_22] : memref<5x256x128xbf16, #tpu.memory_space<vmem>>, vector<1x256x128xbf16>
    %30 = vector.shape_cast %29 : vector<1x256x128xbf16> to vector<256x128xbf16>
    %c3 = arith.constant 3 : index
    %c0_23 = arith.constant 0 : index
    %31 = vector.load %arg12[%c3, %c0_23] : memref<16x128xf32, #tpu.memory_space<vmem>>, vector<1x128xf32>
    %32 = arith.truncf %27 : vector<128x128xf32> to vector<128x128xbf16>
    %cst_24 = arith.constant dense<0.000000e+00> : vector<128x128xf32>
    %33 = tpu.matmul %28, %32, %cst_24 {dimension_numbers = #tpu.dot_dimension_numbers<[1], [0], [0], [1], [0, 0, 1, 1], [], []>} : vector<128x128xbf16>, vector<128x128xbf16>, vector<128x128xf32> -> vector<128x128xf32>
    %34 = arith.truncf %33 : vector<128x128xf32> to vector<128x128xbf16>
    %35 = arith.truncf %27 : vector<128x128xf32> to vector<128x128xbf16>
    %36 = tpu.concatenate %34, %35 in 1 : vector<128x128xbf16>, vector<128x128xbf16> -> vector<128x256xbf16>
    %cst_25 = arith.constant dense<0.000000e+00> : vector<128x128xf32>
    %37 = tpu.matmul %36, %30, %cst_25 {dimension_numbers = #tpu.dot_dimension_numbers<[1], [0], [0], [1], [0, 0, 1, 1], [], []>} : vector<128x256xbf16>, vector<256x128xbf16>, vector<128x128xf32> -> vector<128x128xf32>
    %38 = vector.broadcast %31 : vector<1x128xf32> to vector<128x128xf32>
    %39 = arith.addf %37, %38 : vector<128x128xf32>
    %cst_26 = arith.constant 0.000000e+00 : f32
    %40 = vector.broadcast %cst_26 : f32 to vector<128x128xf32>
    %41 = arith.maximumf %39, %40 : vector<128x128xf32>
    %c0_27 = arith.constant 0 : index
    %c0_28 = arith.constant 0 : index
    %42 = vector.load %arg4[%c0_27, %c0_28] : memref<128x128xbf16, #tpu.memory_space<vmem>>, vector<128x128xbf16>
    %c0_29 = arith.constant 0 : index
    %c0_30 = arith.constant 0 : index
    %43 = vector.load %arg1[%c0_29, %c0_30] : memref<128x128xbf16, #tpu.memory_space<vmem>>, vector<128x128xbf16>
    %c384 = arith.constant 384 : index
    %c0_31 = arith.constant 0 : index
    %44 = vector.load %arg8[%c384, %c0_31] : memref<896x128xbf16, #tpu.memory_space<vmem>>, vector<512x128xbf16>
    %c1_32 = arith.constant 1 : index
    %c0_33 = arith.constant 0 : index
    %45 = vector.load %arg12[%c1_32, %c0_33] : memref<16x128xf32, #tpu.memory_space<vmem>>, vector<1x128xf32>
    %cst_34 = arith.constant dense<0.000000e+00> : vector<128x128xf32>
    %46 = tpu.matmul %42, %43, %cst_34 {dimension_numbers = #tpu.dot_dimension_numbers<[1], [0], [0], [1], [0, 0, 1, 1], [], []>} : vector<128x128xbf16>, vector<128x128xbf16>, vector<128x128xf32> -> vector<128x128xf32>
    %47 = arith.truncf %46 : vector<128x128xf32> to vector<128x128xbf16>
    %cst_35 = arith.constant dense<0.000000e+00> : vector<128x128xf32>
    %48 = tpu.matmul %42, %47, %cst_35 {dimension_numbers = #tpu.dot_dimension_numbers<[1], [0], [0], [1], [0, 0, 1, 1], [], []>} : vector<128x128xbf16>, vector<128x128xbf16>, vector<128x128xf32> -> vector<128x128xf32>
    %49 = arith.truncf %48 : vector<128x128xf32> to vector<128x128xbf16>
    %cst_36 = arith.constant dense<0.000000e+00> : vector<128x128xf32>
    %50 = tpu.matmul %42, %49, %cst_36 {dimension_numbers = #tpu.dot_dimension_numbers<[1], [0], [0], [1], [0, 0, 1, 1], [], []>} : vector<128x128xbf16>, vector<128x128xbf16>, vector<128x128xf32> -> vector<128x128xf32>
    %51 = arith.truncf %50 : vector<128x128xf32> to vector<128x128xbf16>
    %52 = tpu.concatenate %43, %47, %49, %51 in 1 : vector<128x128xbf16>, vector<128x128xbf16>, vector<128x128xbf16>, vector<128x128xbf16> -> vector<128x512xbf16>
    %cst_37 = arith.constant dense<0.000000e+00> : vector<128x128xf32>
    %53 = tpu.matmul %52, %44, %cst_37 {dimension_numbers = #tpu.dot_dimension_numbers<[1], [0], [0], [1], [0, 0, 1, 1], [], []>} : vector<128x512xbf16>, vector<512x128xbf16>, vector<128x128xf32> -> vector<128x128xf32>
    %54 = vector.broadcast %45 : vector<1x128xf32> to vector<128x128xf32>
    %55 = arith.addf %53, %54 : vector<128x128xf32>
    %cst_38 = arith.constant 0.000000e+00 : f32
    %56 = vector.broadcast %cst_38 : f32 to vector<128x128xf32>
    %57 = arith.maximumf %55, %56 : vector<128x128xf32>
    %c0_39 = arith.constant 0 : index
    %c0_40 = arith.constant 0 : index
    %58 = vector.load %arg5[%c0_39, %c0_40] : memref<128x128xbf16, #tpu.memory_space<vmem>>, vector<128x128xbf16>
    %c2_41 = arith.constant 2 : index
    %c0_42 = arith.constant 0 : index
    %c0_43 = arith.constant 0 : index
    %59 = vector.load %arg9[%c2_41, %c0_42, %c0_43] : memref<5x256x128xbf16, #tpu.memory_space<vmem>>, vector<1x256x128xbf16>
    %60 = vector.shape_cast %59 : vector<1x256x128xbf16> to vector<256x128xbf16>
    %c4 = arith.constant 4 : index
    %c0_44 = arith.constant 0 : index
    %61 = vector.load %arg12[%c4, %c0_44] : memref<16x128xf32, #tpu.memory_space<vmem>>, vector<1x128xf32>
    %62 = arith.truncf %57 : vector<128x128xf32> to vector<128x128xbf16>
    %cst_45 = arith.constant dense<0.000000e+00> : vector<128x128xf32>
    %63 = tpu.matmul %58, %62, %cst_45 {dimension_numbers = #tpu.dot_dimension_numbers<[1], [0], [0], [1], [0, 0, 1, 1], [], []>} : vector<128x128xbf16>, vector<128x128xbf16>, vector<128x128xf32> -> vector<128x128xf32>
    %64 = arith.truncf %63 : vector<128x128xf32> to vector<128x128xbf16>
    %65 = arith.truncf %57 : vector<128x128xf32> to vector<128x128xbf16>
    %66 = tpu.concatenate %64, %65 in 1 : vector<128x128xbf16>, vector<128x128xbf16> -> vector<128x256xbf16>
    %cst_46 = arith.constant dense<0.000000e+00> : vector<128x128xf32>
    %67 = tpu.matmul %66, %60, %cst_46 {dimension_numbers = #tpu.dot_dimension_numbers<[1], [0], [0], [1], [0, 0, 1, 1], [], []>} : vector<128x256xbf16>, vector<256x128xbf16>, vector<128x128xf32> -> vector<128x128xf32>
    %68 = vector.broadcast %61 : vector<1x128xf32> to vector<128x128xf32>
    %69 = arith.addf %67, %68 : vector<128x128xf32>
    %cst_47 = arith.constant 0.000000e+00 : f32
    %70 = vector.broadcast %cst_47 : f32 to vector<128x128xf32>
    %71 = arith.maximumf %69, %70 : vector<128x128xf32>
    %c0_48 = arith.constant 0 : index
    %c0_49 = arith.constant 0 : index
    %72 = vector.load %arg5[%c0_48, %c0_49] : memref<128x128xbf16, #tpu.memory_space<vmem>>, vector<128x128xbf16>
    %c3_50 = arith.constant 3 : index
    %c0_51 = arith.constant 0 : index
    %c0_52 = arith.constant 0 : index
    %73 = vector.load %arg9[%c3_50, %c0_51, %c0_52] : memref<5x256x128xbf16, #tpu.memory_space<vmem>>, vector<1x256x128xbf16>
    %74 = vector.shape_cast %73 : vector<1x256x128xbf16> to vector<256x128xbf16>
    %c5 = arith.constant 5 : index
    %c0_53 = arith.constant 0 : index
    %75 = vector.load %arg12[%c5, %c0_53] : memref<16x128xf32, #tpu.memory_space<vmem>>, vector<1x128xf32>
    %76 = arith.truncf %71 : vector<128x128xf32> to vector<128x128xbf16>
    %cst_54 = arith.constant dense<0.000000e+00> : vector<128x128xf32>
    %77 = tpu.matmul %72, %76, %cst_54 {dimension_numbers = #tpu.dot_dimension_numbers<[1], [0], [0], [1], [0, 0, 1, 1], [], []>} : vector<128x128xbf16>, vector<128x128xbf16>, vector<128x128xf32> -> vector<128x128xf32>
    %78 = arith.truncf %77 : vector<128x128xf32> to vector<128x128xbf16>
    %79 = arith.truncf %71 : vector<128x128xf32> to vector<128x128xbf16>
    %80 = tpu.concatenate %78, %79 in 1 : vector<128x128xbf16>, vector<128x128xbf16> -> vector<128x256xbf16>
    %cst_55 = arith.constant dense<0.000000e+00> : vector<128x128xf32>
    %81 = tpu.matmul %80, %74, %cst_55 {dimension_numbers = #tpu.dot_dimension_numbers<[1], [0], [0], [1], [0, 0, 1, 1], [], []>} : vector<128x256xbf16>, vector<256x128xbf16>, vector<128x128xf32> -> vector<128x128xf32>
    %82 = vector.broadcast %75 : vector<1x128xf32> to vector<128x128xf32>
    %83 = arith.addf %81, %82 : vector<128x128xf32>
    %cst_56 = arith.constant 0.000000e+00 : f32
    %84 = vector.broadcast %cst_56 : f32 to vector<128x128xf32>
    %85 = arith.maximumf %83, %84 : vector<128x128xf32>
    %c0_57 = arith.constant 0 : index
    %c0_58 = arith.constant 0 : index
    %86 = vector.load %arg6[%c0_57, %c0_58] : memref<128x128xbf16, #tpu.memory_space<vmem>>, vector<128x128xbf16>
    %c0_59 = arith.constant 0 : index
    %c0_60 = arith.constant 0 : index
    %c0_61 = arith.constant 0 : index
    %87 = vector.load %arg10[%c0_59, %c0_60, %c0_61] : memref<2x128x128xbf16, #tpu.memory_space<vmem>>, vector<1x128x128xbf16>
    %88 = vector.shape_cast %87 : vector<1x128x128xbf16> to vector<128x128xbf16>
    %c1_62 = arith.constant 1 : index
    %c0_63 = arith.constant 0 : index
    %c0_64 = arith.constant 0 : index
    %89 = vector.load %arg10[%c1_62, %c0_63, %c0_64] : memref<2x128x128xbf16, #tpu.memory_space<vmem>>, vector<1x128x128xbf16>
    %90 = vector.shape_cast %89 : vector<1x128x128xbf16> to vector<128x128xbf16>
    %c7 = arith.constant 7 : index
    %c0_65 = arith.constant 0 : index
    %91 = vector.load %arg12[%c7, %c0_65] : memref<16x128xf32, #tpu.memory_space<vmem>>, vector<1x128xf32>
    %c8 = arith.constant 8 : index
    %c0_66 = arith.constant 0 : index
    %92 = vector.load %arg12[%c8, %c0_66] : memref<16x128xf32, #tpu.memory_space<vmem>>, vector<1x128xf32>
    %c9 = arith.constant 9 : index
    %c0_67 = arith.constant 0 : index
    %93 = vector.load %arg12[%c9, %c0_67] : memref<16x128xf32, #tpu.memory_space<vmem>>, vector<1x128xf32>
    %94 = arith.truncf %41 : vector<128x128xf32> to vector<128x128xbf16>
    %cst_68 = arith.constant dense<0.000000e+00> : vector<128x128xf32>
    %95 = tpu.matmul %94, %88, %cst_68 {dimension_numbers = #tpu.dot_dimension_numbers<[1], [0], [0], [1], [0, 0, 1, 1], [], []>} : vector<128x128xbf16>, vector<128x128xbf16>, vector<128x128xf32> -> vector<128x128xf32>
    %96 = arith.truncf %85 : vector<128x128xf32> to vector<128x128xbf16>
    %cst_69 = arith.constant dense<0.000000e+00> : vector<128x128xf32>
    %97 = tpu.matmul %96, %90, %cst_69 {dimension_numbers = #tpu.dot_dimension_numbers<[1], [0], [0], [1], [0, 0, 1, 1], [], []>} : vector<128x128xbf16>, vector<128x128xbf16>, vector<128x128xf32> -> vector<128x128xf32>
    %cst_70 = arith.constant dense<0.000000e+00> : vector<1x128xf32>
    %98 = tpu.matmul %91, %95, %cst_70 {dimension_numbers = #tpu.dot_dimension_numbers<[1], [1], [0], [0], [0, 0, 1, 0], [], []>} : vector<1x128xf32>, vector<128x128xf32>, vector<1x128xf32> -> vector<1x128xf32>
    %99 = vector.broadcast %92 : vector<1x128xf32> to vector<128x128xf32>
    %100 = arith.mulf %97, %99 : vector<128x128xf32>
    %cst_71 = arith.constant dense<0.000000e+00> : vector<128xf32>
    %101 = vector.multi_reduction <add>, %100, %cst_71 [1] : vector<128x128xf32> to vector<128xf32>
    %102 = vector.shape_cast %101 : vector<128xf32> to vector<128x1xf32>
    %103 = vector.broadcast %102 : vector<128x1xf32> to vector<128x128xf32>
    %104 = vector.broadcast %98 : vector<1x128xf32> to vector<128x128xf32>
    %105 = arith.addf %103, %104 : vector<128x128xf32>
    %cst_72 = arith.constant 0.000000e+00 : f32
    %106 = vector.broadcast %cst_72 : f32 to vector<128x128xf32>
    %107 = arith.cmpf ogt, %105, %106 : vector<128x128xf32>
    %cst_73 = arith.constant 2.000000e-01 : f32
    %108 = vector.broadcast %cst_73 : f32 to vector<128x128xf32>
    %109 = arith.mulf %108, %105 : vector<128x128xf32>
    %110 = arith.select %107, %105, %109 : vector<128x128xi1>, vector<128x128xf32>
    %cst_74 = arith.constant 0.000000e+00 : bf16
    %111 = vector.broadcast %cst_74 : bf16 to vector<128x128xbf16>
    %112 = arith.cmpf ogt, %86, %111 : vector<128x128xbf16>
    %cst_75 = arith.constant -1.000000e+30 : f32
    %113 = vector.broadcast %cst_75 : f32 to vector<128x128xf32>
    %114 = arith.select %112, %110, %113 : vector<128x128xi1>, vector<128x128xf32>
    %cst_76 = arith.constant dense<0xFF800000> : vector<128xf32>
    %115 = vector.multi_reduction <maximumf>, %114, %cst_76 [1] : vector<128x128xf32> to vector<128xf32>
    %116 = vector.shape_cast %115 : vector<128xf32> to vector<128x1xf32>
    %117 = vector.broadcast %116 : vector<128x1xf32> to vector<128x128xf32>
    %118 = arith.subf %114, %117 : vector<128x128xf32>
    %119 = math.exp %118 : vector<128x128xf32>
    %cst_77 = arith.constant 0.000000e+00 : f32
    %120 = vector.broadcast %cst_77 : f32 to vector<128x128xf32>
    %121 = arith.select %112, %119, %120 : vector<128x128xi1>, vector<128x128xf32>
    %cst_78 = arith.constant dense<0.000000e+00> : vector<128xf32>
    %122 = vector.multi_reduction <add>, %121, %cst_78 [1] : vector<128x128xf32> to vector<128xf32>
    %123 = vector.shape_cast %122 : vector<128xf32> to vector<128x1xf32>
    %cst_79 = arith.constant 0.000000e+00 : f32
    %124 = vector.broadcast %cst_79 : f32 to vector<128x1xf32>
    %125 = arith.cmpf ogt, %123, %124 : vector<128x1xf32>
    %126 = tpu.reciprocal %123 {approx = true} : vector<128x1xf32> -> vector<128x1xf32>
    %cst_80 = arith.constant 0.000000e+00 : f32
    %127 = vector.broadcast %cst_80 : f32 to vector<128x1xf32>
    %128 = arith.select %125, %126, %127 : vector<128x1xi1>, vector<128x1xf32>
    %129 = vector.broadcast %128 : vector<128x1xf32> to vector<128x128xf32>
    %130 = arith.mulf %121, %129 : vector<128x128xf32>
    %131 = arith.truncf %130 : vector<128x128xf32> to vector<128x128xbf16>
    %132 = arith.truncf %95 : vector<128x128xf32> to vector<128x128xbf16>
    %cst_81 = arith.constant dense<0.000000e+00> : vector<128x128xf32>
    %133 = tpu.matmul %131, %132, %cst_81 {dimension_numbers = #tpu.dot_dimension_numbers<[1], [0], [0], [1], [0, 0, 1, 1], [], []>} : vector<128x128xbf16>, vector<128x128xbf16>, vector<128x128xf32> -> vector<128x128xf32>
    %134 = vector.broadcast %93 : vector<1x128xf32> to vector<128x128xf32>
    %135 = arith.addf %133, %134 : vector<128x128xf32>
    %cst_82 = arith.constant 0.000000e+00 : f32
    %136 = vector.broadcast %cst_82 : f32 to vector<128x128xf32>
    %137 = arith.maximumf %135, %136 : vector<128x128xf32>
    %c0_83 = arith.constant 0 : index
    %c0_84 = arith.constant 0 : index
    %138 = vector.load %arg7[%c0_83, %c0_84] : memref<128x128xbf16, #tpu.memory_space<vmem>>, vector<128x128xbf16>
    %c4_85 = arith.constant 4 : index
    %c0_86 = arith.constant 0 : index
    %c0_87 = arith.constant 0 : index
    %139 = vector.load %arg9[%c4_85, %c0_86, %c0_87] : memref<5x256x128xbf16, #tpu.memory_space<vmem>>, vector<1x256x128xbf16>
    %140 = vector.shape_cast %139 : vector<1x256x128xbf16> to vector<256x128xbf16>
    %c6 = arith.constant 6 : index
    %c0_88 = arith.constant 0 : index
    %141 = vector.load %arg12[%c6, %c0_88] : memref<16x128xf32, #tpu.memory_space<vmem>>, vector<1x128xf32>
    %142 = arith.truncf %41 : vector<128x128xf32> to vector<128x128xbf16>
    %cst_89 = arith.constant dense<0.000000e+00> : vector<128x128xf32>
    %143 = tpu.matmul %138, %142, %cst_89 {dimension_numbers = #tpu.dot_dimension_numbers<[1], [0], [0], [1], [0, 0, 1, 1], [], []>} : vector<128x128xbf16>, vector<128x128xbf16>, vector<128x128xf32> -> vector<128x128xf32>
    %144 = arith.truncf %143 : vector<128x128xf32> to vector<128x128xbf16>
    %145 = arith.truncf %137 : vector<128x128xf32> to vector<128x128xbf16>
    %146 = tpu.concatenate %144, %145 in 1 : vector<128x128xbf16>, vector<128x128xbf16> -> vector<128x256xbf16>
    %cst_90 = arith.constant dense<0.000000e+00> : vector<128x128xf32>
    %147 = tpu.matmul %146, %140, %cst_90 {dimension_numbers = #tpu.dot_dimension_numbers<[1], [0], [0], [1], [0, 0, 1, 1], [], []>} : vector<128x256xbf16>, vector<256x128xbf16>, vector<128x128xf32> -> vector<128x128xf32>
    %148 = vector.broadcast %141 : vector<1x128xf32> to vector<128x128xf32>
    %149 = arith.addf %147, %148 : vector<128x128xf32>
    %cst_91 = arith.constant 0.000000e+00 : f32
    %150 = vector.broadcast %cst_91 : f32 to vector<128x128xf32>
    %151 = arith.maximumf %149, %150 : vector<128x128xf32>
    %c0_92 = arith.constant 0 : index
    %c0_93 = arith.constant 0 : index
    %152 = vector.load %arg11[%c0_92, %c0_93] : memref<128x128xbf16, #tpu.memory_space<vmem>>, vector<128x128xbf16>
    %153 = arith.truncf %151 : vector<128x128xf32> to vector<128x128xbf16>
    %cst_94 = arith.constant dense<0.000000e+00> : vector<128x128xf32>
    %154 = tpu.matmul %153, %152, %cst_94 {dimension_numbers = #tpu.dot_dimension_numbers<[1], [0], [0], [1], [0, 0, 1, 1], [], []>} : vector<128x128xbf16>, vector<128x128xbf16>, vector<128x128xf32> -> vector<128x128xf32>
    %c10 = arith.constant 10 : index
    %c0_95 = arith.constant 0 : index
    %155 = vector.load %arg12[%c10, %c0_95] : memref<16x128xf32, #tpu.memory_space<vmem>>, vector<1x128xf32>
    %156 = vector.broadcast %155 : vector<1x128xf32> to vector<128x128xf32>
    %157 = arith.addf %154, %156 : vector<128x128xf32>
    %c0_96 = arith.constant 0 : index
    %c0_97 = arith.constant 0 : index
    %158 = vector.load %arg13[%c0_96, %c0_97] : memref<128x128xf32, #tpu.memory_space<vmem>>, vector<128x128xf32>
    tpu.vector_store %arg13[%c0_96, %c0_97], %157 {strides = array<i32>} : memref<128x128xf32, #tpu.memory_space<vmem>>, vector<128x128xf32>,
    return
  }
}

</mosaic_0001>

<bundles_post_ra>
// kernel: common_model_forward.1
= control target key start
LH: loop header
LB: loop body
LE: loop exit
PB: predicated region body
PF: predicated region fallthrough
CT: control target
= control target key end

     0   :  { %18 = vsyncpa [#allocation3], 0  ;;  %s8760_s0 = inlined_call_operand.vmem [shape: bf16[128,128], index: 0, kind: input, shape index: {}]   ;;  %s8761_s1 = inlined_call_operand.vmem [shape: bf16[128,128], index: 1, kind: input, shape index: {}]   ;;  %s8762_s2 = inlined_call_operand.vmem [shape: bf16[128,128], index: 2, kind: input, shape index: {}]   ;;  %s8763_s3 = inlined_call_operand.vmem [shape: bf16[128,128], index: 3, kind: input, shape index: {}]   ;;  %s8764_s4 = inlined_call_operand.vmem [shape: bf16[128,128], index: 4, kind: input, shape index: {}]   ;;  %s8765_s5 = inlined_call_operand.vmem [shape: bf16[128,128], index: 5, kind: input, shape index: {}]   ;;  %s8766_s6 = inlined_call_operand.vmem [shape: bf16[128,128], index: 6, kind: input, shape index: {}]   ;;  %s8767_s7 = inlined_call_operand.vmem [shape: bf16[128,128], index: 7, kind: input, shape index: {}]   ;;  %s8768_s8 = inlined_call_operand.vmem [shape: bf16[896,128], index: 8, kind: input, shape index: {}]   ;;  %s8769_s9 = inlined_call_operand.vmem [shape: bf16[5,256,128], index: 9, kind: input, shape index: {}]   ;;  %s8770_s10 = inlined_call_operand.hbm [shape: bf16[2,128,128], index: 10, kind: input, shape index: {}]   ;;  %s8771_s11 = inlined_call_operand.vmem [shape: bf16[128,128], index: 11, kind: input, shape index: {}]   ;;  %s8772_s12 = inlined_call_operand.hbm [shape: f32[16,128], index: 12, kind: input, shape index: {}]   ;;  %s8773_s13 = inlined_call_operand.vmem [shape: f32[128,128], index: 13, kind: output, shape index: {}]  }
   0x1   :  { %19 = vsyncpa [#allocation5], 0  ;;  %s6882_s25 = smov [#allocation2]   ;;  %s6834_s29 = scalar_lea.hbm %s8770_s10, 2048 }
   0x2   :  { %s45_s26 = sshll.u32 %s6882_s25, 4  ;;  %p6835_p0 = scmp.ne.s32.totalorder %s8770_s10, %s6834_s29  ;;  %s46_s26 = int_to_ptr.vmem [resolvable:$true] %s45_s26 }
   0x3   :  { %p6838_p1 = scmp.lt.u32.totalorder %s6834_s29, %s8770_s10 }
   0x5   :  { %p6840_p2 = pnand %p6838_p1, %p6835_p0 }
   0x7   :  { %6843 = shalt.err (!%p6840_p2)
}
   0x8   :  { %s6844_s17 = scalar_lea.vmem %s46_s26, 2048  ;;  %p6849_p4 = scmp.lt.s32.totalorder %s46_s26, %s46_s26 }
   0x9   :  { %p6845_p3 = scmp.ne.s32.totalorder %s46_s26, %s6844_s17  ;;  %p6850_p5 = scmp.lt.s32.totalorder %s6844_s17, %s6844_s17 }
   0xb   :  { %p6851_p6 = por %p6850_p5, %p6849_p4 }
   0xd   :  { %p6852_p7 = pnand %p6851_p6, %p6845_p3 }
   0xf   :  { %6855 = shalt.err (!%p6852_p7)
}
  0x10   :  { %s6883_s18 = smov 64   ;;  %s6884_s19 = smov 4  }
  0x11   :  { %51 = dma.hbm_to_vmem [thread:$0]  %s8770_s10, 2048, %s46_s26, [#allocation3], %s6883_s18, %s6883_s18, %s6884_s19  }
  0x12   :  { %s6885_s22 = smov [#allocation4]   ;;  %s6856_s27 = scalar_lea.hbm %s8772_s12, 256 }
  0x13   :  { %s59_s23 = sshll.u32 %s6885_s22, 4  ;;  %p6857_p8 = scmp.ne.s32.totalorder %s8772_s12, %s6856_s27  ;;  %s60_s23 = int_to_ptr.vmem [resolvable:$true] %s59_s23 }
  0x14   :  { %p6860_p9 = scmp.lt.u32.totalorder %s6856_s27, %s8772_s12 }
  0x16   :  { %p6862_p10 = pnand %p6860_p9, %p6857_p8 }
  0x18   :  { %6865 = shalt.err (!%p6862_p10)
}
  0x19   :  { %s6866_s15 = scalar_lea.vmem %s60_s23, 256  ;;  %p6871_p12 = scmp.lt.s32.totalorder %s60_s23, %s60_s23 }
  0x1a   :  { %p6867_p11 = scmp.ne.s32.totalorder %s60_s23, %s6866_s15  ;;  %p6872_p13 = scmp.lt.s32.totalorder %s6866_s15, %s6866_s15 }
  0x1c   :  { %p6873_p0 = por %p6872_p13, %p6871_p12 }
  0x1e   :  { %p6874_p1 = pnand %p6873_p0, %p6867_p11 }
  0x20   :  { %6877 = shalt.err (!%p6874_p1)
}
  0x21   :  { %s6886_s10 = smov 128   ;;  %s6887_s26 = smov 8  }
  0x22   :  { %65 = dma.hbm_to_vmem [thread:$0]  %s8772_s12, 256, %s60_s23, [#allocation5], %s6886_s10, %s6886_s10, %s6887_s26  }
  0x23   :  { %6878 = dma.done.wait [#allocation3], 2048  }
  0x24   :  { %6879 = vsyncadd [#allocation3], 4294965248 }
  0x25   :  { %6880 = dma.done.wait [#allocation5], 256  }
  0x26   :  { %6881 = vsyncadd [#allocation5], 4294967040  ;;  %v6546_v0 = vld [vmem:[%s8760_s0] sm:$0xff]   ;;  %v6547_v1 = vld [vmem:[%s8760_s0 + $0x8] sm:$0xff]   ;;  %vm6889_vm0 = vmmov 0  }
  0x27   :  { %5997 = vmatprep.subr.bf16.mxu0 %v6546_v0  ;;  %v6548_v2 = vld [vmem:[%s8760_s0 + $0x10] sm:$0xff]   ;;  %v6549_v3 = vld [vmem:[%s8760_s0 + $0x18] sm:$0xff]   ;;  %v6554_v4 = vld [vmem:[%s8762_s2] sm:$0xff]  }
  0x28   :  { %5998 = vmatpush3.bf16.msra.mxu0 %v6546_v0  ;;  %6013 = vmatprep.mubr.bf16.mxu0 %v6554_v4  ;;  %v6550_v5 = vld [vmem:[%s8760_s0 + $0x20] sm:$0xff]   ;;  %v6551_v6 = vld [vmem:[%s8760_s0 + $0x28] sm:$0xff]   ;;  %v6552_v7 = vld [vmem:[%s8760_s0 + $0x30] sm:$0xff]  }
  0x29   :  { %5999 = vmatprep.subr.bf16.mxu0 %v6547_v1  ;;  %6045 = vmatprep.mubr.bf16.mxu1 %v6554_v4  ;;  %v6553_v8 = vld [vmem:[%s8760_s0 + $0x38] sm:$0xff]   ;;  %v7016_v9 = vld [vmem:[%s8762_s2 + $0x8] sm:$0xff]   ;;  %v6562_v10 = vld [vmem:[%s8768_s8 + $0x40] sm:$0xff]  }
  0x2a   :  { %v7024_v11 = vld [vmem:[%s8762_s2 + $0x10] sm:$0xff]   ;;  %v6563_v12 = vld [vmem:[%s8768_s8] sm:$0xff]   ;;  %v6564_v13 = vld [vmem:[%s8768_s8 + $0x48] sm:$0xff]  }
  0x2b   :  { %v6565_v14 = vld [vmem:[%s8768_s8 + $0x8] sm:$0xff]   ;;  %v6566_v15 = vld [vmem:[%s8768_s8 + $0x50] sm:$0xff]   ;;  %v7043_v16 = vld [vmem:[%s8762_s2 + $0x18] sm:$0xff]  }
  0x2c   :  { %6000 = vmatpush3.bf16.msra.mxu0 %v6547_v1  ;;  %v7048_v17 = vld [vmem:[%s8762_s2 + $0x20] sm:$0xff]   ;;  %v6567_v18 = vld [vmem:[%s8768_s8 + $0x10] sm:$0xff]   ;;  %v6568_v19 = vld [vmem:[%s8768_s8 + $0x58] sm:$0xff]  }
  0x2d   :  { %6001 = vmatprep.subr.bf16.mxu0 %v6548_v2  ;;  %v6569_v20 = vld [vmem:[%s8768_s8 + $0x18] sm:$0xff]   ;;  %v6570_v21 = vld [vmem:[%s8768_s8 + $0x60] sm:$0xff]   ;;  %v7067_v22 = vld [vmem:[%s8762_s2 + $0x28] sm:$0xff]  }
  0x2e   :  { %v7072_v23 = vld [vmem:[%s8762_s2 + $0x30] sm:$0xff]   ;;  %v6571_v24 = vld [vmem:[%s8768_s8 + $0x20] sm:$0xff]   ;;  %v6572_v25 = vld [vmem:[%s8768_s8 + $0x68] sm:$0xff]  }
  0x2f   :  { %v6573_v26 = vld [vmem:[%s8768_s8 + $0x28] sm:$0xff]   ;;  %v6574_v27 = vld [vmem:[%s8768_s8 + $0x70] sm:$0xff]   ;;  %v7091_v28 = vld [vmem:[%s8762_s2 + $0x38] sm:$0xff]  }
  0x30   :  { %6002 = vmatpush3.bf16.msra.mxu0 %v6548_v2  ;;  %v6575_v29 = vld [vmem:[%s8768_s8 + $0x30] sm:$0xff]   ;;  %v6576_v30 = vld [vmem:[%s8768_s8 + $0x78] sm:$0xff]   ;;  %v6826_v38 = vld [vmem:[%s8760_s0] sm:$0xff]  }
  0x31   :  { %6003 = vmatprep.subr.bf16.mxu0 %v6549_v3  ;;  %v6577_v31 = vld [vmem:[%s8768_s8 + $0x38] sm:$0xff]   ;;  %v6827_v45 = vld [vmem:[%s8760_s0 + $0x8] sm:$0xff]   ;;  %v6828_v52 = vld [vmem:[%s8760_s0 + $0x10] sm:$0xff]  }
  0x32   :  { %v6829_v59 = vld [vmem:[%s8760_s0 + $0x18] sm:$0xff]   ;;  %v6578_v60 = vld [vmem:[%s8768_s8 + $0x80] sm:$0xff]   ;;  %v6579_v61 = vld [vmem:[%s8768_s8 + $0x88] sm:$0xff]  }
  0x33   :  { %v6830_v62 = vld [vmem:[%s8760_s0 + $0x20] sm:$0xff]   ;;  %v6580_v63 = vld [vmem:[%s8768_s8 + $0x90] sm:$0xff]   ;;  %v6581_v0 = vld [vmem:[%s8768_s8 + $0x98] sm:$0xff]  }
  0x34   :  { %6004 = vmatpush3.bf16.msra.mxu0 %v6549_v3  ;;  %v6831_v1 = vld [vmem:[%s8760_s0 + $0x28] sm:$0xff]   ;;  %v6582_v2 = vld [vmem:[%s8768_s8 + $0xa0] sm:$0xff]   ;;  %v6832_v4 = vld [vmem:[%s8760_s0 + $0x30] sm:$0xff]  }
  0x35   :  { %6005 = vmatprep.subr.bf16.mxu0 %v6550_v5  ;;  %v6583_v3 = vld [vmem:[%s8768_s8 + $0xa8] sm:$0xff]  }
  0x38   :  { %6006 = vmatpush3.bf16.msra.mxu0 %v6550_v5  ;;  %v6584_v5 = vld [vmem:[%s8768_s8 + $0xb0] sm:$0xff]  }
  0x39   :  { %6007 = vmatprep.subr.bf16.mxu0 %v6551_v6 }
  0x3c   :  { %6008 = vmatpush3.bf16.msra.mxu0 %v6551_v6  ;;  %v6833_v6 = vld [vmem:[%s8760_s0 + $0x38] sm:$0xff]  }
  0x3d   :  { %6009 = vmatprep.subr.bf16.mxu0 %v6552_v7 }
  0x40   :  { %6010 = vmatpush3.bf16.msra.mxu0 %v6552_v7  ;;  %v6585_v7 = vld [vmem:[%s8768_s8 + $0xb8] sm:$0xff]  }
  0x41   :  { %6011 = vmatprep.subr.bf16.mxu0 %v6553_v8 }
  0x44   :  { %6012 = vmatpush3.bf16.msra.mxu0 %v6553_v8 }
  0x45   :  { %5260 = vmatprep.subr.bf16.mxu0 %v6562_v10 }
  0x47   :  { %6014 = vmatmul.mubr.bf16.vlgmr.msra.gmra.mrb[0].mxu0 %v7016_v9 }
  0x48   :  { %6017 = vmatprep.mubr.bf16.mxu0 %v7024_v11  ;;  %5261 = vmatpush3.bf16.msra.mxu0 %v6563_v12 }
  0x49   :  { %5262 = vmatprep.subr.bf16.mxu0 %v6564_v13 }
  0x4c   :  { %5263 = vmatpush3.bf16.msra.mxu0 %v6565_v14 }
  0x4d   :  { %5264 = vmatprep.subr.bf16.mxu0 %v6566_v15 }
  0x4f   :  { %6018 = vmatmul.mubr.bf16.gmra.mrb[4].mxu0 %v7043_v16 }
  0x50   :  { %6021 = vmatprep.mubr.bf16.mxu0 %v7048_v17  ;;  %5265 = vmatpush3.bf16.msra.mxu0 %v6567_v18 }
  0x51   :  { %5266 = vmatprep.subr.bf16.mxu0 %v6568_v19 }
  0x54   :  { %5267 = vmatpush3.bf16.msra.mxu0 %v6569_v20 }
  0x55   :  { %5268 = vmatprep.subr.bf16.mxu0 %v6570_v21 }
  0x57   :  { %6022 = vmatmul.mubr.bf16.gmra.mrb[8].mxu0 %v7067_v22 }
  0x58   :  { %6025 = vmatprep.mubr.bf16.mxu0 %v7072_v23  ;;  %5269 = vmatpush3.bf16.msra.mxu0 %v6571_v24 }
  0x59   :  { %5270 = vmatprep.subr.bf16.mxu0 %v6572_v25 }
  0x5c   :  { %5271 = vmatpush3.bf16.msra.mxu0 %v6573_v26 }
  0x5d   :  { %5272 = vmatprep.subr.bf16.mxu0 %v6574_v27 }
  0x5f   :  { %6026 = vmatmul.mubr.bf16.gmra.mrb[12].mxu0 %v7091_v28 }
  0x60   :  { %5273 = vmatpush3.bf16.msra.mxu0 %v6575_v29 }
  0x61   :  { %5274 = vmatprep.subr.bf16.mxu0 %v6576_v30 }
  0x64   :  { %5275 = vmatpush3.bf16.msra.mxu0 %v6577_v31 }
 0x11a   :  { %v6015_v32 = vpop.f32.mrb[0].mxu0 }
 0x11b   :  { %v286_v33 = vpop.f32.mrb[1].mxu0 }
 0x11c   :  { %v6016_v34 = vpop.f32.mrb[2].mxu0 }
 0x11d   :  { %v350_v35 = vpack.c.bf16 %v6016_v34, %v6015_v32  ;;  %v289_v36 = vpop.f32.mrb[3].mxu0 }
 0x11e   :  { %v349_v37 = vpack.c.bf16 %v289_v36, %v286_v33 }
 0x120   :  { %6029 = vmatprep.subr.bf16.mxu1 %v349_v37  ;;  %642 = vmatprep.mubr.bf16.mxu0 %v349_v37 }
 0x121   :  { %6030 = vmatpush3.bf16.msra.mxu1 %v349_v37  ;;  %643 = vmatmul.mubr.bf16.vlgmr.msra.gmra.mrb[16].mxu0 %v6826_v38 }
 0x122   :  { %v6019_v39 = vpop.f32.mrb[4].mxu0  ;;  %6031 = vmatprep.subr.bf16.mxu1 %v350_v35  ;;  %650 = vmatprep.mubr.bf16.mxu0 %v350_v35 }
 0x123   :  { %v302_v40 = vpop.f32.mrb[5].mxu0 }
 0x124   :  { %v6020_v41 = vpop.f32.mrb[6].mxu0 }
 0x125   :  { %v352_v42 = vpack.c.bf16 %v6020_v41, %v6019_v39  ;;  %v305_v43 = vpop.f32.mrb[7].mxu0  ;;  %6032 = vmatpush3.bf16.msra.mxu1 %v350_v35 }
 0x126   :  { %v351_v44 = vpack.c.bf16 %v305_v43, %v302_v40 }
 0x128   :  { %6033 = vmatprep.subr.bf16.mxu1 %v351_v44 }
 0x129   :  { %6034 = vmatpush3.bf16.msra.mxu1 %v351_v44  ;;  %651 = vmatmul.mubr.bf16.gmra.mrb[20].mxu0 %v6827_v45 }
 0x12a   :  { %v6023_v46 = vpop.f32.mrb[8].mxu0  ;;  %6035 = vmatprep.subr.bf16.mxu1 %v352_v42  ;;  %658 = vmatprep.mubr.bf16.mxu0 %v351_v44 }
 0x12b   :  { %v318_v47 = vpop.f32.mrb[9].mxu0 }
 0x12c   :  { %v6024_v48 = vpop.f32.mrb[10].mxu0 }
 0x12d   :  { %v354_v49 = vpack.c.bf16 %v6024_v48, %v6023_v46  ;;  %v321_v50 = vpop.f32.mrb[11].mxu0  ;;  %6036 = vmatpush3.bf16.msra.mxu1 %v352_v42 }
 0x12e   :  { %v353_v51 = vpack.c.bf16 %v321_v50, %v318_v47 }
 0x130   :  { %6037 = vmatprep.subr.bf16.mxu1 %v353_v51 }
 0x131   :  { %6038 = vmatpush3.bf16.msra.mxu1 %v353_v51  ;;  %659 = vmatmul.mubr.bf16.gmra.mrb[24].mxu0 %v6828_v52 }
 0x132   :  { %v6027_v53 = vpop.f32.mrb[12].mxu0  ;;  %6039 = vmatprep.subr.bf16.mxu1 %v354_v49  ;;  %666 = vmatprep.mubr.bf16.mxu0 %v352_v42 }
 0x133   :  { %v334_v54 = vpop.f32.mrb[13].mxu0 }
 0x134   :  { %v6028_v55 = vpop.f32.mrb[14].mxu0 }
 0x135   :  { %v356_v56 = vpack.c.bf16 %v6028_v55, %v6027_v53  ;;  %v337_v57 = vpop.f32.mrb[15].mxu0  ;;  %6040 = vmatpush3.bf16.msra.mxu1 %v354_v49 }
 0x136   :  { %v355_v58 = vpack.c.bf16 %v337_v57, %v334_v54 }
 0x138   :  { %6041 = vmatprep.subr.bf16.mxu1 %v355_v58 }
 0x139   :  { %6042 = vmatpush3.bf16.msra.mxu1 %v355_v58  ;;  %667 = vmatmul.mubr.bf16.gmra.mrb[28].mxu0 %v6829_v59 }
 0x13a   :  { %6043 = vmatprep.subr.bf16.mxu1 %v356_v56  ;;  %674 = vmatprep.mubr.bf16.mxu0 %v353_v51 }
 0x13d   :  { %6044 = vmatpush3.bf16.msra.mxu1 %v356_v56 }
 0x13e   :  { %6061 = vmatprep.subr.bf16.mxu1 %v6578_v60 }
 0x140   :  { %6046 = vmatmul.mubr.bf16.vlgmr.msra.gmra.mrb[0].mxu1 %v7016_v9 }
 0x141   :  { %675 = vmatmul.mubr.bf16.gmra.mrb[32].mxu0 %v6830_v62  ;;  %6049 = vmatprep.mubr.bf16.mxu1 %v7024_v11 }
 0x142   :  { %682 = vmatprep.mubr.bf16.mxu0 %v354_v49  ;;  %6062 = vmatpush3.bf16.msra.mxu1 %v6578_v60 }
 0x143   :  { %6063 = vmatprep.subr.bf16.mxu1 %v6579_v61 }
 0x146   :  { %6064 = vmatpush3.bf16.msra.mxu1 %v6579_v61 }
 0x147   :  { %6065 = vmatprep.subr.bf16.mxu1 %v6580_v63 }
 0x148   :  { %6050 = vmatmul.mubr.bf16.gmra.mrb[4].mxu1 %v7043_v16 }
 0x149   :  { %683 = vmatmul.mubr.bf16.gmra.mrb[36].mxu0 %v6831_v1  ;;  %6053 = vmatprep.mubr.bf16.mxu1 %v7048_v17 }
 0x14a   :  { %690 = vmatprep.mubr.bf16.mxu0 %v355_v58  ;;  %6066 = vmatpush3.bf16.msra.mxu1 %v6580_v63 }
 0x14b   :  { %6067 = vmatprep.subr.bf16.mxu1 %v6581_v0 }
 0x14e   :  { %6068 = vmatpush3.bf16.msra.mxu1 %v6581_v0 }
 0x14f   :  { %6069 = vmatprep.subr.bf16.mxu1 %v6582_v2 }
 0x150   :  { %6054 = vmatmul.mubr.bf16.gmra.mrb[8].mxu1 %v7067_v22 }
 0x151   :  { %691 = vmatmul.mubr.bf16.gmra.mrb[40].mxu0 %v6832_v4  ;;  %6057 = vmatprep.mubr.bf16.mxu1 %v7072_v23 }
 0x152   :  { %698 = vmatprep.mubr.bf16.mxu0 %v356_v56  ;;  %6070 = vmatpush3.bf16.msra.mxu1 %v6582_v2 }
 0x153   :  { %6071 = vmatprep.subr.bf16.mxu1 %v6583_v3 }
 0x156   :  { %6072 = vmatpush3.bf16.msra.mxu1 %v6583_v3 }
 0x157   :  { %6073 = vmatprep.subr.bf16.mxu1 %v6584_v5 }
 0x158   :  { %6058 = vmatmul.mubr.bf16.gmra.mrb[12].mxu1 %v7091_v28 }
 0x159   :  { %699 = vmatmul.mubr.bf16.gmra.mrb[44].mxu0 %v6833_v6 }
 0x15a   :  { %6074 = vmatpush3.bf16.msra.mxu1 %v6584_v5 }
 0x15b   :  { %6075 = vmatprep.subr.bf16.mxu1 %v6585_v7 }
 0x15e   :  { %6076 = vmatpush3.bf16.msra.mxu1 %v6585_v7 }
 0x1f4   :  { %v5276_v8 = vpop.f32.mrb[16].mxu0 }
 0x1f5   :  { %v5277_v9 = vpop.f32.mrb[17].mxu0 }
 0x1f6   :  { %v7158_v10 = vadd.f32 %v5277_v9, %v5276_v8  ;;  %v5279_v11 = vpop.f32.mrb[18].mxu0 }
 0x1f7   :  { %v5280_v12 = vpop.f32.mrb[19].mxu0 }
 0x1f8   :  { %v7160_v13 = vadd.f32 %v5280_v12, %v5279_v11 }
 0x1fc   :  { %v5282_v14 = vpop.f32.mrb[20].mxu0 }
 0x1fd   :  { %v5283_v15 = vpop.f32.mrb[21].mxu0 }
 0x1fe   :  { %v7162_v16 = vadd.f32 %v5283_v15, %v5282_v14  ;;  %v5285_v17 = vpop.f32.mrb[22].mxu0 }
 0x1ff   :  { %v5286_v18 = vpop.f32.mrb[23].mxu0 }
 0x200   :  { %v7164_v19 = vadd.f32 %v5286_v18, %v5285_v17 }
 0x204   :  { %v5288_v20 = vpop.f32.mrb[24].mxu0 }
 0x205   :  { %v5289_v21 = vpop.f32.mrb[25].mxu0 }
 0x206   :  { %v7166_v22 = vadd.f32 %v5289_v21, %v5288_v20  ;;  %v5291_v23 = vpop.f32.mrb[26].mxu0  ;;  %v7193_v20 = vld [vmem:[%s8763_s3] sm:$0xff]  }
 0x207   :  { %v5292_v24 = vpop.f32.mrb[27].mxu0  ;;  %v6594_v21 = vld [vmem:[%s8769_s9 + $0x40] sm:$0xff]  }
 0x208   :  { %v7168_v25 = vadd.f32 %v5292_v24, %v5291_v23  ;;  %v6595_v23 = vld [vmem:[%s8769_s9] sm:$0xff]   ;;  %v6596_v24 = vld [vmem:[%s8769_s9 + $0x48] sm:$0xff]   ;;  %5356 = vmatprep.subr.bf16.mxu0 %v6594_v21 }
 0x209   :  { %5357 = vmatpush3.bf16.msra.mxu0 %v6595_v23 }
 0x20a   :  { %5358 = vmatprep.subr.bf16.mxu0 %v6596_v24 }
 0x20c   :  { %v5294_v26 = vpop.f32.mrb[28].mxu0 }
 0x20d   :  { %v5295_v27 = vpop.f32.mrb[29].mxu0 }
 0x20e   :  { %v7170_v28 = vadd.f32 %v5295_v27, %v5294_v26  ;;  %v5297_v29 = vpop.f32.mrb[30].mxu0  ;;  %v6597_v26 = vld [vmem:[%s8769_s9 + $0x8] sm:$0xff]   ;;  %v6598_v27 = vld [vmem:[%s8769_s9 + $0x50] sm:$0xff]  }
 0x20f   :  { %v5298_v30 = vpop.f32.mrb[31].mxu0  ;;  %5359 = vmatpush3.bf16.msra.mxu0 %v6597_v26 }
 0x210   :  { %v7172_v31 = vadd.f32 %v5298_v30, %v5297_v29  ;;  %v6599_v29 = vld [vmem:[%s8769_s9 + $0x10] sm:$0xff]   ;;  %5360 = vmatprep.subr.bf16.mxu0 %v6598_v27  ;;  %v6600_v30 = vld [vmem:[%s8769_s9 + $0x58] sm:$0xff]  }
 0x213   :  { %v6047_v32 = vpop.f32.mrb[0].mxu1  ;;  %5361 = vmatpush3.bf16.msra.mxu0 %v6599_v29 }
 0x214   :  { %v391_v33 = vpop.f32.mrb[1].mxu1  ;;  %v5300_v34 = vpop.f32.mrb[32].mxu0  ;;  %5362 = vmatprep.subr.bf16.mxu0 %v6600_v30 }
 0x215   :  { %v6048_v35 = vpop.f32.mrb[2].mxu1  ;;  %v5301_v36 = vpop.f32.mrb[33].mxu0 }
 0x216   :  { %v455_v37 = vpack.c.bf16 %v6048_v35, %v6047_v32  ;;  %v394_v38 = vpop.f32.mrb[3].mxu1  ;;  %v7174_v39 = vadd.f32 %v5301_v36, %v5300_v34  ;;  %v5303_v40 = vpop.f32.mrb[34].mxu0  ;;  %v6601_v32 = vld [vmem:[%s8769_s9 + $0x18] sm:$0xff]   ;;  %v6603_v34 = vld [vmem:[%s8769_s9 + $0x20] sm:$0xff]   ;;  %v6604_v35 = vld [vmem:[%s8769_s9 + $0x68] sm:$0xff]  }
 0x217   :  { %v454_v41 = vpack.c.bf16 %v394_v38, %v391_v33  ;;  %v5304_v42 = vpop.f32.mrb[35].mxu0  ;;  %v6602_v33 = vld [vmem:[%s8769_s9 + $0x60] sm:$0xff]   ;;  %5363 = vmatpush3.bf16.msra.mxu0 %v6601_v32  ;;  %v6605_v36 = vld [vmem:[%s8769_s9 + $0x28] sm:$0xff]   ;;  %v6607_v38 = vld [vmem:[%s8769_s9 + $0x30] sm:$0xff]  }
 0x218   :  { %v7176_v43 = vadd.f32 %v5304_v42, %v5303_v40  ;;  %5364 = vmatprep.subr.bf16.mxu0 %v6602_v33  ;;  %v7238_v40 = vld [vmem:[#allocation4] ss:$0 sm:$0xff] }
 0x219   :  { %6077 = vmatprep.mubr.bf16.mxu1 %v454_v41  ;;  %v653_v41 = vadd.f32 %v7162_v16, %v7238_v40 }
 0x21a   :  { %6078 = vmatmul.mubr.bf16.vlgmr.msra.gmra.mrb[16].mxu1 %v455_v37  ;;  %v6606_v37 = vld [vmem:[%s8769_s9 + $0x70] sm:$0xff]   ;;  %v680_v27 = vadd.f32 %v7176_v43, %v7238_v40 }
 0x21b   :  { %v6051_v44 = vpop.f32.mrb[4].mxu1  ;;  %5365 = vmatpush3.bf16.msra.mxu0 %v6603_v34 }
 0x21c   :  { %v407_v45 = vpop.f32.mrb[5].mxu1  ;;  %v5306_v62 = vpop.f32.mrb[36].mxu0  ;;  %5366 = vmatprep.subr.bf16.mxu0 %v6604_v35 }
 0x21d   :  { %v6052_v46 = vpop.f32.mrb[6].mxu1  ;;  %v5307_v63 = vpop.f32.mrb[37].mxu0 }
 0x21e   :  { %v457_v47 = vpack.c.bf16 %v6052_v46, %v6051_v44  ;;  %v410_v48 = vpop.f32.mrb[7].mxu1  ;;  %v5309_v0 = vpop.f32.mrb[38].mxu0  ;;  %v7178_v1 = vadd.f32 %v5307_v63, %v5306_v62  ;;  %v645_v44 = vadd.f32 %v7158_v10, %v7238_v40  ;;  %v669_v10 = vadd.f32 %v7170_v28, %v7238_v40 }
 0x21f   :  { %v456_v49 = vpack.c.bf16 %v410_v48, %v407_v45  ;;  %v5310_v2 = vpop.f32.mrb[39].mxu0  ;;  %5367 = vmatpush3.bf16.msra.mxu0 %v6605_v36 }
 0x220   :  { %v7180_v3 = vadd.f32 %v5310_v2, %v5309_v0  ;;  %5368 = vmatprep.subr.bf16.mxu0 %v6606_v37  ;;  %v664_v0 = vadd.f32 %v7168_v25, %v7238_v40 }
 0x221   :  { %6081 = vmatprep.mubr.bf16.mxu1 %v456_v49 }
 0x222   :  { %6082 = vmatmul.mubr.bf16.gmra.mrb[20].mxu1 %v457_v47  ;;  %v656_v47 = vadd.f32 %v7164_v19, %v7238_v40  ;;  %v661_v19 = vadd.f32 %v7166_v22, %v7238_v40  ;;  %v688_v23 = vadd.f32 %v7180_v3, %v7238_v40 }
 0x223   :  { %v6055_v50 = vpop.f32.mrb[8].mxu1  ;;  %5369 = vmatpush3.bf16.msra.mxu0 %v6607_v38 }
 0x224   :  { %v423_v51 = vpop.f32.mrb[9].mxu1  ;;  %v5312_v4 = vpop.f32.mrb[40].mxu0 }
 0x225   :  { %v6056_v52 = vpop.f32.mrb[10].mxu1  ;;  %v5313_v5 = vpop.f32.mrb[41].mxu0 }
 0x226   :  { %v459_v53 = vpack.c.bf16 %v6056_v52, %v6055_v50  ;;  %v426_v54 = vpop.f32.mrb[11].mxu1  ;;  %v5315_v6 = vpop.f32.mrb[42].mxu0  ;;  %v7182_v7 = vadd.f32 %v5313_v5, %v5312_v4  ;;  %v648_v50 = vadd.f32 %v7160_v13, %v7238_v40  ;;  %v672_v13 = vadd.f32 %v7172_v31, %v7238_v40 }
 0x227   :  { %v458_v55 = vpack.c.bf16 %v426_v54, %v423_v51  ;;  %v5316_v8 = vpop.f32.mrb[43].mxu0  ;;  %v685_v31 = vadd.f32 %v7178_v1, %v7238_v40 }
 0x228   :  { %v7184_v9 = vadd.f32 %v5316_v8, %v5315_v6  ;;  %v693_v38 = vadd.f32 %v7182_v7, %v7238_v40 }
 0x229   :  { %6085 = vmatprep.mubr.bf16.mxu1 %v458_v55 }
 0x22a   :  { %6086 = vmatmul.mubr.bf16.gmra.mrb[24].mxu1 %v459_v53 }
 0x22b   :  { %v6059_v56 = vpop.f32.mrb[12].mxu1 }
 0x22c   :  { %v439_v57 = vpop.f32.mrb[13].mxu1  ;;  %v5318_v11 = vpop.f32.mrb[44].mxu0 }
 0x22d   :  { %v6060_v58 = vpop.f32.mrb[14].mxu1  ;;  %v5319_v12 = vpop.f32.mrb[45].mxu0 }
 0x22e   :  { %v461_v59 = vpack.c.bf16 %v6060_v58, %v6059_v56  ;;  %v442_v60 = vpop.f32.mrb[15].mxu1  ;;  %v7186_v14 = vadd.f32 %v5319_v12, %v5318_v11  ;;  %v5321_v15 = vpop.f32.mrb[46].mxu0 }
 0x22f   :  { %v460_v61 = vpack.c.bf16 %v442_v60, %v439_v57  ;;  %v5322_v17 = vpop.f32.mrb[47].mxu0 }
 0x230   :  { %v7188_v18 = vadd.f32 %v5322_v17, %v5321_v15  ;;  %v677_v15 = vadd.f32 %v7174_v39, %v7238_v40  ;;  %v701_v33 = vadd.f32 %v7186_v14, %v7238_v40  ;;  %v696_v14 = vadd.f32 %v7184_v9, %v7238_v40  ;;  %v7302_v9 = vld [vmem:[%s8763_s3 + $0x8] sm:$0xff]  }
 0x231   :  { %6089 = vmatprep.mubr.bf16.mxu1 %v460_v61 }
 0x232   :  { %6090 = vmatmul.mubr.bf16.gmra.mrb[28].mxu1 %v461_v59  ;;  %v704_v43 = vadd.f32 %v7188_v18, %v7238_v40  ;;  %v7308_v40 = vld [vmem:[%s8763_s3 + $0x10] sm:$0xff]  }
 0x233   :  { %6109 = vmatprep.mubr.bf16.mxu1 %v7193_v20 }
 0x2ed   :  { %v6079_v42 = vpop.f32.mrb[16].mxu1 }
 0x2ee   :  { %v750_v45 = vadd.f32 %v6079_v42, %v653_v41  ;;  %v741_v46 = vpop.f32.mrb[17].mxu1 }
 0x2ef   :  { %v742_v48 = vadd.f32 %v741_v46, %v645_v44  ;;  %v6080_v49 = vpop.f32.mrb[18].mxu1 }
 0x2f0   :  { %v753_v51 = vadd.f32 %v6080_v49, %v656_v47  ;;  %v744_v52 = vpop.f32.mrb[19].mxu1  ;;  %v806_v54 = vmax.f32 %v750_v45, 0.0 }
 0x2f1   :  { %v745_v53 = vadd.f32 %v744_v52, %v648_v50  ;;  %v804_v16 = vmax.f32 %v742_v48, 0.0 }
 0x2f2   :  { %v807_v55 = vmax.f32 %v753_v51, 0.0 }
 0x2f3   :  { %v805_v56 = vmax.f32 %v745_v53, 0.0  ;;  %v7315_v53 = vld [vmem:[%s8763_s3 + $0x18] sm:$0xff]  }
 0x2f4   :  { %v7248_v57 = vpack.c.bf16 %v807_v55, %v806_v54  ;;  %v7320_v54 = vld [vmem:[%s8763_s3 + $0x20] sm:$0xff]   ;;  %v7327_v55 = vld [vmem:[%s8763_s3 + $0x28] sm:$0xff]  }
 0x2f5   :  { %v869_v58 = vpack.c.bf16 %v805_v56, %v804_v16  ;;  %v6083_v59 = vpop.f32.mrb[20].mxu1  ;;  %v7332_v16 = vld [vmem:[%s8763_s3 + $0x30] sm:$0xff]   ;;  %v7339_v56 = vld [vmem:[%s8763_s3 + $0x38] sm:$0xff]  }
 0x2f6   :  { %v766_v60 = vadd.f32 %v6083_v59, %v669_v10  ;;  %v757_v61 = vpop.f32.mrb[21].mxu1  ;;  %v6608_v10 = vld [vmem:[%s8769_s9 + $0x78] sm:$0xff]   ;;  %v7352_v59 = vld [vmem:[%s8761_s1] sm:$0xff]  }
 0x2f7   :  { %v758_v62 = vadd.f32 %v757_v61, %v661_v19  ;;  %v6084_v63 = vpop.f32.mrb[22].mxu1  ;;  %6093 = vmatprep.subr.bf16.mxu1 %v869_v58  ;;  %1162 = vmatprep.mubr.bf16.mxu0 %v869_v58 }
 0x2f8   :  { %v769_v2 = vadd.f32 %v6084_v63, %v672_v13  ;;  %v760_v4 = vpop.f32.mrb[23].mxu1  ;;  %6094 = vmatpush3.bf16.msra.mxu1 %v869_v58  ;;  %v810_v5 = vmax.f32 %v766_v60, 0.0  ;;  %v6609_v58 = vld [vmem:[%s8769_s9 + $0x38] sm:$0xff]   ;;  %5370 = vmatprep.subr.bf16.mxu0 %v6608_v10  ;;  %v7358_v63 = vld [vmem:[%s8761_s1 + $0x8] sm:$0xff]  }
 0x2f9   :  { %v761_v28 = vadd.f32 %v760_v4, %v664_v0  ;;  %6095 = vmatprep.subr.bf16.mxu1 %v7248_v57  ;;  %v808_v6 = vmax.f32 %v758_v62, 0.0  ;;  %5371 = vmatpush3.bf16.msra.mxu0 %v6609_v58 }
 0x2fa   :  { %v811_v22 = vmax.f32 %v769_v2, 0.0  ;;  %6157 = vmatprep.subr.bf16.mxu0 %v7352_v59  ;;  %v7366_v2 = vld [vmem:[%s8761_s1 + $0x10] sm:$0xff]  }
 0x2fb   :  { %v809_v8 = vmax.f32 %v761_v28, 0.0 }
 0x2fc   :  { %v7259_v11 = vpack.c.bf16 %v811_v22, %v810_v5  ;;  %6096 = vmatpush3.bf16.msra.mxu1 %v7248_v57 }
 0x2fd   :  { %v7264_v12 = vpack.c.bf16 %v809_v8, %v808_v6  ;;  %v6087_v25 = vpop.f32.mrb[24].mxu1 }
 0x2fe   :  { %v782_v17 = vadd.f32 %v6087_v25, %v685_v31  ;;  %v773_v21 = vpop.f32.mrb[25].mxu1  ;;  %v7381_v31 = vld [vmem:[%s8761_s1 + $0x20] sm:$0xff]  }
 0x2ff   :  { %v774_v24 = vadd.f32 %v773_v21, %v677_v15  ;;  %v6088_v26 = vpop.f32.mrb[26].mxu1  ;;  %6097 = vmatprep.subr.bf16.mxu1 %v7264_v12 }
 0x300   :  { %v785_v29 = vadd.f32 %v6088_v26, %v688_v23  ;;  %v776_v1 = vpop.f32.mrb[27].mxu1  ;;  %6098 = vmatpush3.bf16.msra.mxu1 %v7264_v12  ;;  %v814_v39 = vmax.f32 %v782_v17, 0.0  ;;  %v7396_v26 = vld [vmem:[%s8761_s1 + $0x30] sm:$0xff]  }
 0x301   :  { %v777_v30 = vadd.f32 %v776_v1, %v680_v27  ;;  %6099 = vmatprep.subr.bf16.mxu1 %v7259_v11  ;;  %v812_v3 = vmax.f32 %v774_v24, 0.0 }
 0x302   :  { %v815_v32 = vmax.f32 %v785_v29, 0.0 }
 0x303   :  { %v813_v34 = vmax.f32 %v777_v30, 0.0 }
 0x304   :  { %v7277_v35 = vpack.c.bf16 %v815_v32, %v814_v39  ;;  %6100 = vmatpush3.bf16.msra.mxu1 %v7259_v11  ;;  %v7415_v32 = vld [vmem:[%s8764_s4] sm:$0xff]  }
 0x305   :  { %v7282_v36 = vpack.c.bf16 %v813_v34, %v812_v3  ;;  %v6091_v37 = vpop.f32.mrb[28].mxu1  ;;  %v7426_v3 = vld [vmem:[%s8764_s4 + $0x10] sm:$0xff]   ;;  %v7433_v34 = vld [vmem:[%s8764_s4 + $0x18] sm:$0xff]  }
 0x306   :  { %v798_v41 = vadd.f32 %v6091_v37, %v701_v33  ;;  %v789_v42 = vpop.f32.mrb[29].mxu1  ;;  %v7421_v33 = vld [vmem:[%s8764_s4 + $0x8] sm:$0xff]   ;;  %v7457_v37 = vld [vmem:[%s8764_s4 + $0x38] sm:$0xff]  }
 0x307   :  { %v790_v44 = vadd.f32 %v789_v42, %v693_v38  ;;  %v6092_v45 = vpop.f32.mrb[30].mxu1  ;;  %6101 = vmatprep.subr.bf16.mxu1 %v7282_v36 }
 0x308   :  { %v801_v46 = vadd.f32 %v6092_v45, %v704_v43  ;;  %v792_v47 = vpop.f32.mrb[31].mxu1  ;;  %6102 = vmatpush3.bf16.msra.mxu1 %v7282_v36  ;;  %v818_v48 = vmax.f32 %v798_v41, 0.0  ;;  %v7445_v43 = vld [vmem:[%s8764_s4 + $0x28] sm:$0xff]   ;;  %v7461_v41 = vld [vmem:[#allocation4 + $0x2] ss:$0 sm:$0xff] }
 0x309   :  { %v793_v18 = vadd.f32 %v792_v47, %v696_v14  ;;  %6103 = vmatprep.subr.bf16.mxu1 %v7277_v35  ;;  %v816_v50 = vmax.f32 %v790_v44, 0.0 }
 0x30a   :  { %v819_v49 = vmax.f32 %v801_v46, 0.0 }
 0x30b   :  { %v817_v7 = vmax.f32 %v793_v18, 0.0 }
 0x30c   :  { %v7291_v51 = vpack.c.bf16 %v819_v49, %v818_v48  ;;  %6104 = vmatpush3.bf16.msra.mxu1 %v7277_v35 }
 0x30d   :  { %v7294_v52 = vpack.c.bf16 %v817_v7, %v816_v50 }
 0x30f   :  { %6105 = vmatprep.subr.bf16.mxu1 %v7294_v52 }
 0x310   :  { %6106 = vmatpush3.bf16.msra.mxu1 %v7294_v52 }
 0x311   :  { %6107 = vmatprep.subr.bf16.mxu1 %v7291_v51 }
 0x314   :  { %6108 = vmatpush3.bf16.msra.mxu1 %v7291_v51 }
 0x317   :  { %6110 = vmatmul.mubr.bf16.vlgmr.msra.gmra.mrb[32].mxu1 %v7302_v9 }
 0x318   :  { %6113 = vmatprep.mubr.bf16.mxu1 %v7308_v40 }
 0x31f   :  { %6114 = vmatmul.mubr.bf16.gmra.mrb[36].mxu1 %v7315_v53 }
 0x320   :  { %6117 = vmatprep.mubr.bf16.mxu1 %v7320_v54 }
 0x327   :  { %6118 = vmatmul.mubr.bf16.gmra.mrb[40].mxu1 %v7327_v55 }
 0x328   :  { %6121 = vmatprep.mubr.bf16.mxu1 %v7332_v16 }
 0x32f   :  { %6122 = vmatmul.mubr.bf16.gmra.mrb[44].mxu1 %v7339_v56 }
 0x330   :  { %6141 = vmatprep.mubr.bf16.mxu1 %v7193_v20 }
 0x3ea   :  { %v6111_v19 = vpop.f32.mrb[32].mxu1 }
 0x3eb   :  { %v959_v60 = vpop.f32.mrb[33].mxu1 }
 0x3ec   :  { %v6112_v20 = vpop.f32.mrb[34].mxu1 }
 0x3ed   :  { %v1023_v61 = vpack.c.bf16 %v6112_v20, %v6111_v19  ;;  %v962_v13 = vpop.f32.mrb[35].mxu1 }
 0x3ee   :  { %v1022_v62 = vpack.c.bf16 %v962_v13, %v959_v60 }
 0x3f0   :  { %1163 = vmatmul.mubr.bf16.vlgmr.msra.gmra.mrb[48].mxu0 %v1022_v62 }
 0x3f1   :  { %1170 = vmatprep.mubr.bf16.mxu0 %v7248_v57  ;;  %6158 = vmatpush3.bf16.msra.mxu0 %v7352_v59  ;;  %v7373_v57 = vld [vmem:[%s8761_s1 + $0x18] sm:$0xff]  }
 0x3f2   :  { %v6115_v0 = vpop.f32.mrb[36].mxu1  ;;  %6159 = vmatprep.subr.bf16.mxu0 %v7358_v63 }
 0x3f3   :  { %v975_v4 = vpop.f32.mrb[37].mxu1 }
 0x3f4   :  { %v6116_v28 = vpop.f32.mrb[38].mxu1 }
 0x3f5   :  { %v1025_v5 = vpack.c.bf16 %v6116_v28, %v6115_v0  ;;  %v978_v22 = vpop.f32.mrb[39].mxu1  ;;  %6160 = vmatpush3.bf16.msra.mxu0 %v7358_v63 }
 0x3f6   :  { %v1024_v6 = vpack.c.bf16 %v978_v22, %v975_v4  ;;  %6161 = vmatprep.subr.bf16.mxu0 %v7366_v2 }
 0x3f8   :  { %1171 = vmatmul.mubr.bf16.gmra.mrb[52].mxu0 %v1023_v61 }
 0x3f9   :  { %1178 = vmatprep.mubr.bf16.mxu0 %v7264_v12  ;;  %6162 = vmatpush3.bf16.msra.mxu0 %v7366_v2  ;;  %v7388_v12 = vld [vmem:[%s8761_s1 + $0x28] sm:$0xff]  }
 0x3fa   :  { %v6119_v8 = vpop.f32.mrb[40].mxu1  ;;  %6163 = vmatprep.subr.bf16.mxu0 %v7373_v57 }
 0x3fb   :  { %v991_v25 = vpop.f32.mrb[41].mxu1 }
 0x3fc   :  { %v6120_v15 = vpop.f32.mrb[42].mxu1 }
 0x3fd   :  { %v1027_v17 = vpack.c.bf16 %v6120_v15, %v6119_v8  ;;  %v994_v21 = vpop.f32.mrb[43].mxu1  ;;  %6164 = vmatpush3.bf16.msra.mxu0 %v7373_v57 }
 0x3fe   :  { %v1026_v23 = vpack.c.bf16 %v994_v21, %v991_v25  ;;  %6165 = vmatprep.subr.bf16.mxu0 %v7381_v31 }
 0x400   :  { %1179 = vmatmul.mubr.bf16.gmra.mrb[56].mxu0 %v1024_v6 }
 0x401   :  { %1186 = vmatprep.mubr.bf16.mxu0 %v7259_v11  ;;  %6166 = vmatpush3.bf16.msra.mxu0 %v7381_v31  ;;  %v7403_v11 = vld [vmem:[%s8761_s1 + $0x38] sm:$0xff]  }
 0x402   :  { %v6123_v24 = vpop.f32.mrb[44].mxu1  ;;  %6167 = vmatprep.subr.bf16.mxu0 %v7388_v12 }
 0x403   :  { %v1007_v27 = vpop.f32.mrb[45].mxu1 }
 0x404   :  { %v6124_v29 = vpop.f32.mrb[46].mxu1 }
 0x405   :  { %v1029_v1 = vpack.c.bf16 %v6124_v29, %v6123_v24  ;;  %v1010_v30 = vpop.f32.mrb[47].mxu1  ;;  %6168 = vmatpush3.bf16.msra.mxu0 %v7388_v12 }
 0x406   :  { %v1028_v39 = vpack.c.bf16 %v1010_v30, %v1007_v27  ;;  %6169 = vmatprep.subr.bf16.mxu0 %v7396_v26 }
 0x408   :  { %1187 = vmatmul.mubr.bf16.gmra.mrb[60].mxu0 %v1025_v5 }
 0x409   :  { %1194 = vmatprep.mubr.bf16.mxu0 %v7282_v36  ;;  %6170 = vmatpush3.bf16.msra.mxu0 %v7396_v26  ;;  %v7450_v36 = vld [vmem:[%s8764_s4 + $0x30] sm:$0xff]  }
 0x40a   :  { %6171 = vmatprep.subr.bf16.mxu0 %v7403_v11 }
 0x40d   :  { %6172 = vmatpush3.bf16.msra.mxu0 %v7403_v11 }
 0x410   :  { %1195 = vmatmul.mubr.bf16.gmra.mrb[64].mxu0 %v1026_v23 }
 0x411   :  { %1202 = vmatprep.mubr.bf16.mxu0 %v7277_v35  ;;  %v7438_v35 = vld [vmem:[%s8764_s4 + $0x20] sm:$0xff]  }
 0x418   :  { %1203 = vmatmul.mubr.bf16.gmra.mrb[68].mxu0 %v1027_v17 }
 0x419   :  { %1210 = vmatprep.mubr.bf16.mxu0 %v7294_v52 }
 0x420   :  { %1211 = vmatmul.mubr.bf16.gmra.mrb[72].mxu0 %v1028_v39 }
 0x421   :  { %1218 = vmatprep.mubr.bf16.mxu0 %v7291_v51 }
 0x428   :  { %1219 = vmatmul.mubr.bf16.gmra.mrb[76].mxu0 %v1029_v1 }
 0x429   :  { %6173 = vmatprep.mubr.bf16.mxu0 %v7415_v32 }
 0x430   :  { %6174 = vmatmul.mubr.bf16.vlgmr.msra.gmra.mrb[80].mxu0 %v7421_v33 }
 0x431   :  { %6177 = vmatprep.mubr.bf16.mxu0 %v7426_v3 }
 0x438   :  { %6178 = vmatmul.mubr.bf16.gmra.mrb[84].mxu0 %v7433_v34 }
 0x439   :  { %6181 = vmatprep.mubr.bf16.mxu0 %v7438_v35 }
 0x440   :  { %6182 = vmatmul.mubr.bf16.gmra.mrb[88].mxu0 %v7445_v43 }
 0x441   :  { %6185 = vmatprep.mubr.bf16.mxu0 %v7450_v36 }
 0x448   :  { %6186 = vmatmul.mubr.bf16.gmra.mrb[92].mxu0 %v7457_v37 }
 0x449   :  { %6205 = vmatprep.mubr.bf16.mxu0 %v7415_v32 }
 0x4c3   :  { %v5372_v38 = vpop.f32.mrb[48].mxu0 }
 0x4c4   :  { %v5373_v42 = vpop.f32.mrb[49].mxu0 }
 0x4c5   :  { %v5374_v44 = vadd.f32 %v5373_v42, %v5372_v38  ;;  %v5375_v45 = vpop.f32.mrb[50].mxu0 }
 0x4c6   :  { %v5376_v14 = vpop.f32.mrb[51].mxu0 }
 0x4c7   :  { %v1165_v46 = vadd.f32 %v5374_v44, %v7461_v41  ;;  %v5377_v47 = vadd.f32 %v5376_v14, %v5375_v45 }
 0x4c9   :  { %v1168_v18 = vadd.f32 %v5377_v47, %v7461_v41  ;;  %v1227_v48 = vmax.f32 %v1165_v46, 0.0 }
 0x4cb   :  { %v1228_v49 = vmax.f32 %v1168_v18, 0.0  ;;  %v5378_v50 = vpop.f32.mrb[52].mxu0 }
 0x4cc   :  { %v5379_v7 = vpop.f32.mrb[53].mxu0 }
 0x4cd   :  { %v5380_v51 = vadd.f32 %v5379_v7, %v5378_v50  ;;  %v5381_v52 = vpop.f32.mrb[54].mxu0  ;;  %v7465_v10 = vpack.c.bf16 %v1228_v49, %v1227_v48 }
 0x4ce   :  { %v5382_v58 = vpop.f32.mrb[55].mxu0 }
 0x4cf   :  { %v1173_v19 = vadd.f32 %v5380_v51, %v7461_v41  ;;  %v5383_v60 = vadd.f32 %v5382_v58, %v5381_v52  ;;  %6125 = vmatprep.subr.bf16.mxu1 %v7465_v10 }
 0x4d0   :  { %6126 = vmatpush3.bf16.msra.mxu1 %v7465_v10 }
 0x4d1   :  { %v1176_v20 = vadd.f32 %v5383_v60, %v7461_v41  ;;  %v1229_v61 = vmax.f32 %v1173_v19, 0.0 }
 0x4d3   :  { %v1230_v13 = vmax.f32 %v1176_v20, 0.0  ;;  %v5384_v62 = vpop.f32.mrb[56].mxu0 }
 0x4d4   :  { %v5385_v0 = vpop.f32.mrb[57].mxu0 }
 0x4d5   :  { %v5386_v4 = vadd.f32 %v5385_v0, %v5384_v62  ;;  %v5387_v28 = vpop.f32.mrb[58].mxu0  ;;  %v7471_v5 = vpack.c.bf16 %v1230_v13, %v1229_v61 }
 0x4d6   :  { %v5388_v22 = vpop.f32.mrb[59].mxu0 }
 0x4d7   :  { %v1181_v6 = vadd.f32 %v5386_v4, %v7461_v41  ;;  %v5389_v8 = vadd.f32 %v5388_v22, %v5387_v28  ;;  %6127 = vmatprep.subr.bf16.mxu1 %v7471_v5 }
 0x4d8   :  { %6128 = vmatpush3.bf16.msra.mxu1 %v7471_v5 }
 0x4d9   :  { %v1184_v25 = vadd.f32 %v5389_v8, %v7461_v41  ;;  %v1231_v15 = vmax.f32 %v1181_v6, 0.0 }
 0x4db   :  { %v1232_v17 = vmax.f32 %v1184_v25, 0.0  ;;  %v5390_v21 = vpop.f32.mrb[60].mxu0 }
 0x4dc   :  { %v5391_v23 = vpop.f32.mrb[61].mxu0 }
 0x4dd   :  { %v5392_v24 = vadd.f32 %v5391_v23, %v5390_v21  ;;  %v5393_v27 = vpop.f32.mrb[62].mxu0  ;;  %v7477_v29 = vpack.c.bf16 %v1232_v17, %v1231_v15 }
 0x4de   :  { %v5394_v1 = vpop.f32.mrb[63].mxu0 }
 0x4df   :  { %v1189_v30 = vadd.f32 %v5392_v24, %v7461_v41  ;;  %v5395_v39 = vadd.f32 %v5394_v1, %v5393_v27  ;;  %6129 = vmatprep.subr.bf16.mxu1 %v7477_v29 }
 0x4e0   :  { %6130 = vmatpush3.bf16.msra.mxu1 %v7477_v29 }
 0x4e1   :  { %v1192_v38 = vadd.f32 %v5395_v39, %v7461_v41  ;;  %v1233_v42 = vmax.f32 %v1189_v30, 0.0 }
 0x4e3   :  { %v1234_v44 = vmax.f32 %v1192_v38, 0.0  ;;  %v5396_v45 = vpop.f32.mrb[64].mxu0 }
 0x4e4   :  { %v5397_v14 = vpop.f32.mrb[65].mxu0 }
 0x4e5   :  { %v5398_v46 = vadd.f32 %v5397_v14, %v5396_v45  ;;  %v5399_v47 = vpop.f32.mrb[66].mxu0  ;;  %v7483_v18 = vpack.c.bf16 %v1234_v44, %v1233_v42 }
 0x4e6   :  { %v5400_v48 = vpop.f32.mrb[67].mxu0 }
 0x4e7   :  { %v1197_v49 = vadd.f32 %v5398_v46, %v7461_v41  ;;  %v5401_v50 = vadd.f32 %v5400_v48, %v5399_v47  ;;  %6131 = vmatprep.subr.bf16.mxu1 %v7483_v18 }
 0x4e8   :  { %6132 = vmatpush3.bf16.msra.mxu1 %v7483_v18 }
 0x4e9   :  { %v1200_v7 = vadd.f32 %v5401_v50, %v7461_v41  ;;  %v1235_v51 = vmax.f32 %v1197_v49, 0.0 }
 0x4eb   :  { %v1236_v52 = vmax.f32 %v1200_v7, 0.0  ;;  %v5402_v58 = vpop.f32.mrb[68].mxu0 }
 0x4ec   :  { %v5403_v19 = vpop.f32.mrb[69].mxu0 }
 0x4ed   :  { %v5404_v60 = vadd.f32 %v5403_v19, %v5402_v58  ;;  %v5405_v20 = vpop.f32.mrb[70].mxu0  ;;  %v7489_v61 = vpack.c.bf16 %v1236_v52, %v1235_v51  ;;  %v6642_v19 = vld [vmem:[%s8769_s9 + $0xc0] sm:$0xff]  }
 0x4ee   :  { %v5406_v13 = vpop.f32.mrb[71].mxu0 }
 0x4ef   :  { %v1205_v62 = vadd.f32 %v5404_v60, %v7461_v41  ;;  %v5407_v0 = vadd.f32 %v5406_v13, %v5405_v20  ;;  %6133 = vmatprep.subr.bf16.mxu1 %v7489_v61 }
 0x4f0   :  { %6134 = vmatpush3.bf16.msra.mxu1 %v7489_v61 }
 0x4f1   :  { %v1208_v4 = vadd.f32 %v5407_v0, %v7461_v41  ;;  %v1237_v28 = vmax.f32 %v1205_v62, 0.0  ;;  %v6644_v62 = vld [vmem:[%s8769_s9 + $0xc8] sm:$0xff]  }
 0x4f3   :  { %v1238_v22 = vmax.f32 %v1208_v4, 0.0  ;;  %v5408_v6 = vpop.f32.mrb[72].mxu0 }
 0x4f4   :  { %v5409_v8 = vpop.f32.mrb[73].mxu0 }
 0x4f5   :  { %v5410_v25 = vadd.f32 %v5409_v8, %v5408_v6  ;;  %v5411_v15 = vpop.f32.mrb[74].mxu0  ;;  %v7495_v17 = vpack.c.bf16 %v1238_v22, %v1237_v28  ;;  %v6645_v28 = vld [vmem:[%s8769_s9 + $0x88] sm:$0xff]   ;;  %v6646_v6 = vld [vmem:[%s8769_s9 + $0xd0] sm:$0xff]  }
 0x4f6   :  { %v5412_v21 = vpop.f32.mrb[75].mxu0 }
 0x4f7   :  { %v1213_v23 = vadd.f32 %v5410_v25, %v7461_v41  ;;  %v5413_v24 = vadd.f32 %v5412_v21, %v5411_v15  ;;  %6135 = vmatprep.subr.bf16.mxu1 %v7495_v17  ;;  %v6648_v15 = vld [vmem:[%s8769_s9 + $0xd8] sm:$0xff]  }
 0x4f8   :  { %6136 = vmatpush3.bf16.msra.mxu1 %v7495_v17 }
 0x4f9   :  { %v1216_v27 = vadd.f32 %v5413_v24, %v7461_v41  ;;  %v1239_v1 = vmax.f32 %v1213_v23, 0.0  ;;  %v6649_v24 = vld [vmem:[%s8769_s9 + $0x98] sm:$0xff]  }
 0x4fb   :  { %v1240_v30 = vmax.f32 %v1216_v27, 0.0  ;;  %v5414_v39 = vpop.f32.mrb[76].mxu0 }
 0x4fc   :  { %v5415_v38 = vpop.f32.mrb[77].mxu0 }
 0x4fd   :  { %v5416_v42 = vadd.f32 %v5415_v38, %v5414_v39  ;;  %v5417_v44 = vpop.f32.mrb[78].mxu0  ;;  %v7501_v45 = vpack.c.bf16 %v1240_v30, %v1239_v1  ;;  %v6650_v1 = vld [vmem:[%s8769_s9 + $0xe0] sm:$0xff]   ;;  %v6652_v38 = vld [vmem:[%s8769_s9 + $0xe8] sm:$0xff]  }
 0x4fe   :  { %v5418_v14 = vpop.f32.mrb[79].mxu0 }
 0x4ff   :  { %v1221_v46 = vadd.f32 %v5416_v42, %v7461_v41  ;;  %v5419_v47 = vadd.f32 %v5418_v14, %v5417_v44  ;;  %6137 = vmatprep.subr.bf16.mxu1 %v7501_v45  ;;  %v6653_v14 = vld [vmem:[%s8769_s9 + $0xa8] sm:$0xff]  }
 0x500   :  { %6138 = vmatpush3.bf16.msra.mxu1 %v7501_v45 }
 0x501   :  { %v1224_v48 = vadd.f32 %v5419_v47, %v7461_v41  ;;  %v1241_v49 = vmax.f32 %v1221_v46, 0.0  ;;  %v6643_v41 = vld [vmem:[%s8769_s9 + $0x80] sm:$0xff]   ;;  %v6654_v47 = vld [vmem:[%s8769_s9 + $0xf0] sm:$0xff]  }
 0x503   :  { %v1242_v50 = vmax.f32 %v1224_v48, 0.0  ;;  %v6175_v7 = vpop.f32.mrb[80].mxu0 }
 0x504   :  { %v1830_v51 = vpop.f32.mrb[81].mxu0 }
 0x505   :  { %v6176_v52 = vpop.f32.mrb[82].mxu0  ;;  %v7507_v58 = vpack.c.bf16 %v1242_v50, %v1241_v49  ;;  %v6626_v50 = vld [vmem:[%s8768_s8 + $0x100] sm:$0xff]  }
 0x506   :  { %v7512_v60 = vpack.c.bf16 %v6176_v52, %v6175_v7  ;;  %v1833_v20 = vpop.f32.mrb[83].mxu0  ;;  %v6627_v7 = vld [vmem:[%s8768_s8 + $0xc0] sm:$0xff]   ;;  %v6631_v52 = vld [vmem:[%s8768_s8 + $0xd0] sm:$0xff]  }
 0x507   :  { %v7514_v13 = vpack.c.bf16 %v1833_v20, %v1830_v51  ;;  %6139 = vmatprep.subr.bf16.mxu1 %v7507_v58  ;;  %v6629_v51 = vld [vmem:[%s8768_s8 + $0xc8] sm:$0xff]   ;;  %v6633_v20 = vld [vmem:[%s8768_s8 + $0xd8] sm:$0xff]  }
 0x508   :  { %6140 = vmatpush3.bf16.msra.mxu1 %v7507_v58 }
 0x509   :  { %6189 = vmatprep.subr.bf16.mxu0 %v7514_v13  ;;  %5436 = vmatprep.subr.bf16.mxu1 %v6642_v19  ;;  %v6632_v19 = vld [vmem:[%s8768_s8 + $0x118] sm:$0xff]  }
 0x50a   :  { %6190 = vmatpush3.bf16.msra.mxu0 %v7514_v13 }
 0x50b   :  { %6142 = vmatmul.mubr.bf16.vlgmr.msra.gmra.mrb[48].mxu1 %v7302_v9  ;;  %v6179_v0 = vpop.f32.mrb[84].mxu0  ;;  %6191 = vmatprep.subr.bf16.mxu0 %v7512_v60 }
 0x50c   :  { %v1846_v4 = vpop.f32.mrb[85].mxu0  ;;  %6145 = vmatprep.mubr.bf16.mxu1 %v7308_v40  ;;  %5437 = vmatpush3.bf16.msra.mxu1 %v6643_v41  ;;  %v6647_v40 = vld [vmem:[%s8769_s9 + $0x90] sm:$0xff]   ;;  %v6634_v41 = vld [vmem:[%s8768_s8 + $0x120] sm:$0xff]  }
 0x50d   :  { %v6180_v22 = vpop.f32.mrb[86].mxu0  ;;  %5438 = vmatprep.subr.bf16.mxu1 %v6644_v62  ;;  %v6635_v62 = vld [vmem:[%s8768_s8 + $0xe0] sm:$0xff]  }
 0x50e   :  { %v7535_v8 = vpack.c.bf16 %v6180_v22, %v6179_v0  ;;  %v1849_v9 = vpop.f32.mrb[87].mxu0  ;;  %6192 = vmatpush3.bf16.msra.mxu0 %v7512_v60  ;;  %v6636_v0 = vld [vmem:[%s8768_s8 + $0x128] sm:$0xff]   ;;  %v6639_v22 = vld [vmem:[%s8768_s8 + $0xf0] sm:$0xff]  }
 0x50f   :  { %v7538_v25 = vpack.c.bf16 %v1849_v9, %v1846_v4  ;;  %v6637_v4 = vld [vmem:[%s8768_s8 + $0xe8] sm:$0xff]   ;;  %v6641_v9 = vld [vmem:[%s8768_s8 + $0xf8] sm:$0xff]  }
 0x510   :  { %5439 = vmatpush3.bf16.msra.mxu1 %v6645_v28  ;;  %v6638_v28 = vld [vmem:[%s8768_s8 + $0x130] sm:$0xff]  }
 0x511   :  { %6193 = vmatprep.subr.bf16.mxu0 %v7538_v25  ;;  %5440 = vmatprep.subr.bf16.mxu1 %v6646_v6  ;;  %v6640_v6 = vld [vmem:[%s8768_s8 + $0x138] sm:$0xff]  }
 0x512   :  { %6194 = vmatpush3.bf16.msra.mxu0 %v7538_v25 }
 0x513   :  { %6146 = vmatmul.mubr.bf16.gmra.mrb[52].mxu1 %v7315_v53  ;;  %v6183_v21 = vpop.f32.mrb[88].mxu0  ;;  %6195 = vmatprep.subr.bf16.mxu0 %v7535_v8 }
 0x514   :  { %v1862_v23 = vpop.f32.mrb[89].mxu0  ;;  %6149 = vmatprep.mubr.bf16.mxu1 %v7320_v54  ;;  %5441 = vmatpush3.bf16.msra.mxu1 %v6647_v40  ;;  %v6651_v54 = vld [vmem:[%s8769_s9 + $0xa0] sm:$0xff]   ;;  %v6657_v40 = vld [vmem:[%s8769_s9 + $0xb8] sm:$0xff]  }
 0x515   :  { %v6184_v27 = vpop.f32.mrb[90].mxu0  ;;  %5442 = vmatprep.subr.bf16.mxu1 %v6648_v15 }
 0x516   :  { %v7557_v30 = vpack.c.bf16 %v6184_v27, %v6183_v21  ;;  %v1865_v53 = vpop.f32.mrb[91].mxu0  ;;  %6196 = vmatpush3.bf16.msra.mxu0 %v7535_v8 }
 0x517   :  { %v7560_v39 = vpack.c.bf16 %v1865_v53, %v1862_v23 }
 0x518   :  { %5443 = vmatpush3.bf16.msra.mxu1 %v6649_v24 }
 0x519   :  { %6197 = vmatprep.subr.bf16.mxu0 %v7560_v39  ;;  %5444 = vmatprep.subr.bf16.mxu1 %v6650_v1 }
 0x51a   :  { %6198 = vmatpush3.bf16.msra.mxu0 %v7560_v39 }
 0x51b   :  { %6150 = vmatmul.mubr.bf16.gmra.mrb[56].mxu1 %v7327_v55  ;;  %v6187_v42 = vpop.f32.mrb[92].mxu0  ;;  %6199 = vmatprep.subr.bf16.mxu0 %v7557_v30 }
 0x51c   :  { %v1878_v44 = vpop.f32.mrb[93].mxu0  ;;  %6153 = vmatprep.mubr.bf16.mxu1 %v7332_v16  ;;  %5445 = vmatpush3.bf16.msra.mxu1 %v6651_v54  ;;  %v6655_v16 = vld [vmem:[%s8769_s9 + $0xb0] sm:$0xff]  }
 0x51d   :  { %v6188_v46 = vpop.f32.mrb[94].mxu0  ;;  %5446 = vmatprep.subr.bf16.mxu1 %v6652_v38 }
 0x51e   :  { %v7579_v48 = vpack.c.bf16 %v6188_v46, %v6187_v42  ;;  %v1881_v55 = vpop.f32.mrb[95].mxu0  ;;  %6200 = vmatpush3.bf16.msra.mxu0 %v7557_v30 }
 0x51f   :  { %v7582_v49 = vpack.c.bf16 %v1881_v55, %v1878_v44 }
 0x520   :  { %5447 = vmatpush3.bf16.msra.mxu1 %v6653_v14 }
 0x521   :  { %6201 = vmatprep.subr.bf16.mxu0 %v7582_v49  ;;  %5448 = vmatprep.subr.bf16.mxu1 %v6654_v47 }
 0x522   :  { %6202 = vmatpush3.bf16.msra.mxu0 %v7582_v49 }
 0x523   :  { %6154 = vmatmul.mubr.bf16.gmra.mrb[60].mxu1 %v7339_v56  ;;  %6203 = vmatprep.subr.bf16.mxu0 %v7579_v48  ;;  %v6628_v56 = vld [vmem:[%s8768_s8 + $0x108] sm:$0xff]  }
 0x524   :  { %1522 = vmatprep.mubr.bf16.mxu1 %v7465_v10  ;;  %5449 = vmatpush3.bf16.msra.mxu1 %v6655_v16  ;;  %v6630_v10 = vld [vmem:[%s8768_s8 + $0x110] sm:$0xff]  }
 0x526   :  { %6204 = vmatpush3.bf16.msra.mxu0 %v7579_v48 }
 0x527   :  { %5548 = vmatprep.subr.bf16.mxu0 %v6626_v50 }
 0x529   :  { %6206 = vmatmul.mubr.bf16.vlgmr.msra.gmra.mrb[96].mxu0 %v7421_v33 }
 0x52a   :  { %5549 = vmatpush3.bf16.msra.mxu0 %v6627_v7  ;;  %6209 = vmatprep.mubr.bf16.mxu0 %v7426_v3 }
 0x52b   :  { %5550 = vmatprep.subr.bf16.mxu0 %v6628_v56 }
 0x52e   :  { %5551 = vmatpush3.bf16.msra.mxu0 %v6629_v51 }
 0x52f   :  { %5552 = vmatprep.subr.bf16.mxu0 %v6630_v10 }
 0x531   :  { %6210 = vmatmul.mubr.bf16.gmra.mrb[100].mxu0 %v7433_v34 }
 0x532   :  { %5553 = vmatpush3.bf16.msra.mxu0 %v6631_v52  ;;  %6213 = vmatprep.mubr.bf16.mxu0 %v7438_v35 }
 0x533   :  { %5554 = vmatprep.subr.bf16.mxu0 %v6632_v19 }
 0x536   :  { %5555 = vmatpush3.bf16.msra.mxu0 %v6633_v20 }
 0x537   :  { %5556 = vmatprep.subr.bf16.mxu0 %v6634_v41 }
 0x539   :  { %6214 = vmatmul.mubr.bf16.gmra.mrb[104].mxu0 %v7445_v43 }
 0x53a   :  { %5557 = vmatpush3.bf16.msra.mxu0 %v6635_v62  ;;  %6217 = vmatprep.mubr.bf16.mxu0 %v7450_v36 }
 0x53b   :  { %5558 = vmatprep.subr.bf16.mxu0 %v6636_v0 }
 0x53e   :  { %5559 = vmatpush3.bf16.msra.mxu0 %v6637_v4  ;;  %v6667_v4 = vld [vmem:[%s8768_s8 + $0x160] sm:$0xff]  }
 0x53f   :  { %5560 = vmatprep.subr.bf16.mxu0 %v6638_v28  ;;  %v6668_v28 = vld [vmem:[%s8768_s8 + $0x1a8] sm:$0xff]  }
 0x541   :  { %6218 = vmatmul.mubr.bf16.gmra.mrb[108].mxu0 %v7457_v37 }
 0x542   :  { %5561 = vmatpush3.bf16.msra.mxu0 %v6639_v22  ;;  %2339 = vmatprep.mubr.bf16.mxu0 %v7514_v13  ;;  %v6656_v13 = vld [vmem:[%s8769_s9 + $0xf8] sm:$0xff]   ;;  %v6669_v22 = vld [vmem:[%s8768_s8 + $0x168] sm:$0xff]  }
 0x543   :  { %5562 = vmatprep.subr.bf16.mxu0 %v6640_v6  ;;  %5450 = vmatprep.subr.bf16.mxu1 %v6656_v13  ;;  %v6670_v6 = vld [vmem:[%s8768_s8 + $0x1b0] sm:$0xff]   ;;  %v6672_v13 = vld [vmem:[%s8768_s8 + $0x1b8] sm:$0xff]  }
 0x544   :  { %5451 = vmatpush3.bf16.msra.mxu1 %v6657_v40  ;;  %v6673_v40 = vld [vmem:[%s8768_s8 + $0x178] sm:$0xff]  }
 0x546   :  { %5563 = vmatpush3.bf16.msra.mxu0 %v6641_v9  ;;  %v6671_v9 = vld [vmem:[%s8768_s8 + $0x170] sm:$0xff]  }
 0x549   :  { %2340 = vmatmul.mubr.bf16.vlgmr.msra.gmra.mrb[112].mxu0 %v7352_v59 }
 0x54a   :  { %2347 = vmatprep.mubr.bf16.mxu0 %v7512_v60 }
 0x551   :  { %2348 = vmatmul.mubr.bf16.gmra.mrb[116].mxu0 %v7358_v63 }
 0x552   :  { %2355 = vmatprep.mubr.bf16.mxu0 %v7538_v25 }
 0x559   :  { %2356 = vmatmul.mubr.bf16.gmra.mrb[120].mxu0 %v7366_v2 }
 0x55a   :  { %2363 = vmatprep.mubr.bf16.mxu0 %v7535_v8 }
 0x561   :  { %2364 = vmatmul.mubr.bf16.gmra.mrb[124].mxu0 %v7373_v57 }
 0x562   :  { %2371 = vmatprep.mubr.bf16.mxu0 %v7560_v39 }
 0x569   :  { %2372 = vmatmul.mubr.bf16.gmra.mrb[128].mxu0 %v7381_v31 }
 0x56a   :  { %2379 = vmatprep.mubr.bf16.mxu0 %v7557_v30 }
 0x571   :  { %2380 = vmatmul.mubr.bf16.gmra.mrb[132].mxu0 %v7388_v12 }
 0x572   :  { %2387 = vmatprep.mubr.bf16.mxu0 %v7582_v49 }
 0x579   :  { %2388 = vmatmul.mubr.bf16.gmra.mrb[136].mxu0 %v7396_v26 }
 0x57a   :  { %2395 = vmatprep.mubr.bf16.mxu0 %v7579_v48 }
 0x581   :  { %2396 = vmatmul.mubr.bf16.gmra.mrb[140].mxu0 %v7403_v11 }
 0x5de   :  { %v6143_v59 = vpop.f32.mrb[48].mxu1 }
 0x5df   :  { %v1319_v63 = vpop.f32.mrb[49].mxu1 }
 0x5e0   :  { %v6144_v2 = vpop.f32.mrb[50].mxu1 }
 0x5e1   :  { %v1383_v57 = vpack.c.bf16 %v6144_v2, %v6143_v59  ;;  %v1322_v60 = vpop.f32.mrb[51].mxu1 }
 0x5e2   :  { %v1382_v8 = vpack.c.bf16 %v1322_v60, %v1319_v63 }
 0x5e4   :  { %1523 = vmatmul.mubr.bf16.vlgmr.msra.gmra.mrb[64].mxu1 %v1382_v8 }
 0x5e5   :  { %1530 = vmatprep.mubr.bf16.mxu1 %v7471_v5 }
 0x5e6   :  { %v6147_v31 = vpop.f32.mrb[52].mxu1 }
 0x5e7   :  { %v1335_v25 = vpop.f32.mrb[53].mxu1 }
 0x5e8   :  { %v6148_v12 = vpop.f32.mrb[54].mxu1 }
 0x5e9   :  { %v1385_v15 = vpack.c.bf16 %v6148_v12, %v6147_v31  ;;  %v1338_v21 = vpop.f32.mrb[55].mxu1 }
 0x5ea   :  { %v1384_v23 = vpack.c.bf16 %v1338_v21, %v1335_v25 }
 0x5ec   :  { %1531 = vmatmul.mubr.bf16.gmra.mrb[68].mxu1 %v1383_v57  ;;  %v7765_v57 = vld [vmem:[#allocation4 + $0x3] ss:$0 sm:$0xff] }
 0x5ed   :  { %1538 = vmatprep.mubr.bf16.mxu1 %v7477_v29 }
 0x5ee   :  { %v6151_v26 = vpop.f32.mrb[56].mxu1 }
 0x5ef   :  { %v1351_v11 = vpop.f32.mrb[57].mxu1 }
 0x5f0   :  { %v6152_v24 = vpop.f32.mrb[58].mxu1 }
 0x5f1   :  { %v1387_v27 = vpack.c.bf16 %v6152_v24, %v6151_v26  ;;  %v1354_v1 = vpop.f32.mrb[59].mxu1 }
 0x5f2   :  { %v1386_v30 = vpack.c.bf16 %v1354_v1, %v1351_v11 }
 0x5f4   :  { %1539 = vmatmul.mubr.bf16.gmra.mrb[72].mxu1 %v1384_v23 }
 0x5f5   :  { %1546 = vmatprep.mubr.bf16.mxu1 %v7483_v18 }
 0x5f6   :  { %v6155_v53 = vpop.f32.mrb[60].mxu1 }
 0x5f7   :  { %v1367_v5 = vpop.f32.mrb[61].mxu1 }
 0x5f8   :  { %v6156_v39 = vpop.f32.mrb[62].mxu1 }
 0x5f9   :  { %v1389_v54 = vpack.c.bf16 %v6156_v39, %v6155_v53  ;;  %v1370_v38 = vpop.f32.mrb[63].mxu1 }
 0x5fa   :  { %v1388_v42 = vpack.c.bf16 %v1370_v38, %v1367_v5 }
 0x5fc   :  { %1547 = vmatmul.mubr.bf16.gmra.mrb[76].mxu1 %v1385_v15  ;;  %v6207_v44 = vpop.f32.mrb[96].mxu0 }
 0x5fd   :  { %1554 = vmatprep.mubr.bf16.mxu1 %v7489_v61  ;;  %v1935_v29 = vpop.f32.mrb[97].mxu0 }
 0x5fe   :  { %v6208_v14 = vpop.f32.mrb[98].mxu0 }
 0x5ff   :  { %v7674_v46 = vpack.c.bf16 %v6208_v14, %v6207_v44  ;;  %v1938_v47 = vpop.f32.mrb[99].mxu0 }
 0x600   :  { %v7676_v48 = vpack.c.bf16 %v1938_v47, %v1935_v29 }
 0x602   :  { %6221 = vmatprep.subr.bf16.mxu1 %v7676_v48 }
 0x603   :  { %6222 = vmatpush3.bf16.msra.mxu1 %v7676_v48 }
 0x604   :  { %1555 = vmatmul.mubr.bf16.gmra.mrb[80].mxu1 %v1386_v30  ;;  %v6211_v18 = vpop.f32.mrb[100].mxu0  ;;  %6223 = vmatprep.subr.bf16.mxu1 %v7674_v46 }
 0x605   :  { %1562 = vmatprep.mubr.bf16.mxu1 %v7495_v17  ;;  %v1951_v55 = vpop.f32.mrb[101].mxu0 }
 0x606   :  { %v6212_v49 = vpop.f32.mrb[102].mxu0 }
 0x607   :  { %v7682_v61 = vpack.c.bf16 %v6212_v49, %v6211_v18  ;;  %v1954_v16 = vpop.f32.mrb[103].mxu0  ;;  %6224 = vmatpush3.bf16.msra.mxu1 %v7674_v46 }
 0x608   :  { %v7685_v50 = vpack.c.bf16 %v1954_v16, %v1951_v55 }
 0x60a   :  { %6225 = vmatprep.subr.bf16.mxu1 %v7685_v50 }
 0x60b   :  { %6226 = vmatpush3.bf16.msra.mxu1 %v7685_v50 }
 0x60c   :  { %1563 = vmatmul.mubr.bf16.gmra.mrb[84].mxu1 %v1387_v27  ;;  %v6215_v7 = vpop.f32.mrb[104].mxu0  ;;  %6227 = vmatprep.subr.bf16.mxu1 %v7682_v61 }
 0x60d   :  { %1570 = vmatprep.mubr.bf16.mxu1 %v7501_v45  ;;  %v1967_v17 = vpop.f32.mrb[105].mxu0 }
 0x60e   :  { %v6216_v56 = vpop.f32.mrb[106].mxu0 }
 0x60f   :  { %6228 = vmatpush3.bf16.msra.mxu1 %v7682_v61  ;;  %v7692_v51 = vpack.c.bf16 %v6216_v56, %v6215_v7  ;;  %v1970_v10 = vpop.f32.mrb[107].mxu0 }
 0x610   :  { %v7694_v52 = vpack.c.bf16 %v1970_v10, %v1967_v17 }
 0x612   :  { %6229 = vmatprep.subr.bf16.mxu1 %v7694_v52 }
 0x613   :  { %6230 = vmatpush3.bf16.msra.mxu1 %v7694_v52 }
 0x614   :  { %1571 = vmatmul.mubr.bf16.gmra.mrb[88].mxu1 %v1388_v42  ;;  %v6219_v19 = vpop.f32.mrb[108].mxu0  ;;  %6231 = vmatprep.subr.bf16.mxu1 %v7692_v51 }
 0x615   :  { %1578 = vmatprep.mubr.bf16.mxu1 %v7507_v58  ;;  %v1983_v45 = vpop.f32.mrb[109].mxu0  ;;  %v6666_v58 = vld [vmem:[%s8768_s8 + $0x1a0] sm:$0xff]  }
 0x616   :  { %v6220_v20 = vpop.f32.mrb[110].mxu0 }
 0x617   :  { %v7700_v41 = vpack.c.bf16 %v6220_v20, %v6219_v19  ;;  %v1986_v62 = vpop.f32.mrb[111].mxu0  ;;  %6232 = vmatpush3.bf16.msra.mxu1 %v7692_v51 }
 0x618   :  { %v7703_v0 = vpack.c.bf16 %v1986_v62, %v1983_v45 }
 0x61a   :  { %6233 = vmatprep.subr.bf16.mxu1 %v7703_v0 }
 0x61b   :  { %6234 = vmatpush3.bf16.msra.mxu1 %v7703_v0 }
 0x61c   :  { %1579 = vmatmul.mubr.bf16.gmra.mrb[92].mxu1 %v1389_v54  ;;  %6235 = vmatprep.subr.bf16.mxu1 %v7700_v41  ;;  %v5564_v59 = vpop.f32.mrb[112].mxu0 }
 0x61d   :  { %6237 = vmatprep.mubr.bf16.mxu1 %v7415_v32  ;;  %v6658_v32 = vld [vmem:[%s8768_s8 + $0x180] sm:$0xff]   ;;  %v5565_v2 = vpop.f32.mrb[113].mxu0 }
 0x61e   :  { %v7767_v8 = vadd.f32 %v5565_v2, %v5564_v59  ;;  %v7769_v31 = vpop.f32.mrb[114].mxu0 }
 0x61f   :  { %6236 = vmatpush3.bf16.msra.mxu1 %v7700_v41 }
 0x620   :  { %5612 = vmatprep.subr.bf16.mxu1 %v6658_v32 }
 0x624   :  { %6238 = vmatmul.mubr.bf16.vlgmr.msra.gmra.mrb[96].mxu1 %v7421_v33  ;;  %v6659_v33 = vld [vmem:[%s8768_s8 + $0x140] sm:$0xff]  }
 0x625   :  { %6241 = vmatprep.mubr.bf16.mxu1 %v7426_v3  ;;  %v6660_v3 = vld [vmem:[%s8768_s8 + $0x188] sm:$0xff]   ;;  %5613 = vmatpush3.bf16.msra.mxu1 %v6659_v33 }
 0x626   :  { %5614 = vmatprep.subr.bf16.mxu1 %v6660_v3 }
 0x62c   :  { %6242 = vmatmul.mubr.bf16.gmra.mrb[100].mxu1 %v7433_v34  ;;  %v6661_v34 = vld [vmem:[%s8768_s8 + $0x148] sm:$0xff]  }
 0x62d   :  { %6245 = vmatprep.mubr.bf16.mxu1 %v7438_v35  ;;  %v6662_v35 = vld [vmem:[%s8768_s8 + $0x190] sm:$0xff]   ;;  %5615 = vmatpush3.bf16.msra.mxu1 %v6661_v34 }
 0x62e   :  { %5616 = vmatprep.subr.bf16.mxu1 %v6662_v35 }
 0x634   :  { %6246 = vmatmul.mubr.bf16.gmra.mrb[104].mxu1 %v7445_v43  ;;  %v6663_v43 = vld [vmem:[%s8768_s8 + $0x150] sm:$0xff]  }
 0x635   :  { %6249 = vmatprep.mubr.bf16.mxu1 %v7450_v36  ;;  %v6664_v36 = vld [vmem:[%s8768_s8 + $0x198] sm:$0xff]   ;;  %5617 = vmatpush3.bf16.msra.mxu1 %v6663_v43 }
 0x636   :  { %5618 = vmatprep.subr.bf16.mxu1 %v6664_v36 }
 0x63c   :  { %6250 = vmatmul.mubr.bf16.gmra.mrb[108].mxu1 %v7457_v37  ;;  %v6665_v37 = vld [vmem:[%s8768_s8 + $0x158] sm:$0xff]  }
 0x63d   :  { %5619 = vmatpush3.bf16.msra.mxu1 %v6665_v37 }
 0x63e   :  { %5620 = vmatprep.subr.bf16.mxu1 %v6666_v58 }
 0x641   :  { %5621 = vmatpush3.bf16.msra.mxu1 %v6667_v4 }
 0x642   :  { %5622 = vmatprep.subr.bf16.mxu1 %v6668_v28 }
 0x645   :  { %5623 = vmatpush3.bf16.msra.mxu1 %v6669_v22 }
 0x646   :  { %5624 = vmatprep.subr.bf16.mxu1 %v6670_v6 }
 0x649   :  { %5625 = vmatpush3.bf16.msra.mxu1 %v6671_v9 }
 0x64a   :  { %5626 = vmatprep.subr.bf16.mxu1 %v6672_v13 }
 0x64d   :  { %5627 = vmatpush3.bf16.msra.mxu1 %v6673_v40 }
 0x6b7   :  { %v5452_v63 = vpop.f32.mrb[64].mxu1 }
 0x6b8   :  { %v5453_v60 = vpop.f32.mrb[65].mxu1 }
 0x6b9   :  { %v5454_v25 = vadd.f32 %v5453_v60, %v5452_v63  ;;  %v5455_v12 = vpop.f32.mrb[66].mxu1 }
 0x6ba   :  { %v5456_v15 = vpop.f32.mrb[67].mxu1 }
 0x6bb   :  { %v1525_v21 = vadd.f32 %v5454_v25, %v7765_v57  ;;  %v5457_v23 = vadd.f32 %v5456_v15, %v5455_v12 }
 0x6bd   :  { %v1528_v26 = vadd.f32 %v5457_v23, %v7765_v57  ;;  %v1587_v11 = vmax.f32 %v1525_v21, 0.0 }
 0x6bf   :  { %v1588_v24 = vmax.f32 %v1528_v26, 0.0  ;;  %v5458_v27 = vpop.f32.mrb[68].mxu1 }
 0x6c0   :  { %v5459_v1 = vpop.f32.mrb[69].mxu1 }
 0x6c1   :  { %v5460_v30 = vadd.f32 %v5459_v1, %v5458_v27  ;;  %v5461_v53 = vpop.f32.mrb[70].mxu1  ;;  %v7773_v5 = vpack.c.bf16 %v1588_v24, %v1587_v11 }
 0x6c2   :  { %v5462_v39 = vpop.f32.mrb[71].mxu1 }
 0x6c3   :  { %v1533_v54 = vadd.f32 %v5460_v30, %v7765_v57  ;;  %v5463_v38 = vadd.f32 %v5462_v39, %v5461_v53 }
 0x6c5   :  { %v1536_v42 = vadd.f32 %v5463_v38, %v7765_v57  ;;  %v1589_v44 = vmax.f32 %v1533_v54, 0.0 }
 0x6c7   :  { %v1590_v29 = vmax.f32 %v1536_v42, 0.0  ;;  %v5464_v14 = vpop.f32.mrb[72].mxu1 }
 0x6c8   :  { %v5465_v47 = vpop.f32.mrb[73].mxu1 }
 0x6c9   :  { %v7777_v18 = vpack.c.bf16 %v1590_v29, %v1589_v44  ;;  %v5466_v55 = vadd.f32 %v5465_v47, %v5464_v14  ;;  %v5467_v49 = vpop.f32.mrb[74].mxu1 }
 0x6ca   :  { %v5468_v16 = vpop.f32.mrb[75].mxu1 }
 0x6cb   :  { %v1541_v7 = vadd.f32 %v5466_v55, %v7765_v57  ;;  %v5469_v17 = vadd.f32 %v5468_v16, %v5467_v49 }
 0x6cd   :  { %v1544_v56 = vadd.f32 %v5469_v17, %v7765_v57  ;;  %v1591_v10 = vmax.f32 %v1541_v7, 0.0 }
 0x6cf   :  { %v1592_v19 = vmax.f32 %v1544_v56, 0.0  ;;  %v5470_v45 = vpop.f32.mrb[76].mxu1 }
 0x6d0   :  { %v5471_v20 = vpop.f32.mrb[77].mxu1 }
 0x6d1   :  { %v5472_v62 = vadd.f32 %v5471_v20, %v5470_v45  ;;  %v5473_v32 = vpop.f32.mrb[78].mxu1  ;;  %v7781_v33 = vpack.c.bf16 %v1592_v19, %v1591_v10 }
 0x6d2   :  { %v5474_v3 = vpop.f32.mrb[79].mxu1 }
 0x6d3   :  { %v1549_v34 = vadd.f32 %v5472_v62, %v7765_v57  ;;  %v5475_v35 = vadd.f32 %v5474_v3, %v5473_v32 }
 0x6d5   :  { %v1552_v43 = vadd.f32 %v5475_v35, %v7765_v57  ;;  %v1593_v36 = vmax.f32 %v1549_v34, 0.0 }
 0x6d7   :  { %v1594_v37 = vmax.f32 %v1552_v43, 0.0  ;;  %v5476_v58 = vpop.f32.mrb[80].mxu1 }
 0x6d8   :  { %v5477_v4 = vpop.f32.mrb[81].mxu1 }
 0x6d9   :  { %v5478_v28 = vadd.f32 %v5477_v4, %v5476_v58  ;;  %v5479_v22 = vpop.f32.mrb[82].mxu1  ;;  %v7785_v6 = vpack.c.bf16 %v1594_v37, %v1593_v36 }
 0x6da   :  { %v5480_v9 = vpop.f32.mrb[83].mxu1 }
 0x6db   :  { %v1557_v13 = vadd.f32 %v5478_v28, %v7765_v57  ;;  %v5481_v40 = vadd.f32 %v5480_v9, %v5479_v22 }
 0x6dd   :  { %v1560_v59 = vadd.f32 %v5481_v40, %v7765_v57  ;;  %v1595_v63 = vmax.f32 %v1557_v13, 0.0 }
 0x6df   :  { %v1596_v2 = vmax.f32 %v1560_v59, 0.0  ;;  %v5482_v60 = vpop.f32.mrb[84].mxu1 }
 0x6e0   :  { %v5483_v25 = vpop.f32.mrb[85].mxu1 }
 0x6e1   :  { %v5484_v12 = vadd.f32 %v5483_v25, %v5482_v60  ;;  %v5485_v15 = vpop.f32.mrb[86].mxu1  ;;  %v7789_v21 = vpack.c.bf16 %v1596_v2, %v1595_v63 }
 0x6e2   :  { %v5486_v23 = vpop.f32.mrb[87].mxu1 }
 0x6e3   :  { %v1565_v26 = vadd.f32 %v5484_v12, %v7765_v57  ;;  %v5487_v11 = vadd.f32 %v5486_v23, %v5485_v15 }
 0x6e5   :  { %v1568_v24 = vadd.f32 %v5487_v11, %v7765_v57  ;;  %v1597_v27 = vmax.f32 %v1565_v26, 0.0 }
 0x6e7   :  { %v1598_v1 = vmax.f32 %v1568_v24, 0.0  ;;  %v5488_v30 = vpop.f32.mrb[88].mxu1 }
 0x6e8   :  { %v5489_v53 = vpop.f32.mrb[89].mxu1 }
 0x6e9   :  { %v5490_v39 = vadd.f32 %v5489_v53, %v5488_v30  ;;  %v5491_v54 = vpop.f32.mrb[90].mxu1  ;;  %v7793_v38 = vpack.c.bf16 %v1598_v1, %v1597_v27 }
 0x6ea   :  { %v5492_v42 = vpop.f32.mrb[91].mxu1 }
 0x6eb   :  { %v1573_v44 = vadd.f32 %v5490_v39, %v7765_v57  ;;  %v5493_v29 = vadd.f32 %v5492_v42, %v5491_v54 }
 0x6ed   :  { %v1576_v14 = vadd.f32 %v5493_v29, %v7765_v57  ;;  %v1599_v47 = vmax.f32 %v1573_v44, 0.0 }
 0x6ef   :  { %v1600_v55 = vmax.f32 %v1576_v14, 0.0  ;;  %v5494_v49 = vpop.f32.mrb[92].mxu1 }
 0x6f0   :  { %v5495_v16 = vpop.f32.mrb[93].mxu1 }
 0x6f1   :  { %v5496_v7 = vadd.f32 %v5495_v16, %v5494_v49  ;;  %v5497_v17 = vpop.f32.mrb[94].mxu1  ;;  %v7797_v56 = vpack.c.bf16 %v1600_v55, %v1599_v47 }
 0x6f2   :  { %v5498_v10 = vpop.f32.mrb[95].mxu1 }
 0x6f3   :  { %v1581_v19 = vadd.f32 %v5496_v7, %v7765_v57  ;;  %v5499_v45 = vadd.f32 %v5498_v10, %v5497_v17 }
 0x6f5   :  { %v1584_v20 = vadd.f32 %v5499_v45, %v7765_v57  ;;  %v1601_v62 = vmax.f32 %v1581_v19, 0.0 }
 0x6f7   :  { %v1602_v32 = vmax.f32 %v1584_v20, 0.0  ;;  %v6239_v3 = vpop.f32.mrb[96].mxu1 }
 0x6f8   :  { %v2040_v34 = vpop.f32.mrb[97].mxu1 }
 0x6f9   :  { %v6240_v35 = vpop.f32.mrb[98].mxu1  ;;  %v7801_v43 = vpack.c.bf16 %v1602_v32, %v1601_v62 }
 0x6fa   :  { %v2104_v36 = vpack.c.bf16 %v6240_v35, %v6239_v3  ;;  %v2043_v37 = vpop.f32.mrb[99].mxu1 }
 0x6fb   :  { %v2103_v58 = vpack.c.bf16 %v2043_v37, %v2040_v34 }
 0x6fd   :  { %2436 = vmatprep.mubr.bf16.mxu1 %v2103_v58 }
 0x6fe   :  { %2437 = vmatmul.mubr.bf16.vlgmr.msra.gmra.mrb[112].mxu1 %v7676_v48 }
 0x6ff   :  { %2444 = vmatprep.mubr.bf16.mxu1 %v2104_v36  ;;  %v6243_v4 = vpop.f32.mrb[100].mxu1 }
 0x700   :  { %v2056_v28 = vpop.f32.mrb[101].mxu1 }
 0x701   :  { %v6244_v22 = vpop.f32.mrb[102].mxu1 }
 0x702   :  { %v2106_v9 = vpack.c.bf16 %v6244_v22, %v6243_v4  ;;  %v2059_v13 = vpop.f32.mrb[103].mxu1 }
 0x703   :  { %v2105_v57 = vpack.c.bf16 %v2059_v13, %v2056_v28 }
 0x706   :  { %2445 = vmatmul.mubr.bf16.gmra.mrb[116].mxu1 %v7674_v46  ;;  %v5568_v46 = vpop.f32.mrb[115].mxu0 }
 0x707   :  { %2452 = vmatprep.mubr.bf16.mxu1 %v2105_v57  ;;  %v6247_v40 = vpop.f32.mrb[104].mxu1  ;;  %v5570_v24 = vpop.f32.mrb[116].mxu0 }
 0x708   :  { %v2072_v59 = vpop.f32.mrb[105].mxu1  ;;  %v5571_v27 = vpop.f32.mrb[117].mxu0 }
 0x709   :  { %v6248_v63 = vpop.f32.mrb[106].mxu1  ;;  %v5573_v1 = vpop.f32.mrb[118].mxu0  ;;  %v7814_v30 = vadd.f32 %v5571_v27, %v5570_v24  ;;  %v6693_v24 = vld [vmem:[%s8769_s9 + $0x128] sm:$0xff]   ;;  %v6694_v27 = vld [vmem:[%s8769_s9 + $0x170] sm:$0xff]  }
 0x70a   :  { %v2108_v2 = vpack.c.bf16 %v6248_v63, %v6247_v40  ;;  %v2075_v60 = vpop.f32.mrb[107].mxu1  ;;  %v6682_v63 = vld [vmem:[%s8769_s9 + $0x140] sm:$0xff]  }
 0x70b   :  { %v2107_v25 = vpack.c.bf16 %v2075_v60, %v2072_v59  ;;  %v7845_v59 = vld [vmem:[%s8765_s5] sm:$0xff]   ;;  %v6684_v60 = vld [vmem:[%s8769_s9 + $0x148] sm:$0xff]   ;;  %5692 = vmatprep.subr.bf16.mxu1 %v6682_v63 }
 0x70c   :  { %6269 = vmatprep.mubr.bf16.mxu0 %v7845_v59 }
 0x70e   :  { %2453 = vmatmul.mubr.bf16.gmra.mrb[120].mxu1 %v7685_v50  ;;  %v7812_v50 = vadd.f32 %v5568_v46, %v7769_v31  ;;  %v6692_v46 = vld [vmem:[%s8769_s9 + $0x168] sm:$0xff]  }
 0x70f   :  { %2460 = vmatprep.mubr.bf16.mxu1 %v2106_v9  ;;  %v6251_v48 = vpop.f32.mrb[108].mxu1 }
 0x710   :  { %v2088_v12 = vpop.f32.mrb[109].mxu1 }
 0x711   :  { %v6252_v15 = vpop.f32.mrb[110].mxu1 }
 0x712   :  { %v2110_v23 = vpack.c.bf16 %v6252_v15, %v6251_v48  ;;  %v2091_v26 = vpop.f32.mrb[111].mxu1  ;;  %v6686_v48 = vld [vmem:[%s8769_s9 + $0x150] sm:$0xff]   ;;  %v6688_v15 = vld [vmem:[%s8769_s9 + $0x158] sm:$0xff]  }
 0x713   :  { %v2109_v11 = vpack.c.bf16 %v2091_v26, %v2088_v12  ;;  %v6687_v12 = vld [vmem:[%s8769_s9 + $0x110] sm:$0xff]   ;;  %v6690_v26 = vld [vmem:[%s8769_s9 + $0x160] sm:$0xff]  }
 0x716   :  { %2461 = vmatmul.mubr.bf16.gmra.mrb[124].mxu1 %v7682_v61  ;;  %v5574_v61 = vpop.f32.mrb[119].mxu0 }
 0x717   :  { %2468 = vmatprep.mubr.bf16.mxu1 %v2107_v25  ;;  %v5576_v53 = vpop.f32.mrb[120].mxu0  ;;  %v6685_v25 = vld [vmem:[%s8769_s9 + $0x108] sm:$0xff]  }
 0x71e   :  { %2469 = vmatmul.mubr.bf16.gmra.mrb[128].mxu1 %v7694_v52  ;;  %v7816_v52 = vadd.f32 %v5574_v61, %v5573_v1  ;;  %v6695_v1 = vld [vmem:[%s8769_s9 + $0x130] sm:$0xff]   ;;  %v7890_v61 = vld [vmem:[#allocation4 + $0x1] ss:$0 sm:$0xff] }
 0x71f   :  { %2476 = vmatprep.mubr.bf16.mxu1 %v2108_v2  ;;  %v6683_v2 = vld [vmem:[%s8769_s9 + $0x100] sm:$0xff]  }
 0x720   :  { %5693 = vmatpush3.bf16.msra.mxu1 %v6683_v2 }
 0x721   :  { %5694 = vmatprep.subr.bf16.mxu1 %v6684_v60 }
 0x724   :  { %5695 = vmatpush3.bf16.msra.mxu1 %v6685_v25 }
 0x725   :  { %5696 = vmatprep.subr.bf16.mxu1 %v6686_v48 }
 0x726   :  { %2477 = vmatmul.mubr.bf16.gmra.mrb[132].mxu1 %v7692_v51  ;;  %v5577_v51 = vpop.f32.mrb[121].mxu0 }
 0x727   :  { %2484 = vmatprep.mubr.bf16.mxu1 %v2109_v11  ;;  %v5579_v39 = vpop.f32.mrb[122].mxu0  ;;  %v6691_v11 = vld [vmem:[%s8769_s9 + $0x120] sm:$0xff]  }
 0x728   :  { %v5580_v54 = vpop.f32.mrb[123].mxu0  ;;  %5697 = vmatpush3.bf16.msra.mxu1 %v6687_v12 }
 0x729   :  { %v7820_v42 = vadd.f32 %v5580_v54, %v5579_v39  ;;  %5698 = vmatprep.subr.bf16.mxu1 %v6688_v15 }
 0x72e   :  { %2485 = vmatmul.mubr.bf16.gmra.mrb[136].mxu1 %v7703_v0  ;;  %v7818_v0 = vadd.f32 %v5577_v51, %v5576_v53  ;;  %v2342_v53 = vadd.f32 %v7767_v8, %v7890_v61 }
 0x72f   :  { %2492 = vmatprep.mubr.bf16.mxu1 %v2110_v23  ;;  %v6689_v23 = vld [vmem:[%s8769_s9 + $0x118] sm:$0xff]  }
 0x730   :  { %5699 = vmatpush3.bf16.msra.mxu1 %v6689_v23 }
 0x731   :  { %5700 = vmatprep.subr.bf16.mxu1 %v6690_v26 }
 0x734   :  { %5701 = vmatpush3.bf16.msra.mxu1 %v6691_v11 }
 0x735   :  { %5702 = vmatprep.subr.bf16.mxu1 %v6692_v46 }
 0x736   :  { %2493 = vmatmul.mubr.bf16.gmra.mrb[140].mxu1 %v7700_v41  ;;  %v5582_v41 = vpop.f32.mrb[124].mxu0 }
 0x737   :  { %v5583_v44 = vpop.f32.mrb[125].mxu0 }
 0x738   :  { %v5585_v31 = vpop.f32.mrb[126].mxu0  ;;  %v7822_v14 = vadd.f32 %v5583_v44, %v5582_v41  ;;  %5703 = vmatpush3.bf16.msra.mxu1 %v6693_v24 }
 0x739   :  { %v5586_v29 = vpop.f32.mrb[127].mxu0  ;;  %5704 = vmatprep.subr.bf16.mxu1 %v6694_v27 }
 0x73a   :  { %v7824_v47 = vadd.f32 %v5586_v29, %v5585_v31  ;;  %v5588_v55 = vpop.f32.mrb[128].mxu0  ;;  %v2345_v31 = vadd.f32 %v7812_v50, %v7890_v61 }
 0x73b   :  { %v5589_v49 = vpop.f32.mrb[129].mxu0 }
 0x73c   :  { %v5591_v16 = vpop.f32.mrb[130].mxu0  ;;  %v7826_v17 = vadd.f32 %v5589_v49, %v5588_v55  ;;  %5705 = vmatpush3.bf16.msra.mxu1 %v6695_v1 }
 0x73d   :  { %v5592_v7 = vpop.f32.mrb[131].mxu0 }
 0x73e   :  { %v7828_v10 = vadd.f32 %v5592_v7, %v5591_v16  ;;  %v5594_v19 = vpop.f32.mrb[132].mxu0 }
 0x73f   :  { %v5595_v45 = vpop.f32.mrb[133].mxu0 }
 0x740   :  { %v5597_v20 = vpop.f32.mrb[134].mxu0  ;;  %v7830_v32 = vadd.f32 %v5595_v45, %v5594_v19  ;;  %v2350_v19 = vadd.f32 %v7814_v30, %v7890_v61  ;;  %v2358_v30 = vadd.f32 %v7818_v0, %v7890_v61  ;;  %v2366_v0 = vadd.f32 %v7822_v14, %v7890_v61 }
 0x741   :  { %v5598_v62 = vpop.f32.mrb[135].mxu0  ;;  %v2374_v14 = vadd.f32 %v7826_v17, %v7890_v61 }
 0x742   :  { %v7832_v3 = vadd.f32 %v5598_v62, %v5597_v20  ;;  %v5600_v34 = vpop.f32.mrb[136].mxu0  ;;  %v2382_v17 = vadd.f32 %v7830_v32, %v7890_v61 }
 0x743   :  { %v5601_v35 = vpop.f32.mrb[137].mxu0 }
 0x744   :  { %v5603_v36 = vpop.f32.mrb[138].mxu0  ;;  %v7834_v58 = vadd.f32 %v5601_v35, %v5600_v34 }
 0x745   :  { %v5604_v37 = vpop.f32.mrb[139].mxu0 }
 0x746   :  { %v7836_v4 = vadd.f32 %v5604_v37, %v5603_v36  ;;  %v5606_v28 = vpop.f32.mrb[140].mxu0  ;;  %v2353_v36 = vadd.f32 %v7816_v52, %v7890_v61  ;;  %v2361_v52 = vadd.f32 %v7820_v42, %v7890_v61  ;;  %v2369_v42 = vadd.f32 %v7824_v47, %v7890_v61 }
 0x747   :  { %v5607_v22 = vpop.f32.mrb[141].mxu0  ;;  %v2377_v47 = vadd.f32 %v7828_v10, %v7890_v61  ;;  %v2385_v10 = vadd.f32 %v7832_v3, %v7890_v61  ;;  %v2390_v32 = vadd.f32 %v7834_v58, %v7890_v61 }
 0x748   :  { %v5609_v9 = vpop.f32.mrb[142].mxu0  ;;  %v7838_v57 = vadd.f32 %v5607_v22, %v5606_v28  ;;  %v2393_v3 = vadd.f32 %v7836_v4, %v7890_v61 }
 0x749   :  { %v5610_v13 = vpop.f32.mrb[143].mxu0 }
 0x74a   :  { %v7840_v40 = vadd.f32 %v5610_v13, %v5609_v9  ;;  %v2398_v58 = vadd.f32 %v7838_v57, %v7890_v61 }
 0x74c   :  { %v2401_v4 = vadd.f32 %v7840_v40, %v7890_v61  ;;  %v7960_v40 = vld [vmem:[%s8765_s5 + $0x10] sm:$0xff]   ;;  %v7967_v61 = vld [vmem:[%s8765_s5 + $0x18] sm:$0xff]  }
 0x7d1   :  { %v5628_v51 = vpop.f32.mrb[112].mxu1 }
 0x7d2   :  { %v5629_v39 = vpop.f32.mrb[113].mxu1 }
 0x7d3   :  { %v5630_v54 = vadd.f32 %v5629_v39, %v5628_v51  ;;  %v5631_v41 = vpop.f32.mrb[114].mxu1 }
 0x7d4   :  { %v5632_v44 = vpop.f32.mrb[115].mxu1 }
 0x7d5   :  { %v2439_v29 = vadd.f32 %v5630_v54, %v2342_v53  ;;  %v5633_v55 = vadd.f32 %v5632_v44, %v5631_v41 }
 0x7d7   :  { %v2442_v49 = vadd.f32 %v5633_v55, %v2345_v31  ;;  %v2501_v16 = vmax.f32 %v2439_v29, 0.0 }
 0x7d9   :  { %v2502_v7 = vmax.f32 %v2442_v49, 0.0  ;;  %v5634_v45 = vpop.f32.mrb[116].mxu1 }
 0x7da   :  { %v5635_v20 = vpop.f32.mrb[117].mxu1 }
 0x7db   :  { %v5636_v62 = vadd.f32 %v5635_v20, %v5634_v45  ;;  %v5637_v8 = vpop.f32.mrb[118].mxu1  ;;  %v2567_v34 = vpack.c.bf16 %v2502_v7, %v2501_v16 }
 0x7dc   :  { %v5638_v35 = vpop.f32.mrb[119].mxu1 }
 0x7dd   :  { %v2447_v37 = vadd.f32 %v5636_v62, %v2350_v19  ;;  %v5639_v28 = vadd.f32 %v5638_v35, %v5637_v8  ;;  %6253 = vmatprep.subr.bf16.mxu0 %v2567_v34  ;;  %2860 = vmatprep.mubr.bf16.mxu1 %v2567_v34 }
 0x7de   :  { %6254 = vmatpush3.bf16.msra.mxu0 %v2567_v34 }
 0x7df   :  { %v2450_v50 = vadd.f32 %v5639_v28, %v2353_v36  ;;  %v2503_v22 = vmax.f32 %v2447_v37, 0.0 }
 0x7e1   :  { %v2504_v9 = vmax.f32 %v2450_v50, 0.0  ;;  %v5640_v13 = vpop.f32.mrb[120].mxu1 }
 0x7e2   :  { %v5641_v63 = vpop.f32.mrb[121].mxu1 }
 0x7e3   :  { %v5642_v2 = vadd.f32 %v5641_v63, %v5640_v13  ;;  %v5643_v60 = vpop.f32.mrb[122].mxu1  ;;  %v7902_v25 = vpack.c.bf16 %v2504_v9, %v2503_v22 }
 0x7e4   :  { %v5644_v48 = vpop.f32.mrb[123].mxu1 }
 0x7e5   :  { %v2455_v12 = vadd.f32 %v5642_v2, %v2358_v30  ;;  %v5645_v15 = vadd.f32 %v5644_v48, %v5643_v60  ;;  %6255 = vmatprep.subr.bf16.mxu0 %v7902_v25 }
 0x7e6   :  { %6256 = vmatpush3.bf16.msra.mxu0 %v7902_v25 }
 0x7e7   :  { %v2458_v23 = vadd.f32 %v5645_v15, %v2361_v52  ;;  %v2505_v26 = vmax.f32 %v2455_v12, 0.0 }
 0x7e9   :  { %v2506_v11 = vmax.f32 %v2458_v23, 0.0  ;;  %v5646_v46 = vpop.f32.mrb[124].mxu1 }
 0x7ea   :  { %v5647_v24 = vpop.f32.mrb[125].mxu1 }
 0x7eb   :  { %v5648_v27 = vadd.f32 %v5647_v24, %v5646_v46  ;;  %v5649_v1 = vpop.f32.mrb[126].mxu1  ;;  %v7910_v53 = vpack.c.bf16 %v2506_v11, %v2505_v26 }
 0x7ec   :  { %v5650_v51 = vpop.f32.mrb[127].mxu1 }
 0x7ed   :  { %v2463_v39 = vadd.f32 %v5648_v27, %v2366_v0  ;;  %v5651_v54 = vadd.f32 %v5650_v51, %v5649_v1  ;;  %6257 = vmatprep.subr.bf16.mxu0 %v7910_v53 }
 0x7ee   :  { %6258 = vmatpush3.bf16.msra.mxu0 %v7910_v53 }
 0x7ef   :  { %v2466_v41 = vadd.f32 %v5651_v54, %v2369_v42  ;;  %v2507_v44 = vmax.f32 %v2463_v39, 0.0 }
 0x7f1   :  { %v2508_v31 = vmax.f32 %v2466_v41, 0.0  ;;  %v5652_v29 = vpop.f32.mrb[128].mxu1 }
 0x7f2   :  { %v5653_v55 = vpop.f32.mrb[129].mxu1 }
 0x7f3   :  { %v5654_v49 = vadd.f32 %v5653_v55, %v5652_v29  ;;  %v5655_v16 = vpop.f32.mrb[130].mxu1  ;;  %v7918_v7 = vpack.c.bf16 %v2508_v31, %v2507_v44  ;;  %v7954_v55 = vld [vmem:[%s8765_s5 + $0x8] sm:$0xff]  }
 0x7f4   :  { %v5656_v19 = vpop.f32.mrb[131].mxu1 }
 0x7f5   :  { %v2471_v45 = vadd.f32 %v5654_v49, %v2374_v14  ;;  %v5657_v20 = vadd.f32 %v5656_v19, %v5655_v16  ;;  %6259 = vmatprep.subr.bf16.mxu0 %v7918_v7  ;;  %v7972_v49 = vld [vmem:[%s8765_s5 + $0x20] sm:$0xff]   ;;  %v7979_v16 = vld [vmem:[%s8765_s5 + $0x28] sm:$0xff]   ;;  %v7984_v19 = vld [vmem:[%s8765_s5 + $0x30] sm:$0xff]  }
 0x7f6   :  { %6260 = vmatpush3.bf16.msra.mxu0 %v7918_v7 }
 0x7f7   :  { %v2474_v62 = vadd.f32 %v5657_v20, %v2377_v47  ;;  %v2509_v8 = vmax.f32 %v2471_v45, 0.0  ;;  %v7991_v47 = vld [vmem:[%s8765_s5 + $0x38] sm:$0xff]  }
 0x7f8   :  { %v6696_v45 = vld [vmem:[%s8769_s9 + $0x178] sm:$0xff]  }
 0x7f9   :  { %v2510_v34 = vmax.f32 %v2474_v62, 0.0  ;;  %v5658_v35 = vpop.f32.mrb[132].mxu1  ;;  %v6697_v20 = vld [vmem:[%s8769_s9 + $0x138] sm:$0xff]   ;;  %5706 = vmatprep.subr.bf16.mxu1 %v6696_v45  ;;  %v6698_v62 = vld [vmem:[#allocation2] sm:$0xff]  }
 0x7fa   :  { %v5659_v36 = vpop.f32.mrb[133].mxu1  ;;  %5707 = vmatpush3.bf16.msra.mxu1 %v6697_v20 }
 0x7fb   :  { %v5660_v37 = vadd.f32 %v5659_v36, %v5658_v35  ;;  %v5661_v28 = vpop.f32.mrb[134].mxu1  ;;  %v7926_v50 = vpack.c.bf16 %v2510_v34, %v2509_v8  ;;  %6317 = vmatprep.subr.bf16.mxu1 %v6698_v62 }
 0x7fc   :  { %v5662_v22 = vpop.f32.mrb[135].mxu1 }
 0x7fd   :  { %v2479_v9 = vadd.f32 %v5660_v37, %v2382_v17  ;;  %v5663_v30 = vadd.f32 %v5662_v22, %v5661_v28  ;;  %6261 = vmatprep.subr.bf16.mxu0 %v7926_v50  ;;  %v6699_v28 = vld [vmem:[#allocation2 + $0x8] sm:$0xff]   ;;  %v6700_v22 = vld [vmem:[#allocation2 + $0x10] sm:$0xff]  }
 0x7fe   :  { %6262 = vmatpush3.bf16.msra.mxu0 %v7926_v50 }
 0x7ff   :  { %v2482_v13 = vadd.f32 %v5663_v30, %v2385_v10  ;;  %v2511_v63 = vmax.f32 %v2479_v9, 0.0 }
 0x801   :  { %v2512_v2 = vmax.f32 %v2482_v13, 0.0  ;;  %v5664_v60 = vpop.f32.mrb[136].mxu1 }
 0x802   :  { %v5665_v48 = vpop.f32.mrb[137].mxu1 }
 0x803   :  { %v5666_v52 = vadd.f32 %v5665_v48, %v5664_v60  ;;  %v5667_v12 = vpop.f32.mrb[138].mxu1  ;;  %v7934_v15 = vpack.c.bf16 %v2512_v2, %v2511_v63  ;;  %v6701_v2 = vld [vmem:[#allocation2 + $0x18] sm:$0xff]   ;;  %v6702_v60 = vld [vmem:[#allocation2 + $0x20] sm:$0xff]  }
 0x804   :  { %v5668_v23 = vpop.f32.mrb[139].mxu1 }
 0x805   :  { %v2487_v26 = vadd.f32 %v5666_v52, %v2390_v32  ;;  %v5669_v11 = vadd.f32 %v5668_v23, %v5667_v12  ;;  %6263 = vmatprep.subr.bf16.mxu0 %v7934_v15 }
 0x806   :  { %6264 = vmatpush3.bf16.msra.mxu0 %v7934_v15 }
 0x807   :  { %v2490_v0 = vadd.f32 %v5669_v11, %v2393_v3  ;;  %v2513_v46 = vmax.f32 %v2487_v26, 0.0  ;;  %v6703_v3 = vld [vmem:[#allocation2 + $0x28] sm:$0xff]   ;;  %v6704_v11 = vld [vmem:[#allocation2 + $0x30] sm:$0xff]  }
 0x809   :  { %v2514_v24 = vmax.f32 %v2490_v0, 0.0  ;;  %v5670_v27 = vpop.f32.mrb[140].mxu1 }
 0x80a   :  { %v5671_v1 = vpop.f32.mrb[141].mxu1 }
 0x80b   :  { %v5672_v51 = vadd.f32 %v5671_v1, %v5670_v27  ;;  %v5673_v42 = vpop.f32.mrb[142].mxu1  ;;  %v7942_v39 = vpack.c.bf16 %v2514_v24, %v2513_v46  ;;  %v6705_v27 = vld [vmem:[#allocation2 + $0x38] sm:$0xff]  }
 0x80c   :  { %v5674_v54 = vpop.f32.mrb[143].mxu1  ;;  %v6709_v1 = vld [vmem:[#allocation2 + $0x58] sm:$0xff]  }
 0x80d   :  { %v2495_v41 = vadd.f32 %v5672_v51, %v2398_v58  ;;  %v5675_v44 = vadd.f32 %v5674_v54, %v5673_v42  ;;  %6265 = vmatprep.subr.bf16.mxu0 %v7942_v39  ;;  %v6710_v51 = vld [vmem:[#allocation2 + $0x60] sm:$0xff]   ;;  %v6711_v42 = vld [vmem:[#allocation2 + $0x68] sm:$0xff]   ;;  %v6713_v54 = vld [vmem:[#allocation2 + $0x78] sm:$0xff]  }
 0x80e   :  { %6266 = vmatpush3.bf16.msra.mxu0 %v7942_v39 }
 0x80f   :  { %v2498_v31 = vadd.f32 %v5675_v44, %v2401_v4  ;;  %v2515_v14 = vmax.f32 %v2495_v41, 0.0  ;;  %v8016_v41 = vld [vmem:[#allocation4 + $0x4] ss:$0 sm:$0xff] }
 0x811   :  { %v2516_v29 = vmax.f32 %v2498_v31, 0.0 }
 0x813   :  { %v7948_v57 = vpack.c.bf16 %v2516_v29, %v2515_v14 }
 0x815   :  { %6267 = vmatprep.subr.bf16.mxu0 %v7948_v57 }
 0x816   :  { %6268 = vmatpush3.bf16.msra.mxu0 %v7948_v57 }
 0x819   :  { %6270 = vmatmul.mubr.bf16.vlgmr.msra.gmra.mrb[144].mxu0 %v7954_v55 }
 0x81a   :  { %6273 = vmatprep.mubr.bf16.mxu0 %v7960_v40 }
 0x821   :  { %6274 = vmatmul.mubr.bf16.gmra.mrb[148].mxu0 %v7967_v61 }
 0x822   :  { %6277 = vmatprep.mubr.bf16.mxu0 %v7972_v49 }
 0x829   :  { %6278 = vmatmul.mubr.bf16.gmra.mrb[152].mxu0 %v7979_v16 }
 0x82a   :  { %6281 = vmatprep.mubr.bf16.mxu0 %v7984_v19 }
 0x831   :  { %6282 = vmatmul.mubr.bf16.gmra.mrb[156].mxu0 %v7991_v47 }
 0x832   :  { %6301 = vmatprep.mubr.bf16.mxu0 %v7845_v59 }
 0x8ec   :  { %v6271_v8 = vpop.f32.mrb[144].mxu0 }
 0x8ed   :  { %v2657_v34 = vpop.f32.mrb[145].mxu0 }
 0x8ee   :  { %v6272_v17 = vpop.f32.mrb[146].mxu0 }
 0x8ef   :  { %v2721_v35 = vpack.c.bf16 %v6272_v17, %v6271_v8  ;;  %v2660_v36 = vpop.f32.mrb[147].mxu0 }
 0x8f0   :  { %v2720_v37 = vpack.c.bf16 %v2660_v36, %v2657_v34 }
 0x8f2   :  { %2861 = vmatmul.mubr.bf16.vlgmr.msra.gmra.mrb[144].mxu1 %v2720_v37 }
 0x8f3   :  { %2868 = vmatprep.mubr.bf16.mxu1 %v7902_v25  ;;  %6318 = vmatpush3.bf16.msra.mxu1 %v6698_v62 }
 0x8f4   :  { %v6275_v59 = vpop.f32.mrb[148].mxu0  ;;  %6319 = vmatprep.subr.bf16.mxu1 %v6699_v28 }
 0x8f5   :  { %v2673_v10 = vpop.f32.mrb[149].mxu0 }
 0x8f6   :  { %v6276_v9 = vpop.f32.mrb[150].mxu0 }
 0x8f7   :  { %v2723_v30 = vpack.c.bf16 %v6276_v9, %v6275_v59  ;;  %v2676_v13 = vpop.f32.mrb[151].mxu0  ;;  %6320 = vmatpush3.bf16.msra.mxu1 %v6699_v28 }
 0x8f8   :  { %v2722_v63 = vpack.c.bf16 %v2676_v13, %v2673_v10  ;;  %6321 = vmatprep.subr.bf16.mxu1 %v6700_v22 }
 0x8fa   :  { %2869 = vmatmul.mubr.bf16.gmra.mrb[148].mxu1 %v2721_v35 }
 0x8fb   :  { %2876 = vmatprep.mubr.bf16.mxu1 %v7910_v53  ;;  %6322 = vmatpush3.bf16.msra.mxu1 %v6700_v22 }
 0x8fc   :  { %v6279_v32 = vpop.f32.mrb[152].mxu0  ;;  %6323 = vmatprep.subr.bf16.mxu1 %v6701_v2 }
 0x8fd   :  { %v2689_v25 = vpop.f32.mrb[153].mxu0 }
 0x8fe   :  { %v6280_v48 = vpop.f32.mrb[154].mxu0 }
 0x8ff   :  { %v2725_v52 = vpack.c.bf16 %v6280_v48, %v6279_v32  ;;  %v2692_v12 = vpop.f32.mrb[155].mxu0  ;;  %6324 = vmatpush3.bf16.msra.mxu1 %v6701_v2 }
 0x900   :  { %v2724_v23 = vpack.c.bf16 %v2692_v12, %v2689_v25  ;;  %6325 = vmatprep.subr.bf16.mxu1 %v6702_v60 }
 0x902   :  { %2877 = vmatmul.mubr.bf16.gmra.mrb[152].mxu1 %v2722_v63 }
 0x903   :  { %2884 = vmatprep.mubr.bf16.mxu1 %v7918_v7  ;;  %6326 = vmatpush3.bf16.msra.mxu1 %v6702_v60  ;;  %v6706_v7 = vld [vmem:[#allocation2 + $0x40] sm:$0xff]  }
 0x904   :  { %v6283_v26 = vpop.f32.mrb[156].mxu0  ;;  %6327 = vmatprep.subr.bf16.mxu1 %v6703_v3 }
 0x905   :  { %v2705_v53 = vpop.f32.mrb[157].mxu0 }
 0x906   :  { %v6284_v0 = vpop.f32.mrb[158].mxu0 }
 0x907   :  { %v2727_v46 = vpack.c.bf16 %v6284_v0, %v6283_v26  ;;  %v2708_v24 = vpop.f32.mrb[159].mxu0  ;;  %6328 = vmatpush3.bf16.msra.mxu1 %v6703_v3 }
 0x908   :  { %v2726_v58 = vpack.c.bf16 %v2708_v24, %v2705_v53  ;;  %6329 = vmatprep.subr.bf16.mxu1 %v6704_v11 }
 0x90a   :  { %2885 = vmatmul.mubr.bf16.gmra.mrb[156].mxu1 %v2723_v30 }
 0x90b   :  { %2892 = vmatprep.mubr.bf16.mxu1 %v7926_v50  ;;  %6330 = vmatpush3.bf16.msra.mxu1 %v6704_v11  ;;  %v6707_v50 = vld [vmem:[#allocation2 + $0x48] sm:$0xff]  }
 0x90c   :  { %6331 = vmatprep.subr.bf16.mxu1 %v6705_v27 }
 0x90f   :  { %6332 = vmatpush3.bf16.msra.mxu1 %v6705_v27 }
 0x910   :  { %6349 = vmatprep.subr.bf16.mxu1 %v6706_v7 }
 0x912   :  { %2893 = vmatmul.mubr.bf16.gmra.mrb[160].mxu1 %v2724_v23 }
 0x913   :  { %2900 = vmatprep.mubr.bf16.mxu1 %v7934_v15  ;;  %v6708_v15 = vld [vmem:[#allocation2 + $0x50] sm:$0xff]  }
 0x91a   :  { %2901 = vmatmul.mubr.bf16.gmra.mrb[164].mxu1 %v2725_v52 }
 0x91b   :  { %2908 = vmatprep.mubr.bf16.mxu1 %v7942_v39  ;;  %v6712_v39 = vld [vmem:[#allocation2 + $0x70] sm:$0xff]  }
 0x922   :  { %2909 = vmatmul.mubr.bf16.gmra.mrb[168].mxu1 %v2726_v58 }
 0x923   :  { %2916 = vmatprep.mubr.bf16.mxu1 %v7948_v57 }
 0x92a   :  { %2917 = vmatmul.mubr.bf16.gmra.mrb[172].mxu1 %v2727_v46 }
 0x92b   :  { %6333 = vmatprep.mubr.bf16.mxu1 %v7773_v5 }
 0x932   :  { %6334 = vmatmul.mubr.bf16.vlgmr.msra.gmra.mrb[176].mxu1 %v7777_v18 }
 0x933   :  { %6337 = vmatprep.mubr.bf16.mxu1 %v7781_v33  ;;  %6350 = vmatpush3.bf16.msra.mxu1 %v6706_v7 }
 0x934   :  { %6351 = vmatprep.subr.bf16.mxu1 %v6707_v50 }
 0x937   :  { %6352 = vmatpush3.bf16.msra.mxu1 %v6707_v50 }
 0x938   :  { %6353 = vmatprep.subr.bf16.mxu1 %v6708_v15 }
 0x93a   :  { %6338 = vmatmul.mubr.bf16.gmra.mrb[180].mxu1 %v7785_v6 }
 0x93b   :  { %6341 = vmatprep.mubr.bf16.mxu1 %v7789_v21  ;;  %6354 = vmatpush3.bf16.msra.mxu1 %v6708_v15 }
 0x93c   :  { %6355 = vmatprep.subr.bf16.mxu1 %v6709_v1 }
 0x93f   :  { %6356 = vmatpush3.bf16.msra.mxu1 %v6709_v1 }
 0x940   :  { %6357 = vmatprep.subr.bf16.mxu1 %v6710_v51 }
 0x942   :  { %6342 = vmatmul.mubr.bf16.gmra.mrb[184].mxu1 %v7793_v38 }
 0x943   :  { %6345 = vmatprep.mubr.bf16.mxu1 %v7797_v56  ;;  %6358 = vmatpush3.bf16.msra.mxu1 %v6710_v51 }
 0x944   :  { %6359 = vmatprep.subr.bf16.mxu1 %v6711_v42 }
 0x947   :  { %6360 = vmatpush3.bf16.msra.mxu1 %v6711_v42 }
 0x948   :  { %6361 = vmatprep.subr.bf16.mxu1 %v6712_v39 }
 0x94a   :  { %6346 = vmatmul.mubr.bf16.gmra.mrb[188].mxu1 %v7801_v43 }
 0x94b   :  { %6362 = vmatpush3.bf16.msra.mxu1 %v6712_v39 }
 0x94c   :  { %6363 = vmatprep.subr.bf16.mxu1 %v6713_v54 }
 0x94f   :  { %6364 = vmatpush3.bf16.msra.mxu1 %v6713_v54 }
 0x9c5   :  { %v5708_v4 = vpop.f32.mrb[144].mxu1 }
 0x9c6   :  { %v5709_v44 = vpop.f32.mrb[145].mxu1 }
 0x9c7   :  { %v5710_v31 = vadd.f32 %v5709_v44, %v5708_v4  ;;  %v5711_v14 = vpop.f32.mrb[146].mxu1 }
 0x9c8   :  { %v5712_v29 = vpop.f32.mrb[147].mxu1 }
 0x9c9   :  { %v2863_v57 = vadd.f32 %v5710_v31, %v8016_v41  ;;  %v5713_v45 = vadd.f32 %v5712_v29, %v5711_v14 }
 0x9cb   :  { %v2866_v20 = vadd.f32 %v5713_v45, %v8016_v41  ;;  %v2925_v62 = vmax.f32 %v2863_v57, 0.0 }
 0x9cd   :  { %v2926_v8 = vmax.f32 %v2866_v20, 0.0  ;;  %v5714_v34 = vpop.f32.mrb[148].mxu1 }
 0x9ce   :  { %v5715_v17 = vpop.f32.mrb[149].mxu1 }
 0x9cf   :  { %v5716_v35 = vadd.f32 %v5715_v17, %v5714_v34  ;;  %v5717_v36 = vpop.f32.mrb[150].mxu1  ;;  %v8020_v37 = vpack.c.bf16 %v2926_v8, %v2925_v62 }
 0x9d0   :  { %v5718_v28 = vpop.f32.mrb[151].mxu1 }
 0x9d1   :  { %v2871_v59 = vadd.f32 %v5716_v35, %v8016_v41  ;;  %v5719_v22 = vadd.f32 %v5718_v28, %v5717_v36  ;;  %6285 = vmatprep.subr.bf16.mxu0 %v8020_v37 }
 0x9d2   :  { %6286 = vmatpush3.bf16.msra.mxu0 %v8020_v37 }
 0x9d3   :  { %v2874_v10 = vadd.f32 %v5719_v22, %v8016_v41  ;;  %v2927_v9 = vmax.f32 %v2871_v59, 0.0 }
 0x9d5   :  { %v2928_v30 = vmax.f32 %v2874_v10, 0.0  ;;  %v5720_v13 = vpop.f32.mrb[152].mxu1 }
 0x9d6   :  { %v5721_v63 = vpop.f32.mrb[153].mxu1 }
 0x9d7   :  { %v8026_v2 = vpack.c.bf16 %v2928_v30, %v2927_v9  ;;  %v5722_v32 = vadd.f32 %v5721_v63, %v5720_v13  ;;  %v5723_v60 = vpop.f32.mrb[154].mxu1 }
 0x9d8   :  { %v5724_v25 = vpop.f32.mrb[155].mxu1 }
 0x9d9   :  { %6287 = vmatprep.subr.bf16.mxu0 %v8026_v2  ;;  %v2879_v48 = vadd.f32 %v5722_v32, %v8016_v41  ;;  %v5725_v52 = vadd.f32 %v5724_v25, %v5723_v60 }
 0x9da   :  { %6288 = vmatpush3.bf16.msra.mxu0 %v8026_v2 }
 0x9db   :  { %v2882_v12 = vadd.f32 %v5725_v52, %v8016_v41  ;;  %v2929_v23 = vmax.f32 %v2879_v48, 0.0 }
 0x9dd   :  { %v2930_v3 = vmax.f32 %v2882_v12, 0.0  ;;  %v5726_v26 = vpop.f32.mrb[156].mxu1 }
 0x9de   :  { %v5727_v11 = vpop.f32.mrb[157].mxu1 }
 0x9df   :  { %v5728_v53 = vadd.f32 %v5727_v11, %v5726_v26  ;;  %v5729_v0 = vpop.f32.mrb[158].mxu1  ;;  %v8032_v46 = vpack.c.bf16 %v2930_v3, %v2929_v23 }
 0x9e0   :  { %v5730_v24 = vpop.f32.mrb[159].mxu1 }
 0x9e1   :  { %v2887_v58 = vadd.f32 %v5728_v53, %v8016_v41  ;;  %v5731_v27 = vadd.f32 %v5730_v24, %v5729_v0  ;;  %6289 = vmatprep.subr.bf16.mxu0 %v8032_v46 }
 0x9e2   :  { %6290 = vmatpush3.bf16.msra.mxu0 %v8032_v46 }
 0x9e3   :  { %v2890_v7 = vadd.f32 %v5731_v27, %v8016_v41  ;;  %v2931_v50 = vmax.f32 %v2887_v58, 0.0 }
 0x9e5   :  { %v2932_v15 = vmax.f32 %v2890_v7, 0.0  ;;  %v5732_v1 = vpop.f32.mrb[160].mxu1 }
 0x9e6   :  { %v5733_v51 = vpop.f32.mrb[161].mxu1 }
 0x9e7   :  { %v5734_v42 = vadd.f32 %v5733_v51, %v5732_v1  ;;  %v5735_v39 = vpop.f32.mrb[162].mxu1  ;;  %v8038_v54 = vpack.c.bf16 %v2932_v15, %v2931_v50 }
 0x9e8   :  { %v5736_v4 = vpop.f32.mrb[163].mxu1 }
 0x9e9   :  { %v2895_v44 = vadd.f32 %v5734_v42, %v8016_v41  ;;  %v5737_v31 = vadd.f32 %v5736_v4, %v5735_v39  ;;  %6291 = vmatprep.subr.bf16.mxu0 %v8038_v54  ;;  %v6714_v39 = vld [vmem:[%s8769_s9 + $0x1c0] sm:$0xff]  }
 0x9ea   :  { %6292 = vmatpush3.bf16.msra.mxu0 %v8038_v54 }
 0x9eb   :  { %v2898_v14 = vadd.f32 %v5737_v31, %v8016_v41  ;;  %v2933_v29 = vmax.f32 %v2895_v44, 0.0 }
 0x9ed   :  { %v2934_v57 = vmax.f32 %v2898_v14, 0.0  ;;  %v5738_v45 = vpop.f32.mrb[164].mxu1  ;;  %v6716_v14 = vld [vmem:[%s8769_s9 + $0x1c8] sm:$0xff]  }
 0x9ee   :  { %v5739_v20 = vpop.f32.mrb[165].mxu1 }
 0x9ef   :  { %v5740_v62 = vadd.f32 %v5739_v20, %v5738_v45  ;;  %v5741_v8 = vpop.f32.mrb[166].mxu1  ;;  %v8044_v34 = vpack.c.bf16 %v2934_v57, %v2933_v29  ;;  %v6717_v45 = vld [vmem:[%s8769_s9 + $0x188] sm:$0xff]  }
 0x9f0   :  { %v5742_v17 = vpop.f32.mrb[167].mxu1 }
 0x9f1   :  { %v2903_v35 = vadd.f32 %v5740_v62, %v8016_v41  ;;  %v5743_v36 = vadd.f32 %v5742_v17, %v5741_v8  ;;  %6293 = vmatprep.subr.bf16.mxu0 %v8044_v34  ;;  %v6718_v62 = vld [vmem:[%s8769_s9 + $0x1d0] sm:$0xff]  }
 0x9f2   :  { %6294 = vmatpush3.bf16.msra.mxu0 %v8044_v34 }
 0x9f3   :  { %v2906_v28 = vadd.f32 %v5743_v36, %v8016_v41  ;;  %v2935_v59 = vmax.f32 %v2903_v35, 0.0 }
 0x9f5   :  { %v2936_v22 = vmax.f32 %v2906_v28, 0.0  ;;  %v5744_v10 = vpop.f32.mrb[168].mxu1 }
 0x9f6   :  { %v5745_v9 = vpop.f32.mrb[169].mxu1 }
 0x9f7   :  { %v5746_v30 = vadd.f32 %v5745_v9, %v5744_v10  ;;  %v5747_v13 = vpop.f32.mrb[170].mxu1  ;;  %v8050_v63 = vpack.c.bf16 %v2936_v22, %v2935_v59  ;;  %v6721_v59 = vld [vmem:[%s8769_s9 + $0x198] sm:$0xff]   ;;  %v6722_v10 = vld [vmem:[%s8769_s9 + $0x1e0] sm:$0xff]  }
 0x9f8   :  { %v5748_v32 = vpop.f32.mrb[171].mxu1 }
 0x9f9   :  { %v2911_v60 = vadd.f32 %v5746_v30, %v8016_v41  ;;  %v5749_v25 = vadd.f32 %v5748_v32, %v5747_v13  ;;  %6295 = vmatprep.subr.bf16.mxu0 %v8050_v63 }
 0x9fa   :  { %6296 = vmatpush3.bf16.msra.mxu0 %v8050_v63 }
 0x9fb   :  { %v2914_v48 = vadd.f32 %v5749_v25, %v8016_v41  ;;  %v2937_v52 = vmax.f32 %v2911_v60, 0.0  ;;  %v6725_v25 = vld [vmem:[%s8769_s9 + $0x1a8] sm:$0xff]  }
 0x9fd   :  { %v2938_v12 = vmax.f32 %v2914_v48, 0.0  ;;  %v5750_v23 = vpop.f32.mrb[172].mxu1 }
 0x9fe   :  { %v5751_v3 = vpop.f32.mrb[173].mxu1 }
 0x9ff   :  { %v5752_v26 = vadd.f32 %v5751_v3, %v5750_v23  ;;  %v5753_v11 = vpop.f32.mrb[174].mxu1  ;;  %v8056_v53 = vpack.c.bf16 %v2938_v12, %v2937_v52  ;;  %v6726_v52 = vld [vmem:[%s8769_s9 + $0x1f0] sm:$0xff]  }
 0xa00   :  { %v5754_v0 = vpop.f32.mrb[175].mxu1 }
 0xa01   :  { %v2919_v24 = vadd.f32 %v5752_v26, %v8016_v41  ;;  %v5755_v58 = vadd.f32 %v5754_v0, %v5753_v11  ;;  %6297 = vmatprep.subr.bf16.mxu0 %v8056_v53  ;;  %v6729_v26 = vld [vmem:[%s8769_s9 + $0x1b8] sm:$0xff]   ;;  %v6888_v11 = vmov 0.0|0.0  }
 0xa02   :  { %6298 = vmatpush3.bf16.msra.mxu0 %v8056_v53 }
 0xa03   :  { %v2922_v27 = vadd.f32 %v5755_v58, %v8016_v41  ;;  %v2939_v7 = vmax.f32 %v2919_v24, 0.0  ;;  %v6715_v41 = vld [vmem:[%s8769_s9 + $0x180] sm:$0xff]  }
 0xa05   :  { %v2940_v50 = vmax.f32 %v2922_v27, 0.0  ;;  %v6335_v15 = vpop.f32.mrb[176].mxu1 }
 0xa06   :  { %v3443_v1 = vpop.f32.mrb[177].mxu1 }
 0xa07   :  { %v6336_v51 = vpop.f32.mrb[178].mxu1  ;;  %v8062_v42 = vpack.c.bf16 %v2940_v50, %v2939_v7 }
 0xa08   :  { %v8067_v4 = vpack.c.bf16 %v6336_v51, %v6335_v15  ;;  %v3446_v44 = vpop.f32.mrb[179].mxu1 }
 0xa09   :  { %v8069_v31 = vpack.c.bf16 %v3446_v44, %v3443_v1  ;;  %6299 = vmatprep.subr.bf16.mxu0 %v8062_v42 }
 0xa0a   :  { %6300 = vmatpush3.bf16.msra.mxu0 %v8062_v42 }
 0xa0b   :  { %6416 = vmatprep.subr.bf16.mxu1 %v8069_v31  ;;  %5772 = vmatprep.subr.bf16.mxu0 %v6714_v39 }
 0xa0d   :  { %6302 = vmatmul.mubr.bf16.vlgmr.msra.gmra.mrb[160].mxu0 %v7954_v55  ;;  %v6339_v29 = vpop.f32.mrb[180].mxu1  ;;  %v6719_v55 = vld [vmem:[%s8769_s9 + $0x190] sm:$0xff]  }
 0xa0e   :  { %v3459_v57 = vpop.f32.mrb[181].mxu1  ;;  %6305 = vmatprep.mubr.bf16.mxu0 %v7960_v40  ;;  %5773 = vmatpush3.bf16.msra.mxu0 %v6715_v41  ;;  %v6720_v40 = vld [vmem:[%s8769_s9 + $0x1d8] sm:$0xff]  }
 0xa0f   :  { %v6340_v20 = vpop.f32.mrb[182].mxu1  ;;  %5774 = vmatprep.subr.bf16.mxu0 %v6716_v14 }
 0xa10   :  { %v8088_v8 = vpack.c.bf16 %v6340_v20, %v6339_v29  ;;  %v3462_v17 = vpop.f32.mrb[183].mxu1 }
 0xa11   :  { %v8090_v35 = vpack.c.bf16 %v3462_v17, %v3459_v57 }
 0xa12   :  { %5775 = vmatpush3.bf16.msra.mxu0 %v6717_v45 }
 0xa13   :  { %5776 = vmatprep.subr.bf16.mxu0 %v6718_v62 }
 0xa15   :  { %6306 = vmatmul.mubr.bf16.gmra.mrb[164].mxu0 %v7967_v61  ;;  %v6343_v36 = vpop.f32.mrb[184].mxu1  ;;  %v6723_v61 = vld [vmem:[%s8769_s9 + $0x1a0] sm:$0xff]  }
 0xa16   :  { %v3475_v28 = vpop.f32.mrb[185].mxu1  ;;  %6309 = vmatprep.mubr.bf16.mxu0 %v7972_v49  ;;  %5777 = vmatpush3.bf16.msra.mxu0 %v6719_v55  ;;  %v6724_v49 = vld [vmem:[%s8769_s9 + $0x1e8] sm:$0xff]  }
 0xa17   :  { %v6344_v22 = vpop.f32.mrb[186].mxu1  ;;  %5778 = vmatprep.subr.bf16.mxu0 %v6720_v40 }
 0xa18   :  { %v8106_v9 = vpack.c.bf16 %v6344_v22, %v6343_v36  ;;  %v3478_v30 = vpop.f32.mrb[187].mxu1 }
 0xa19   :  { %v8108_v13 = vpack.c.bf16 %v3478_v30, %v3475_v28 }
 0xa1a   :  { %5779 = vmatpush3.bf16.msra.mxu0 %v6721_v59 }
 0xa1b   :  { %5780 = vmatprep.subr.bf16.mxu0 %v6722_v10 }
 0xa1d   :  { %6310 = vmatmul.mubr.bf16.gmra.mrb[168].mxu0 %v7979_v16  ;;  %v6347_v32 = vpop.f32.mrb[188].mxu1  ;;  %v6727_v16 = vld [vmem:[%s8769_s9 + $0x1b0] sm:$0xff]  }
 0xa1e   :  { %v3491_v60 = vpop.f32.mrb[189].mxu1  ;;  %6313 = vmatprep.mubr.bf16.mxu0 %v7984_v19  ;;  %5781 = vmatpush3.bf16.msra.mxu0 %v6723_v61  ;;  %v6728_v19 = vld [vmem:[%s8769_s9 + $0x1f8] sm:$0xff]  }
 0xa1f   :  { %v6348_v48 = vpop.f32.mrb[190].mxu1  ;;  %5782 = vmatprep.subr.bf16.mxu0 %v6724_v49 }
 0xa20   :  { %v8124_v12 = vpack.c.bf16 %v6348_v48, %v6347_v32  ;;  %v3494_v23 = vpop.f32.mrb[191].mxu1 }
 0xa21   :  { %v8126_v3 = vpack.c.bf16 %v3494_v23, %v3491_v60 }
 0xa22   :  { %5783 = vmatpush3.bf16.msra.mxu0 %v6725_v25 }
 0xa23   :  { %5784 = vmatprep.subr.bf16.mxu0 %v6726_v52 }
 0xa25   :  { %6314 = vmatmul.mubr.bf16.gmra.mrb[172].mxu0 %v7991_v47 }
 0xa26   :  { %3220 = vmatprep.mubr.bf16.mxu0 %v8020_v37  ;;  %5785 = vmatpush3.bf16.msra.mxu0 %v6727_v16 }
 0xa27   :  { %5786 = vmatprep.subr.bf16.mxu0 %v6728_v19 }
 0xa2a   :  { %5787 = vmatpush3.bf16.msra.mxu0 %v6729_v26 }
 0xa2b   :  { %6512 = vmatprep.subr.bf16.mxu0 %v6888_v11 }
 0xae0   :  { %v6303_v0 = vpop.f32.mrb[160].mxu0 }
 0xae1   :  { %v3017_v24 = vpop.f32.mrb[161].mxu0 }
 0xae2   :  { %v6304_v58 = vpop.f32.mrb[162].mxu0 }
 0xae3   :  { %v3081_v27 = vpack.c.bf16 %v6304_v58, %v6303_v0  ;;  %v3020_v7 = vpop.f32.mrb[163].mxu0 }
 0xae4   :  { %v3080_v50 = vpack.c.bf16 %v3020_v7, %v3017_v24 }
 0xae6   :  { %3221 = vmatmul.mubr.bf16.vlgmr.msra.gmra.mrb[176].mxu0 %v3080_v50 }
 0xae7   :  { %6514 = vmatpush3.bf16.xpose.msra.mxu0 %v8069_v31  ;;  %3228 = vmatprep.mubr.bf16.mxu0 %v8026_v2 }
 0xae8   :  { %6515 = vmatprep.subr.bf16.mxu0 %v6888_v11  ;;  %v6307_v47 = vpop.f32.mrb[164].mxu0 }
 0xae9   :  { %v3033_v37 = vpop.f32.mrb[165].mxu0 }
 0xaea   :  { %v6308_v15 = vpop.f32.mrb[166].mxu0 }
 0xaeb   :  { %v3083_v1 = vpack.c.bf16 %v6308_v15, %v6307_v47  ;;  %v3036_v51 = vpop.f32.mrb[167].mxu0 }
 0xaec   :  { %v3082_v39 = vpack.c.bf16 %v3036_v51, %v3033_v37 }
 0xaee   :  { %3229 = vmatmul.mubr.bf16.gmra.mrb[180].mxu0 %v3081_v27 }
 0xaef   :  { %6517 = vmatpush3.bf16.xpose.msra.mxu0 %v8067_v4  ;;  %3236 = vmatprep.mubr.bf16.mxu0 %v8032_v46  ;;  %v6890_v46 = vmov 0.0  }
 0xaf0   :  { %6518 = vmatprep.subr.bf16.mxu0 %v6888_v11  ;;  %v6311_v44 = vpop.f32.mrb[168].mxu0 }
 0xaf1   :  { %v3049_v41 = vpop.f32.mrb[169].mxu0 }
 0xaf2   :  { %v6312_v14 = vpop.f32.mrb[170].mxu0 }
 0xaf3   :  { %v3085_v29 = vpack.c.bf16 %v6312_v14, %v6311_v44  ;;  %v3052_v57 = vpop.f32.mrb[171].mxu0 }
 0xaf4   :  { %v3084_v45 = vpack.c.bf16 %v3052_v57, %v3049_v41 }
 0xaf6   :  { %3237 = vmatmul.mubr.bf16.gmra.mrb[184].mxu0 %v3082_v39 }
 0xaf7   :  { %6520 = vmatpush3.bf16.xpose.msra.mxu0 %v8090_v35  ;;  %3244 = vmatprep.mubr.bf16.mxu0 %v8038_v54  ;;  %v3350_v54 = vld [vmem:[#allocation4 + $0x7] sm:$0x1] }
 0xaf8   :  { %6521 = vmatprep.subr.bf16.mxu0 %v6888_v11  ;;  %v6315_v2 = vpop.f32.mrb[172].mxu0 }
 0xaf9   :  { %v3065_v20 = vpop.f32.mrb[173].mxu0 }
 0xafa   :  { %v6316_v62 = vpop.f32.mrb[174].mxu0 }
 0xafb   :  { %v3087_v17 = vpack.c.bf16 %v6316_v62, %v6315_v2  ;;  %v3068_v55 = vpop.f32.mrb[175].mxu0 }
 0xafc   :  { %v3086_v40 = vpack.c.bf16 %v3068_v55, %v3065_v20 }
 0xafe   :  { %3245 = vmatmul.mubr.bf16.gmra.mrb[188].mxu0 %v3083_v1 }
 0xaff   :  { %6523 = vmatpush3.bf16.xpose.msra.mxu0 %v8088_v8  ;;  %3252 = vmatprep.mubr.bf16.mxu0 %v8044_v34 }
 0xb00   :  { %6524 = vmatprep.subr.bf16.mxu0 %v6888_v11 }
 0xb06   :  { %3253 = vmatmul.mubr.bf16.gmra.mrb[192].mxu0 %v3084_v45 }
 0xb07   :  { %6526 = vmatpush3.bf16.xpose.msra.mxu0 %v8108_v13  ;;  %3260 = vmatprep.mubr.bf16.mxu0 %v8050_v63 }
 0xb08   :  { %6527 = vmatprep.subr.bf16.mxu0 %v6888_v11 }
 0xb0e   :  { %3261 = vmatmul.mubr.bf16.gmra.mrb[196].mxu0 %v3085_v29 }
 0xb0f   :  { %6529 = vmatpush3.bf16.xpose.msra.mxu0 %v8106_v9  ;;  %3268 = vmatprep.mubr.bf16.mxu0 %v8056_v53 }
 0xb10   :  { %6530 = vmatprep.subr.bf16.mxu0 %v6888_v11 }
 0xb16   :  { %3269 = vmatmul.mubr.bf16.gmra.mrb[200].mxu0 %v3086_v40 }
 0xb17   :  { %6532 = vmatpush3.bf16.xpose.msra.mxu0 %v8126_v3  ;;  %3276 = vmatprep.mubr.bf16.mxu0 %v8062_v42 }
 0xb18   :  { %6533 = vmatprep.subr.bf16.mxu0 %v6888_v11 }
 0xb1e   :  { %3277 = vmatmul.mubr.bf16.gmra.mrb[204].mxu0 %v3087_v17 }
 0xb1f   :  { %6535 = vmatpush3.bf16.xpose.msra.mxu0 %v8124_v12  ;;  %6413 = vmatprep.mubr.msk.f32.mxu0 %vm6889_vm0, %v6890_v46 }
 0xb20   :  { %6448 = vmatprep.subr.bf16.mxu0 %v7773_v5 }
 0xb26   :  { %6414 = vmatmul.mubr.f32.vlgmr.msra.gmra.mrb[208].mxu0 %v3350_v54 }
 0xb27   :  { %6449 = vmatpush3.bf16.msra.mxu0 %v7773_v5 }
 0xb28   :  { %6450 = vmatprep.subr.bf16.mxu0 %v7777_v18 }
 0xb2b   :  { %6451 = vmatpush3.bf16.msra.mxu0 %v7777_v18  ;;  %v8170_v18 = vld [vmem:[#allocation4 + $0x5] ss:$0 sm:$0xff] }
 0xb2c   :  { %6452 = vmatprep.subr.bf16.mxu0 %v7781_v33 }
 0xb2f   :  { %6453 = vmatpush3.bf16.msra.mxu0 %v7781_v33 }
 0xb30   :  { %6454 = vmatprep.subr.bf16.mxu0 %v7785_v6 }
 0xb33   :  { %6455 = vmatpush3.bf16.msra.mxu0 %v7785_v6 }
 0xb34   :  { %6456 = vmatprep.subr.bf16.mxu0 %v7789_v21 }
 0xb37   :  { %6457 = vmatpush3.bf16.msra.mxu0 %v7789_v21 }
 0xb38   :  { %6458 = vmatprep.subr.bf16.mxu0 %v7793_v38 }
 0xb3b   :  { %6459 = vmatpush3.bf16.msra.mxu0 %v7793_v38 }
 0xb3c   :  { %6460 = vmatprep.subr.bf16.mxu0 %v7797_v56 }
 0xb3f   :  { %6461 = vmatpush3.bf16.msra.mxu0 %v7797_v56 }
 0xb40   :  { %6462 = vmatprep.subr.bf16.mxu0 %v7801_v43 }
 0xb43   :  { %6463 = vmatpush3.bf16.msra.mxu0 %v7801_v43 }
 0xbb9   :  { %v5788_v5 = vpop.f32.mrb[176].mxu0 }
 0xbba   :  { %v5789_v33 = vpop.f32.mrb[177].mxu0 }
 0xbbb   :  { %v5790_v6 = vadd.f32 %v5789_v33, %v5788_v5  ;;  %v5791_v34 = vpop.f32.mrb[178].mxu0 }
 0xbbc   :  { %v5792_v63 = vpop.f32.mrb[179].mxu0 }
 0xbbd   :  { %v3223_v21 = vadd.f32 %v5790_v6, %v8170_v18  ;;  %v5793_v53 = vadd.f32 %v5792_v63, %v5791_v34 }
 0xbbf   :  { %v3226_v38 = vadd.f32 %v5793_v53, %v8170_v18  ;;  %v3285_v42 = vmax.f32 %v3223_v21, 0.0 }
 0xbc1   :  { %v3286_v36 = vmax.f32 %v3226_v38, 0.0  ;;  %v5794_v28 = vpop.f32.mrb[180].mxu0 }
 0xbc2   :  { %v5795_v56 = vpop.f32.mrb[181].mxu0 }
 0xbc3   :  { %v5796_v59 = vadd.f32 %v5795_v56, %v5794_v28  ;;  %v5797_v22 = vpop.f32.mrb[182].mxu0  ;;  %v3506_v10 = vpack.c.bf16 %v3286_v36, %v3285_v42 }
 0xbc4   :  { %v5798_v43 = vpop.f32.mrb[183].mxu0 }
 0xbc5   :  { %v3231_v30 = vadd.f32 %v5796_v59, %v8170_v18  ;;  %v5799_v61 = vadd.f32 %v5798_v43, %v5797_v22  ;;  %6365 = vmatprep.mubr.bf16.mxu1 %v3506_v10 }
 0xbc7   :  { %v3234_v49 = vadd.f32 %v5799_v61, %v8170_v18  ;;  %v3287_v32 = vmax.f32 %v3231_v30, 0.0 }
 0xbc9   :  { %v3288_v60 = vmax.f32 %v3234_v49, 0.0  ;;  %v5800_v25 = vpop.f32.mrb[184].mxu0 }
 0xbca   :  { %v5801_v48 = vpop.f32.mrb[185].mxu0 }
 0xbcb   :  { %v3507_v52 = vpack.c.bf16 %v3288_v60, %v3287_v32  ;;  %v5802_v23 = vadd.f32 %v5801_v48, %v5800_v25  ;;  %v5803_v16 = vpop.f32.mrb[186].mxu0 }
 0xbcc   :  { %v5804_v19 = vpop.f32.mrb[187].mxu0 }
 0xbcd   :  { %6366 = vmatmul.mubr.bf16.vlgmr.msra.gmra.mrb[192].mxu1 %v3507_v52  ;;  %v3239_v26 = vadd.f32 %v5802_v23, %v8170_v18  ;;  %v5805_v11 = vadd.f32 %v5804_v19, %v5803_v16 }
 0xbce   :  { %6417 = vmatpush3.bf16.msra.mxu1 %v8069_v31 }
 0xbcf   :  { %6418 = vmatprep.subr.bf16.mxu1 %v8067_v4  ;;  %v3242_v0 = vadd.f32 %v5805_v11, %v8170_v18  ;;  %v3289_v24 = vmax.f32 %v3239_v26, 0.0  ;;  %v5160_v26 = vld [vmem:[#allocation4 + $0x8] ss:$0 sm:$0xff] }
 0xbd1   :  { %v3290_v58 = vmax.f32 %v3242_v0, 0.0  ;;  %v5806_v27 = vpop.f32.mrb[188].mxu0 }
 0xbd2   :  { %6419 = vmatpush3.bf16.msra.mxu1 %v8067_v4  ;;  %v5807_v7 = vpop.f32.mrb[189].mxu0 }
 0xbd3   :  { %v5808_v50 = vadd.f32 %v5807_v7, %v5806_v27  ;;  %6420 = vmatprep.subr.bf16.mxu1 %v8090_v35  ;;  %v5809_v47 = vpop.f32.mrb[190].mxu0  ;;  %v3508_v37 = vpack.c.bf16 %v3290_v58, %v3289_v24 }
 0xbd4   :  { %v5810_v15 = vpop.f32.mrb[191].mxu0 }
 0xbd5   :  { %v3247_v1 = vadd.f32 %v5808_v50, %v8170_v18  ;;  %v5811_v51 = vadd.f32 %v5810_v15, %v5809_v47  ;;  %6369 = vmatprep.mubr.bf16.mxu1 %v3508_v37 }
 0xbd6   :  { %6421 = vmatpush3.bf16.msra.mxu1 %v8090_v35 }
 0xbd7   :  { %v3250_v31 = vadd.f32 %v5811_v51, %v8170_v18  ;;  %6422 = vmatprep.subr.bf16.mxu1 %v8088_v8  ;;  %v3291_v39 = vmax.f32 %v3247_v1, 0.0 }
 0xbd9   :  { %v3292_v44 = vmax.f32 %v3250_v31, 0.0  ;;  %v5812_v4 = vpop.f32.mrb[192].mxu0 }
 0xbda   :  { %6423 = vmatpush3.bf16.msra.mxu1 %v8088_v8  ;;  %v5813_v41 = vpop.f32.mrb[193].mxu0 }
 0xbdb   :  { %6424 = vmatprep.subr.bf16.mxu1 %v8108_v13  ;;  %v3509_v14 = vpack.c.bf16 %v3292_v44, %v3291_v39  ;;  %v5814_v29 = vadd.f32 %v5813_v41, %v5812_v4  ;;  %v5815_v57 = vpop.f32.mrb[194].mxu0 }
 0xbdc   :  { %v5816_v45 = vpop.f32.mrb[195].mxu0 }
 0xbdd   :  { %6370 = vmatmul.mubr.bf16.gmra.mrb[196].mxu1 %v3509_v14  ;;  %v3255_v2 = vadd.f32 %v5814_v29, %v8170_v18  ;;  %v5817_v35 = vadd.f32 %v5816_v45, %v5815_v57 }
 0xbde   :  { %6425 = vmatpush3.bf16.msra.mxu1 %v8108_v13 }
 0xbdf   :  { %6426 = vmatprep.subr.bf16.mxu1 %v8106_v9  ;;  %v3258_v20 = vadd.f32 %v5817_v35, %v8170_v18  ;;  %v3293_v62 = vmax.f32 %v3255_v2, 0.0 }
 0xbe1   :  { %v3294_v17 = vmax.f32 %v3258_v20, 0.0  ;;  %v5818_v8 = vpop.f32.mrb[196].mxu0 }
 0xbe2   :  { %6427 = vmatpush3.bf16.msra.mxu1 %v8106_v9  ;;  %v5819_v55 = vpop.f32.mrb[197].mxu0 }
 0xbe3   :  { %v5820_v40 = vadd.f32 %v5819_v55, %v5818_v8  ;;  %6428 = vmatprep.subr.bf16.mxu1 %v8126_v3  ;;  %v5821_v46 = vpop.f32.mrb[198].mxu0  ;;  %v3510_v54 = vpack.c.bf16 %v3294_v17, %v3293_v62 }
 0xbe4   :  { %v5822_v5 = vpop.f32.mrb[199].mxu0 }
 0xbe5   :  { %v3263_v33 = vadd.f32 %v5820_v40, %v8170_v18  ;;  %v5823_v6 = vadd.f32 %v5822_v5, %v5821_v46  ;;  %6373 = vmatprep.mubr.bf16.mxu1 %v3510_v54  ;;  %v3781_v5 = vlaneseq }
 0xbe6   :  { %6429 = vmatpush3.bf16.msra.mxu1 %v8126_v3 }
 0xbe7   :  { %v3266_v13 = vadd.f32 %v5823_v6, %v8170_v18  ;;  %6430 = vmatprep.subr.bf16.mxu1 %v8124_v12  ;;  %v3295_v34 = vmax.f32 %v3263_v33, 0.0  ;;  %v3782_v33 = vshrl.u32 %v3781_v5, 7  ;;  %v3301_v6 = vld [vmem:[%s8766_s6] sm:$0xf] }
 0xbe8   :  { %vm3849_vm1 = vcmp.gt.bf16.partialorder %v3301_v6, 0 }
 0xbe9   :  { %v3296_v63 = vmax.f32 %v3266_v13, 0.0  ;;  %v5824_v9 = vpop.f32.mrb[200].mxu0  ;;  %v3783_v13 = vsub.s32 0, %v3782_v33 }
 0xbea   :  { %6431 = vmatpush3.bf16.msra.mxu1 %v8124_v12  ;;  %v5825_v21 = vpop.f32.mrb[201].mxu0 }
 0xbeb   :  { %v3511_v53 = vpack.c.bf16 %v3296_v63, %v3295_v34  ;;  %v5826_v38 = vadd.f32 %v5825_v21, %v5824_v9  ;;  %v5827_v42 = vpop.f32.mrb[202].mxu0  ;;  %v3303_v34 = vld [vmem:[%s8766_s6 + $0x8] sm:$0xf]  ;;  %v3302_v63 = vld [vmem:[%s8766_s6 + $0x4] sm:$0xf]  ;;  %v6891_v9 = vmov 0  }
 0xbec   :  { %v5828_v36 = vpop.f32.mrb[203].mxu0  ;;  %v3865_v21 = vsel %vm3849_vm1, 65537, %v6891_v9  ;;  %vm3851_vm2 = vcmp.gt.bf16.partialorder %v3303_v34, 0  ;;  %vm3850_vm3 = vcmp.gt.bf16.partialorder %v3302_v63, 0 }
 0xbed   :  { %6374 = vmatmul.mubr.bf16.gmra.mrb[200].mxu1 %v3511_v53  ;;  %v3271_v28 = vadd.f32 %v5826_v38, %v8170_v18  ;;  %v5829_v56 = vadd.f32 %v5828_v36, %v5827_v42  ;;  %v3304_v38 = vld [vmem:[%s8766_s6 + $0xc] sm:$0xf]  ;;  %v3881_v42 = vunpack.c.l.b16 %v3865_v21  ;;  %v3867_v36 = vsel %vm3851_vm2, 65537, %v6891_v9 }
 0xbee   :  { %vm3852_vm4 = vcmp.gt.bf16.partialorder %v3304_v38, 0  ;;  %v3310_v38 = vld [vmem:[%s8766_s6 + $0x24] sm:$0xf] }
 0xbef   :  { %v3274_v3 = vadd.f32 %v5829_v56, %v8170_v18  ;;  %v3297_v59 = vmax.f32 %v3271_v28, 0.0  ;;  %v3866_v28 = vsel %vm3850_vm3, 65537, %v6891_v9  ;;  %vm8222_vm5 = vcmp.ne.s32.totalorder %v3881_v42, 0 }
 0xbf1   :  { %v3298_v22 = vmax.f32 %v3274_v3, 0.0  ;;  %v5830_v10 = vpop.f32.mrb[204].mxu0 }
 0xbf2   :  { %v5831_v43 = vpop.f32.mrb[205].mxu0 }
 0xbf3   :  { %v5832_v30 = vadd.f32 %v5831_v43, %v5830_v10  ;;  %v5833_v61 = vpop.f32.mrb[206].mxu0  ;;  %v3512_v49 = vpack.c.bf16 %v3298_v22, %v3297_v59  ;;  %v3883_v10 = vunpack.c.l.b16 %v3867_v36  ;;  %v3882_v43 = vunpack.c.l.b16 %v3866_v28 }
 0xbf4   :  { %v5834_v32 = vpop.f32.mrb[207].mxu0 }
 0xbf5   :  { %v3279_v12 = vadd.f32 %v5832_v30, %v8170_v18  ;;  %v5835_v60 = vadd.f32 %v5834_v32, %v5833_v61  ;;  %6377 = vmatprep.mubr.bf16.mxu1 %v3512_v49  ;;  %vm8229_vm8 = vcmp.ne.s32.totalorder %v3883_v10, 0  ;;  %vm8233_vm9 = vcmp.ne.s32.totalorder %v3882_v43, 0  ;;  %v3312_v10 = vld [vmem:[%s8766_s6 + $0x2c] sm:$0xf] }
 0xbf7   :  { %v3282_v25 = vadd.f32 %v5835_v60, %v8170_v18  ;;  %v3299_v48 = vmax.f32 %v3279_v12, 0.0  ;;  %v3868_v12 = vsel %vm3852_vm4, 65537, %v6891_v9 }
 0xbf9   :  { %v3300_v52 = vmax.f32 %v3282_v25, 0.0  ;;  %v3725_v16 = vpop.f32.mrb[208].mxu0 }
 0xbfa   :  { %v6415_v19 = vpop.f32.mrb[209].mxu0  ;;  %v8213_v53 = vrot.slane %v3725_v16, %v3783_v13  ;;  %v3309_v13 = vld [vmem:[%s8766_s6 + $0x20] sm:$0xf] }
 0xbfb   :  { %v3513_v23 = vpack.c.bf16 %v3300_v52, %v3299_v48 }
 0xbfd   :  { %6378 = vmatmul.mubr.bf16.gmra.mrb[204].mxu1 %v3513_v23 }
 0xca0   :  { %v6367_v11 = vpop.f32.mrb[192].mxu1 }
 0xca1   :  { %v3596_v0 = vpop.f32.mrb[193].mxu1  ;;  %v3735_v24 = vmul.f32 %v6367_v11, %v5160_v26  ;;  %v3305_v11 = vld [vmem:[%s8766_s6 + $0x10] sm:$0xf] }
 0xca2   :  { %v3733_v58 = vmul.f32 %v5160_v26, %v3596_v0  ;;  %v6368_v27 = vpop.f32.mrb[194].mxu1  ;;  %v3306_v0 = vld [vmem:[%s8766_s6 + $0x14] sm:$0xf]  ;;  %vm3853_vm12 = vcmp.gt.bf16.partialorder %v3305_v11, 0 }
 0xca3   :  { %v3599_v7 = vpop.f32.mrb[195].mxu1  ;;  %3753 = vadd.xlane.f32.xlu1 %v3735_v24  ;;  %v3736_v50 = vmul.f32 %v6368_v27, %v5160_v26  ;;  %vm3854_vm13 = vcmp.gt.bf16.partialorder %v3306_v0, 0 }
 0xca4   :  { %3749 = vadd.xlane.f32.xlu0 %v3733_v58  ;;  %v3734_v47 = vmul.f32 %v5160_v26, %v3599_v7 }
 0xca7   :  { %3755 = vadd.xlane.f32.xlu1 %v3736_v50  ;;  %v3307_v50 = vld [vmem:[%s8766_s6 + $0x18] sm:$0xf] }
 0xca8   :  { %3751 = vadd.xlane.f32.xlu0 %v3734_v47  ;;  %vm3855_vm15 = vcmp.gt.bf16.partialorder %v3307_v50, 0 }
 0xcb0   :  { %v6371_v18 = vpop.f32.mrb[196].mxu1 }
 0xcb1   :  { %v3612_v37 = vpop.f32.mrb[197].mxu1  ;;  %v3739_v39 = vmul.f32 %v6371_v18, %v5160_v26 }
 0xcb2   :  { %v3737_v15 = vmul.f32 %v5160_v26, %v3612_v37  ;;  %v6372_v1 = vpop.f32.mrb[198].mxu1 }
 0xcb3   :  { %v3615_v51 = vpop.f32.mrb[199].mxu1  ;;  %v3740_v44 = vmul.f32 %v6372_v1, %v5160_v26  ;;  %v3308_v1 = vld [vmem:[%s8766_s6 + $0x1c] sm:$0xf] }
 0xcb4   :  { %v3738_v31 = vmul.f32 %v5160_v26, %v3615_v51  ;;  %3757 = vadd.xlane.f32.xlu0 %v3737_v15  ;;  %v3869_v51 = vsel %vm3853_vm12, 65537, %v6891_v9  ;;  %vm3856_vm0 = vcmp.gt.bf16.partialorder %v3308_v1, 0  ;;  %vm3857_vm12 = vcmp.gt.bf16.partialorder %v3309_v13, 0 }
 0xcb6   :  { %3759 = vadd.xlane.f32.xlu1 %v3738_v31  ;;  %v3870_v31 = vsel %vm3854_vm13, 65537, %v6891_v9  ;;  %vm3858_vm13 = vcmp.gt.bf16.partialorder %v3310_v38, 0 }
 0xcb8   :  { %3761 = vadd.xlane.f32.xlu0 %v3739_v39 }
 0xcba   :  { %3763 = vadd.xlane.f32.xlu1 %v3740_v44  ;;  %v3885_v44 = vunpack.c.l.b16 %v3869_v51 }
 0xcbc   :  { %vm8279_vm2 = vcmp.ne.s32.totalorder %v3885_v44, 0 }
 0xcc0   :  { %v6375_v4 = vpop.f32.mrb[200].mxu1 }
 0xcc1   :  { %v3628_v41 = vpop.f32.mrb[201].mxu1  ;;  %v3743_v2 = vmul.f32 %v6375_v4, %v5160_v26  ;;  %v3871_v4 = vsel %vm3855_vm15, 65537, %v6891_v9 }
 0xcc2   :  { %v3741_v14 = vmul.f32 %v5160_v26, %v3628_v41  ;;  %v6376_v29 = vpop.f32.mrb[202].mxu1 }
 0xcc3   :  { %v3631_v57 = vpop.f32.mrb[203].mxu1  ;;  %v3744_v35 = vmul.f32 %v6376_v29, %v5160_v26 }
 0xcc4   :  { %v3742_v45 = vmul.f32 %v5160_v26, %v3631_v57  ;;  %3765 = vadd.xlane.f32.xlu0 %v3741_v14  ;;  %v3886_v14 = vunpack.c.l.b16 %v3870_v31  ;;  %v3872_v57 = vsel %vm3856_vm0, 65537, %v6891_v9  ;;  %vm3860_vm0 = vcmp.gt.bf16.partialorder %v3312_v10, 0 }
 0xcc6   :  { %3767 = vadd.xlane.f32.xlu1 %v3742_v45  ;;  %vm8283_vm3 = vcmp.ne.s32.totalorder %v3886_v14, 0 }
 0xcc8   :  { %3769 = vadd.xlane.f32.xlu0 %v3743_v2  ;;  %v3887_v2 = vunpack.c.l.b16 %v3871_v4  ;;  %v8797_v4 = vmov 0 }
 0xcca   :  { %3771 = vadd.xlane.f32.xlu1 %v3744_v35 }
 0xcd0   :  { %v6379_v20 = vpop.f32.mrb[204].mxu1 }
 0xcd1   :  { %v3644_v62 = vpop.f32.mrb[205].mxu1  ;;  %v3747_v46 = vmul.f32 %v6379_v20, %v5160_v26 }
 0xcd2   :  { %v3745_v17 = vmul.f32 %v5160_v26, %v3644_v62  ;;  %v6380_v8 = vpop.f32.mrb[206].mxu1 }
 0xcd3   :  { %v3647_v55 = vpop.f32.mrb[207].mxu1  ;;  %v3748_v54 = vmul.f32 %v6380_v8, %v5160_v26 }
 0xcd4   :  { %v3746_v40 = vmul.f32 %v5160_v26, %v3647_v55  ;;  %3773 = vadd.xlane.f32.xlu0 %v3745_v17  ;;  %v3884_v26 = vunpack.c.l.b16 %v3868_v12  ;;  %v3888_v55 = vunpack.c.l.b16 %v3872_v57 }
 0xcd6   :  { %3775 = vadd.xlane.f32.xlu1 %v3746_v40  ;;  %vm8261_vm14 = vcmp.ne.s32.totalorder %v3884_v26, 0 }
 0xcd8   :  { %3777 = vadd.xlane.f32.xlu0 %v3747_v46 }
 0xcda   :  { %3779 = vadd.xlane.f32.xlu1 %v3748_v54 }
 0xd30   :  { %v3754_v56 = vpop.xlane.xlu1 %3753 }
 0xd31   :  { %v3750_v3 = vpop.xlane.xlu0 %3749  ;;  %v3787_v59 = vadd.f32 %v8213_v53, %v3754_v56 }
 0xd32   :  { %v3785_v22 = vadd.f32 %v8213_v53, %v3750_v3  ;;  %v3311_v3 = vld [vmem:[%s8766_s6 + $0x28] sm:$0xf] }
 0xd33   :  { %v3819_v49 = vmul.f32 0.2, %v3787_v59  ;;  %vm3803_vm7 = vcmp.gt.f32.partialorder %v3787_v59, 0.0  ;;  %vm3859_vm15 = vcmp.gt.bf16.partialorder %v3311_v3, 0 }
 0xd34   :  { %v3817_v61 = vmul.f32 0.2, %v3785_v22  ;;  %vm3801_vm6 = vcmp.gt.f32.partialorder %v3785_v22, 0.0  ;;  %v3756_v32 = vpop.xlane.xlu1 %3755  ;;  %v3875_v12 = vsel %vm3859_vm15, 65537, %v6891_v9 }
 0xd35   :  { %v3752_v60 = vpop.xlane.xlu0 %3751  ;;  %v3788_v25 = vadd.f32 %v8213_v53, %v3756_v32  ;;  %v3835_v27 = vsel %vm3803_vm7, %v3787_v59, %v3819_v49  ;;  %v3874_v49 = vsel %vm3858_vm13, 65537, %v6891_v9  ;;  %v3891_v11 = vunpack.c.l.b16 %v3875_v12 }
 0xd36   :  { %v3786_v48 = vadd.f32 %v8213_v53, %v3752_v60  ;;  %v3833_v52 = vsel %vm3801_vm6, %v3785_v22, %v3817_v61  ;;  %v8253_v47 = vsel %vm8229_vm8, %v3835_v27, -1e+30  ;;  %vm8292_vm6 = vcmp.ne.s32.totalorder %v3887_v2, 0 }
 0xd37   :  { %v8239_v19 = vsel %vm8222_vm5, %v3833_v52, -1e+30  ;;  %v3820_v58 = vmul.f32 0.2, %v3788_v25  ;;  %vm3804_vm11 = vcmp.gt.f32.partialorder %v3788_v25, 0.0  ;;  %v3873_v61 = vsel %vm3857_vm12, 65537, %v6891_v9 }
 0xd38   :  { %v3818_v24 = vmul.f32 0.2, %v3786_v48  ;;  %3929 = vmax.xlane.f32.xlu0 %v8239_v19  ;;  %vm3802_vm10 = vcmp.gt.f32.partialorder %v3786_v48, 0.0  ;;  %v3889_v32 = vunpack.c.l.b16 %v3873_v61  ;;  %v3876_v52 = vsel %vm3860_vm0, 65537, %v6891_v9 }
 0xd39   :  { %v3836_v37 = vsel %vm3804_vm11, %v3788_v25, %v3820_v58  ;;  %v3890_v25 = vunpack.c.l.b16 %v3874_v49  ;;  %v3892_v50 = vunpack.c.l.b16 %v3876_v52  ;;  %vm8348_vm12 = vcmp.ne.s32.totalorder %v3891_v11, 0 }
 0xd3a   :  { %v3834_v7 = vsel %vm3802_vm10, %v3786_v48, %v3818_v24  ;;  %v8272_v39 = vsel %vm8261_vm14, %v3836_v37, -1e+30  ;;  %vm8308_vm10 = vcmp.ne.s32.totalorder %v3888_v55, 0  ;;  %v8798_v4 = vsel %vm8348_vm12, 4294967295, %v8797_v4  ;;  %v3315_v55 = vld [vmem:[%s8766_s6 + $0x38] sm:$0xf] }
 0xd3b   :  { %v8257_v18 = vsel %vm8233_vm9, %v3834_v7, -1e+30  ;;  %vm8364_vm15 = vcmp.ne.s32.totalorder %v3892_v50, 0 }
 0xd3c   :  { %3933 = vmax.xlane.f32.xlu0 %v8253_v47  ;;  %3931 = vmax.xlane.f32.xlu1 %v8257_v18 }
 0xd40   :  { %3935 = vmax.xlane.f32.xlu1 %v8272_v39 }
 0xd41   :  { %v3758_v41 = vpop.xlane.xlu0 %3757 }
 0xd42   :  { %v3789_v29 = vadd.f32 %v8213_v53, %v3758_v41  ;;  %v3313_v41 = vld [vmem:[%s8766_s6 + $0x30] sm:$0xf] }
 0xd43   :  { %v3760_v45 = vpop.xlane.xlu1 %3759 }
 0xd44   :  { %v3821_v35 = vmul.f32 0.2, %v3789_v29  ;;  %v3790_v20 = vadd.f32 %v8213_v53, %v3760_v45  ;;  %vm3805_vm1 = vcmp.gt.f32.partialorder %v3789_v29, 0.0  ;;  %v3314_v45 = vld [vmem:[%s8766_s6 + $0x34] sm:$0xf] }
 0xd45   :  { %v3762_v17 = vpop.xlane.xlu0 %3761 }
 0xd46   :  { %v3822_v40 = vmul.f32 0.2, %v3790_v20  ;;  %v3791_v46 = vadd.f32 %v8213_v53, %v3762_v17  ;;  %v3837_v54 = vsel %vm3805_vm1, %v3789_v29, %v3821_v35  ;;  %vm3806_vm4 = vcmp.gt.f32.partialorder %v3790_v20, 0.0 }
 0xd47   :  { %v3764_v5 = vpop.xlane.xlu1 %3763  ;;  %v8290_v33 = vsel %vm8279_vm2, %v3837_v54, -1e+30  ;;  %v8799_v35 = vmov 0  ;;  %v3316_v54 = vld [vmem:[%s8766_s6 + $0x3c] sm:$0xf] }
 0xd48   :  { %v3823_v34 = vmul.f32 0.2, %v3791_v46  ;;  %v3792_v63 = vadd.f32 %v8213_v53, %v3764_v5  ;;  %3937 = vmax.xlane.f32.xlu0 %v8290_v33  ;;  %v3838_v21 = vsel %vm3806_vm4, %v3790_v20, %v3822_v40  ;;  %vm3807_vm7 = vcmp.gt.f32.partialorder %v3791_v46, 0.0 }
 0xd49   :  { %v8306_v42 = vsel %vm8283_vm3, %v3838_v21, -1e+30  ;;  %vm8335_vm4 = vcmp.ne.s32.totalorder %v3889_v32, 0  ;;  %v8800_v35 = vsel %vm8364_vm15, 4294967295, %v8799_v35  ;;  %v8801_v32 = vmov 0 }
 0xd4a   :  { %v3824_v28 = vmul.f32 0.2, %v3792_v63  ;;  %3939 = vmax.xlane.f32.xlu1 %v8306_v42  ;;  %v3839_v56 = vsel %vm3807_vm7, %v3791_v46, %v3823_v34  ;;  %vm3808_vm11 = vcmp.gt.f32.partialorder %v3792_v63, 0.0  ;;  %vm8339_vm7 = vcmp.ne.s32.totalorder %v3890_v25, 0 }
 0xd4b   :  { %v8318_v59 = vsel %vm8292_vm6, %v3839_v56, -1e+30 }
 0xd4c   :  { %3941 = vmax.xlane.f32.xlu0 %v8318_v59  ;;  %v3840_v22 = vsel %vm3808_vm11, %v3792_v63, %v3824_v28 }
 0xd4d   :  { %v8326_v43 = vsel %vm8308_vm10, %v3840_v22, -1e+30 }
 0xd4e   :  { %3943 = vmax.xlane.f32.xlu1 %v8326_v43 }
 0xd51   :  { %v3766_v60 = vpop.xlane.xlu0 %3765 }
 0xd52   :  { %v3793_v48 = vadd.f32 %v8213_v53, %v3766_v60  ;;  %v6732_v60 = vld [vmem:[%s8767_s7 + $0x10] sm:$0xff]  }
 0xd53   :  { %v3768_v26 = vpop.xlane.xlu1 %3767 }
 0xd54   :  { %v3825_v0 = vmul.f32 0.2, %v3793_v48  ;;  %v3794_v24 = vadd.f32 %v8213_v53, %v3768_v26  ;;  %vm3809_vm1 = vcmp.gt.f32.partialorder %v3793_v48, 0.0 }
 0xd55   :  { %v3770_v27 = vpop.xlane.xlu0 %3769 }
 0xd56   :  { %v3826_v37 = vmul.f32 0.2, %v3794_v24  ;;  %v3795_v1 = vadd.f32 %v8213_v53, %v3770_v27  ;;  %v3841_v51 = vsel %vm3809_vm1, %v3793_v48, %v3825_v0  ;;  %vm3810_vm11 = vcmp.gt.f32.partialorder %v3794_v24, 0.0  ;;  %v6734_v0 = vld [vmem:[%s8767_s7 + $0x20] sm:$0xff]  }
 0xd57   :  { %v3772_v31 = vpop.xlane.xlu1 %3771  ;;  %v8346_v44 = vsel %vm8335_vm4, %v3841_v51, -1e+30  ;;  %vm3861_vm1 = vcmp.gt.bf16.partialorder %v3313_v41, 0 }
 0xd58   :  { %v3827_v14 = vmul.f32 0.2, %v3795_v1  ;;  %v3796_v29 = vadd.f32 %v8213_v53, %v3772_v31  ;;  %3945 = vmax.xlane.f32.xlu0 %v8346_v44  ;;  %v3842_v57 = vsel %vm3810_vm11, %v3794_v24, %v3826_v37  ;;  %vm3811_vm13 = vcmp.gt.f32.partialorder %v3795_v1, 0.0  ;;  %v6735_v31 = vld [vmem:[%s8767_s7 + $0x28] sm:$0xff]  }
 0xd59   :  { %v8362_v2 = vsel %vm8339_vm7, %v3842_v57, -1e+30  ;;  %vm3862_vm11 = vcmp.gt.bf16.partialorder %v3314_v45, 0  ;;  %v3877_v13 = vsel %vm3861_vm1, 65537, %v6891_v9 }
 0xd5a   :  { %v3828_v20 = vmul.f32 0.2, %v3796_v29  ;;  %3947 = vmax.xlane.f32.xlu1 %v8362_v2  ;;  %v3843_v17 = vsel %vm3811_vm13, %v3795_v1, %v3827_v14  ;;  %vm3812_vm0 = vcmp.gt.f32.partialorder %v3796_v29, 0.0  ;;  %vm3863_vm13 = vcmp.gt.bf16.partialorder %v3315_v55, 0 }
 0xd5b   :  { %v8374_v40 = vsel %vm8348_vm12, %v3843_v17, -1e+30  ;;  %v3878_v34 = vsel %vm3862_vm11, 65537, %v6891_v9  ;;  %vm3864_vm12 = vcmp.gt.bf16.partialorder %v3316_v54, 0  ;;  %v3893_v63 = vunpack.c.l.b16 %v3877_v13 }
 0xd5c   :  { %3949 = vmax.xlane.f32.xlu0 %v8374_v40  ;;  %v3844_v46 = vsel %vm3812_vm0, %v3796_v29, %v3828_v20  ;;  %v3879_v21 = vsel %vm3863_vm13, 65537, %v6891_v9  ;;  %v3894_v28 = vunpack.c.l.b16 %v3878_v34  ;;  %v3880_v3 = vsel %vm3864_vm12, 65537, %v6891_v9 }
 0xd5d   :  { %v8382_v5 = vsel %vm8364_vm15, %v3844_v46, -1e+30  ;;  %v3895_v10 = vunpack.c.l.b16 %v3879_v21  ;;  %vm8391_vm1 = vcmp.ne.s32.totalorder %v3893_v63, 0  ;;  %v3896_v25 = vunpack.c.l.b16 %v3880_v3 }
 0xd5e   :  { %3951 = vmax.xlane.f32.xlu1 %v8382_v5  ;;  %v8802_v32 = vsel %vm8391_vm1, 4294967295, %v8801_v32  ;;  %vm8395_vm11 = vcmp.ne.s32.totalorder %v3894_v28, 0 }
 0xd5f   :  { %vm8404_vm13 = vcmp.ne.s32.totalorder %v3895_v10, 0 }
 0xd61   :  { %v3774_v38 = vpop.xlane.xlu0 %3773 }
 0xd62   :  { %v3797_v56 = vadd.f32 %v8213_v53, %v3774_v38 }
 0xd63   :  { %v3776_v22 = vpop.xlane.xlu1 %3775 }
 0xd64   :  { %v3829_v61 = vmul.f32 0.2, %v3797_v56  ;;  %v3798_v49 = vadd.f32 %v8213_v53, %v3776_v22  ;;  %vm3813_vm0 = vcmp.gt.f32.partialorder %v3797_v56, 0.0 }
 0xd65   :  { %v3778_v12 = vpop.xlane.xlu0 %3777 }
 0xd66   :  { %v3830_v48 = vmul.f32 0.2, %v3798_v49  ;;  %v3799_v52 = vadd.f32 %v8213_v53, %v3778_v12  ;;  %v3845_v9 = vsel %vm3813_vm0, %v3797_v56, %v3829_v61  ;;  %vm3814_vm12 = vcmp.gt.f32.partialorder %v3798_v49, 0.0 }
 0xd67   :  { %v3780_v26 = vpop.xlane.xlu1 %3779  ;;  %v8402_v11 = vsel %vm8391_vm1, %v3845_v9, -1e+30  ;;  %vm8415_vm1 = vcmp.ne.s32.totalorder %v3896_v25, 0 }
 0xd68   :  { %v3831_v24 = vmul.f32 0.2, %v3799_v52  ;;  %v3800_v27 = vadd.f32 %v8213_v53, %v3780_v26  ;;  %3953 = vmax.xlane.f32.xlu0 %v8402_v11  ;;  %v3846_v50 = vsel %vm3814_vm12, %v3798_v49, %v3830_v48  ;;  %vm3815_vm15 = vcmp.gt.f32.partialorder %v3799_v52, 0.0 }
 0xd69   :  { %v8412_v37 = vsel %vm8395_vm11, %v3846_v50, -1e+30 }
 0xd6a   :  { %v3832_v1 = vmul.f32 0.2, %v3800_v27  ;;  %3955 = vmax.xlane.f32.xlu1 %v8412_v37  ;;  %v3847_v51 = vsel %vm3815_vm15, %v3799_v52, %v3831_v24  ;;  %vm3816_vm0 = vcmp.gt.f32.partialorder %v3800_v27, 0.0 }
 0xd6b   :  { %v8421_v53 = vsel %vm8404_vm13, %v3847_v51, -1e+30 }
 0xd6c   :  { %3957 = vmax.xlane.f32.xlu0 %v8421_v53  ;;  %v3848_v41 = vsel %vm3816_vm0, %v3800_v27, %v3832_v1 }
 0xd6d   :  { %v8426_v14 = vsel %vm8415_vm1, %v3848_v41, -1e+30 }
 0xd6e   :  { %3959 = vmax.xlane.f32.xlu1 %v8426_v14 }
 0xdc5   :  { %v3930_v29 = vpop.xlane.xlu0 %3929 }
 0xdc6   :  { %v3961_v57 = vsub.f32 %v8239_v19, %v3930_v29 }
 0xdc8   :  { %v3977_v45 = vmul.f32 1.442695, %v3961_v57 }
 0xdc9   :  { %v3934_v20 = vpop.xlane.xlu0 %3933  ;;  %v3932_v17 = vpop.xlane.xlu1 %3931 }
 0xdca   :  { %6762 = vpow2.f32 %v3977_v45  ;;  %v3963_v55 = vsub.f32 %v8253_v47, %v3934_v20  ;;  %v3962_v46 = vsub.f32 %v8257_v18, %v3932_v17 }
 0xdcc   :  { %v3981_v54 = vmul.f32 1.442695, %v3963_v55  ;;  %v3979_v13 = vmul.f32 1.442695, %v3962_v46 }
 0xdcd   :  { %v3936_v34 = vpop.xlane.xlu1 %3935 }
 0xdce   :  { %6764 = vpow2.f32 %v3981_v54  ;;  %v3964_v63 = vsub.f32 %v8272_v39, %v3936_v34 }
 0xdcf   :  { %6766 = vpow2.f32 %v3979_v13 }
 0xdd0   :  { %v3983_v21 = vmul.f32 1.442695, %v3964_v63 }
 0xdd2   :  { %6768 = vpow2.f32 %v3983_v21 }
 0xdd4   :  { %v6763_v38 = vpop.eup %6762 }
 0xdd5   :  { %v3938_v28 = vpop.xlane.xlu0 %3937  ;;  %v8435_v19 = vsel %vm8222_vm5, %v6763_v38, 0.0  ;;  %vm8809_vm5 = vnez %v8798_v4  ;;  %v6730_v4 = vld [vmem:[%s8767_s7] sm:$0xff]  }
 0xdd6   :  { %v3965_v56 = vsub.f32 %v8290_v33, %v3938_v28  ;;  %4025 = vadd.xlane.f32.xlu0 %v8435_v19  ;;  %6464 = vmatprep.mubr.bf16.mxu0 %v6730_v4 }
 0xdd7   :  { %v3940_v47 = vpop.xlane.xlu1 %3939 }
 0xdd8   :  { %v6765_v18 = vpop.eup %6764  ;;  %v3985_v3 = vmul.f32 1.442695, %v3965_v56  ;;  %v3966_v22 = vsub.f32 %v8306_v42, %v3940_v47 }
 0xdd9   :  { %v6767_v10 = vpop.eup %6766  ;;  %v3942_v39 = vpop.xlane.xlu0 %3941  ;;  %v8442_v61 = vsel %vm8229_vm8, %v6765_v18, 0.0  ;;  %vm8810_vm8 = vnez %v8800_v35 }
 0xdda   :  { %6770 = vpow2.f32 %v3985_v3  ;;  %v3987_v49 = vmul.f32 1.442695, %v3966_v22  ;;  %v3967_v30 = vsub.f32 %v8318_v59, %v3942_v39  ;;  %4029 = vadd.xlane.f32.xlu0 %v8442_v61  ;;  %v8448_v33 = vsel %vm8233_vm9, %v6767_v10, 0.0 }
 0xddb   :  { %4027 = vadd.xlane.f32.xlu1 %v8448_v33  ;;  %v3944_v12 = vpop.xlane.xlu1 %3943  ;;  %vm8811_vm9 = vnez %v8802_v32 }
 0xddc   :  { %v6769_v42 = vpop.eup %6768  ;;  %6772 = vpow2.f32 %v3987_v49  ;;  %v3989_v25 = vmul.f32 1.442695, %v3967_v30  ;;  %v3968_v23 = vsub.f32 %v8326_v43, %v3944_v12  ;;  %v6733_v49 = vld [vmem:[%s8767_s7 + $0x18] sm:$0xff]   ;;  %v6736_v30 = vld [vmem:[%s8767_s7 + $0x30] sm:$0xff]  }
 0xddd   :  { %v8454_v48 = vsel %vm8261_vm14, %v6769_v42, 0.0  ;;  %v6737_v12 = vld [vmem:[%s8767_s7 + $0x38] sm:$0xff]   ;;  %v6738_v42 = vld [vmem:[%s8769_s9 + $0x240] sm:$0xff]  }
 0xdde   :  { %6774 = vpow2.f32 %v3989_v25  ;;  %v3991_v59 = vmul.f32 1.442695, %v3968_v23  ;;  %5917 = vmatprep.subr.bf16.mxu1 %v6738_v42 }
 0xddf   :  { %4031 = vadd.xlane.f32.xlu1 %v8454_v48 }
 0xde0   :  { %6776 = vpow2.f32 %v3991_v59 }
 0xde4   :  { %v6771_v16 = vpop.eup %6770 }
 0xde5   :  { %v3946_v52 = vpop.xlane.xlu0 %3945  ;;  %v8459_v9 = vsel %vm8279_vm2, %v6771_v16, 0.0 }
 0xde6   :  { %v6773_v26 = vpop.eup %6772  ;;  %v3969_v24 = vsub.f32 %v8346_v44, %v3946_v52  ;;  %4033 = vadd.xlane.f32.xlu0 %v8459_v9 }
 0xde7   :  { %v3948_v43 = vpop.xlane.xlu1 %3947  ;;  %v8465_v15 = vsel %vm8283_vm3, %v6773_v26, 0.0 }
 0xde8   :  { %v6775_v27 = vpop.eup %6774  ;;  %v3993_v50 = vmul.f32 1.442695, %v3969_v24  ;;  %v3970_v1 = vsub.f32 %v8362_v2, %v3948_v43  ;;  %4035 = vadd.xlane.f32.xlu1 %v8465_v15 }
 0xde9   :  { %v3950_v51 = vpop.xlane.xlu0 %3949  ;;  %v8471_v62 = vsel %vm8292_vm6, %v6775_v27, 0.0 }
 0xdea   :  { %v6777_v41 = vpop.eup %6776  ;;  %6778 = vpow2.f32 %v3993_v50  ;;  %v3995_v44 = vmul.f32 1.442695, %v3970_v1  ;;  %v3971_v29 = vsub.f32 %v8374_v40, %v3950_v51  ;;  %4037 = vadd.xlane.f32.xlu0 %v8471_v62 }
 0xdeb   :  { %v3952_v8 = vpop.xlane.xlu1 %3951  ;;  %v8477_v57 = vsel %vm8308_vm10, %v6777_v41, 0.0 }
 0xdec   :  { %6780 = vpow2.f32 %v3995_v44  ;;  %v3997_v2 = vmul.f32 1.442695, %v3971_v29  ;;  %v3972_v45 = vsub.f32 %v8382_v5, %v3952_v8  ;;  %4039 = vadd.xlane.f32.xlu1 %v8477_v57 }
 0xdee   :  { %6782 = vpow2.f32 %v3997_v2  ;;  %v3999_v6 = vmul.f32 1.442695, %v3972_v45 }
 0xdf0   :  { %6784 = vpow2.f32 %v3999_v6 }
 0xdf4   :  { %v6779_v20 = vpop.eup %6778 }
 0xdf5   :  { %v3954_v17 = vpop.xlane.xlu0 %3953  ;;  %v8483_v40 = vsel %vm8335_vm4, %v6779_v20, 0.0 }
 0xdf6   :  { %v6781_v55 = vpop.eup %6780  ;;  %v3973_v36 = vsub.f32 %v8402_v11, %v3954_v17  ;;  %4041 = vadd.xlane.f32.xlu0 %v8483_v40 }
 0xdf7   :  { %v3956_v46 = vpop.xlane.xlu1 %3955  ;;  %v8489_v5 = vsel %vm8339_vm7, %v6781_v55, 0.0  ;;  %v6740_v55 = vld [vmem:[%s8769_s9 + $0x248] sm:$0xff]  }
 0xdf8   :  { %v6783_v54 = vpop.eup %6782  ;;  %v4001_v13 = vmul.f32 1.442695, %v3973_v36  ;;  %v3974_v34 = vsub.f32 %v8412_v37, %v3956_v46  ;;  %4043 = vadd.xlane.f32.xlu1 %v8489_v5  ;;  %v6742_v46 = vld [vmem:[%s8769_s9 + $0x250] sm:$0xff]  }
 0xdf9   :  { %v3958_v63 = vpop.xlane.xlu0 %3957  ;;  %v8495_v58 = vsel %vm8809_vm5, %v6783_v54, 0.0 }
 0xdfa   :  { %v6785_v21 = vpop.eup %6784  ;;  %6786 = vpow2.f32 %v4001_v13  ;;  %v4003_v11 = vmul.f32 1.442695, %v3974_v34  ;;  %v3975_v38 = vsub.f32 %v8421_v53, %v3958_v63  ;;  %4045 = vadd.xlane.f32.xlu0 %v8495_v58  ;;  %v6731_v53 = vld [vmem:[%s8767_s7 + $0x8] sm:$0xff]  }
 0xdfb   :  { %v3960_v7 = vpop.xlane.xlu1 %3959  ;;  %v8501_v28 = vsel %vm8810_vm8, %v6785_v21, 0.0  ;;  %6465 = vmatmul.mubr.bf16.vlgmr.msra.gmra.mrb[212].mxu0 %v6731_v53 }
 0xdfc   :  { %6788 = vpow2.f32 %v4003_v11  ;;  %v4005_v37 = vmul.f32 1.442695, %v3975_v38  ;;  %v3976_v56 = vsub.f32 %v8426_v14, %v3960_v7  ;;  %4047 = vadd.xlane.f32.xlu1 %v8501_v28  ;;  %6468 = vmatprep.mubr.bf16.mxu0 %v6732_v60  ;;  %v6743_v11 = vld [vmem:[%s8769_s9 + $0x210] sm:$0xff]  }
 0xdfe   :  { %6790 = vpow2.f32 %v4005_v37  ;;  %v4007_v47 = vmul.f32 1.442695, %v3976_v56  ;;  %v6744_v37 = vld [vmem:[%s8769_s9 + $0x258] sm:$0xff]  }
 0xe00   :  { %6792 = vpow2.f32 %v4007_v47 }
 0xe03   :  { %6469 = vmatmul.mubr.bf16.gmra.mrb[216].mxu0 %v6733_v49 }
 0xe04   :  { %v6787_v35 = vpop.eup %6786  ;;  %6472 = vmatprep.mubr.bf16.mxu0 %v6734_v0 }
 0xe05   :  { %v8513_v18 = vsel %vm8811_vm9, %v6787_v35, 0.0 }
 0xe06   :  { %v6789_v14 = vpop.eup %6788  ;;  %4049 = vadd.xlane.f32.xlu0 %v8513_v18 }
 0xe07   :  { %v8518_v3 = vsel %vm8395_vm11, %v6789_v14, 0.0  ;;  %v6745_v14 = vld [vmem:[%s8769_s9 + $0x218] sm:$0xff]  }
 0xe08   :  { %v6791_v22 = vpop.eup %6790  ;;  %4051 = vadd.xlane.f32.xlu1 %v8518_v3 }
 0xe09   :  { %v8523_v10 = vsel %vm8404_vm13, %v6791_v22, 0.0 }
 0xe0a   :  { %v6793_v39 = vpop.eup %6792  ;;  %4053 = vadd.xlane.f32.xlu0 %v8523_v10 }
 0xe0b   :  { %v8528_v32 = vsel %vm8415_vm1, %v6793_v39, 0.0  ;;  %6473 = vmatmul.mubr.bf16.gmra.mrb[220].mxu0 %v6735_v31  ;;  %v6746_v39 = vld [vmem:[%s8769_s9 + $0x260] sm:$0xff]  }
 0xe0c   :  { %4055 = vadd.xlane.f32.xlu1 %v8528_v32  ;;  %6476 = vmatprep.mubr.bf16.mxu0 %v6736_v30 }
 0xe13   :  { %6477 = vmatmul.mubr.bf16.gmra.mrb[224].mxu0 %v6737_v12 }
 0xe63   :  { %v4026_v25 = vpop.xlane.xlu0 %4025 }
 0xe64   :  { %6794 = vrcp.f32 %v4026_v25  ;;  %vm4057_vm14 = vcmp.gt.f32.partialorder %v4026_v25, 0.0 }
 0xe67   :  { %v4030_v23 = vpop.xlane.xlu0 %4029 }
 0xe68   :  { %6796 = vrcp.f32 %v4030_v23  ;;  %v4028_v59 = vpop.xlane.xlu1 %4027  ;;  %vm4059_vm3 = vcmp.gt.f32.partialorder %v4030_v23, 0.0 }
 0xe69   :  { %6798 = vrcp.f32 %v4028_v59  ;;  %vm4058_vm2 = vcmp.gt.f32.partialorder %v4028_v59, 0.0 }
 0xe6c   :  { %v4032_v16 = vpop.xlane.xlu1 %4031 }
 0xe6d   :  { %6800 = vrcp.f32 %v4032_v16  ;;  %vm4060_vm6 = vcmp.gt.f32.partialorder %v4032_v16, 0.0 }
 0xe6e   :  { %v6795_v52 = vpop.eup %6794 }
 0xe6f   :  { %v4089_v24 = vsel %vm4057_vm14, %v6795_v52, 0.0 }
 0xe70   :  { %v4105_v1 = vmul.f32 %v4089_v24, %v8435_v19  ;;  %v6739_v19 = vld [vmem:[%s8769_s9 + $0x200] sm:$0xff]  }
 0xe72   :  { %v6797_v26 = vpop.eup %6796 }
 0xe73   :  { %v6799_v43 = vpop.eup %6798  ;;  %v4034_v27 = vpop.xlane.xlu0 %4033  ;;  %v4091_v44 = vsel %vm4059_vm3, %v6797_v26, 0.0 }
 0xe74   :  { %v4090_v50 = vsel %vm4058_vm2, %v6799_v43, 0.0  ;;  %6802 = vrcp.f32 %v4034_v27  ;;  %v4107_v6 = vmul.f32 %v4091_v44, %v8442_v61  ;;  %vm4061_vm10 = vcmp.gt.f32.partialorder %v4034_v27, 0.0  ;;  %v6741_v61 = vld [vmem:[%s8769_s9 + $0x208] sm:$0xff]  }
 0xe75   :  { %v4106_v51 = vmul.f32 %v4090_v50, %v8448_v33  ;;  %v4036_v41 = vpop.xlane.xlu1 %4035 }
 0xe76   :  { %6804 = vrcp.f32 %v4036_v41  ;;  %vm4062_vm4 = vcmp.gt.f32.partialorder %v4036_v41, 0.0 }
 0xe77   :  { %v6801_v29 = vpop.eup %6800  ;;  %v4038_v8 = vpop.xlane.xlu0 %4037  ;;  %v4121_v2 = vpack.c.bf16 %v4106_v51, %v4105_v1 }
 0xe78   :  { %v4092_v45 = vsel %vm4060_vm6, %v6801_v29, 0.0  ;;  %6806 = vrcp.f32 %v4038_v8  ;;  %vm4063_vm7 = vcmp.gt.f32.partialorder %v4038_v8, 0.0 }
 0xe79   :  { %v4108_v20 = vmul.f32 %v4092_v45, %v8454_v48  ;;  %6432 = vmatprep.mubr.bf16.mxu1 %v4121_v2  ;;  %v4040_v17 = vpop.xlane.xlu1 %4039 }
 0xe7a   :  { %6808 = vrcp.f32 %v4040_v17  ;;  %vm4064_vm15 = vcmp.gt.f32.partialorder %v4040_v17, 0.0 }
 0xe7b   :  { %v4122_v33 = vpack.c.bf16 %v4108_v20, %v4107_v6 }
 0xe7d   :  { %6433 = vmatmul.mubr.bf16.vlgmr.msra.gmra.mrb[208].mxu1 %v4122_v33  ;;  %v6749_v33 = vld [vmem:[%s8769_s9 + $0x228] sm:$0xff]  }
 0xe7e   :  { %v6803_v36 = vpop.eup %6802  ;;  %5918 = vmatpush3.bf16.msra.mxu1 %v6739_v19 }
 0xe7f   :  { %v4093_v48 = vsel %vm4061_vm10, %v6803_v36, 0.0  ;;  %5919 = vmatprep.subr.bf16.mxu1 %v6740_v55  ;;  %v6752_v36 = vld [vmem:[%s8769_s9 + $0x278] sm:$0xff]  }
 0xe80   :  { %v6805_v54 = vpop.eup %6804  ;;  %v4109_v63 = vmul.f32 %v4093_v48, %v8459_v9 }
 0xe81   :  { %v4094_v13 = vsel %vm4062_vm4, %v6805_v54, 0.0  ;;  %v6753_v54 = vld [vmem:[%s8769_s9 + $0x238] sm:$0xff]  }
 0xe82   :  { %v6807_v34 = vpop.eup %6806  ;;  %v4110_v21 = vmul.f32 %v4094_v13, %v8465_v15  ;;  %5920 = vmatpush3.bf16.msra.mxu1 %v6741_v61 }
 0xe83   :  { %v4095_v38 = vsel %vm4063_vm7, %v6807_v34, 0.0  ;;  %v4042_v7 = vpop.xlane.xlu0 %4041  ;;  %5921 = vmatprep.subr.bf16.mxu1 %v6742_v46 }
 0xe84   :  { %v6809_v56 = vpop.eup %6808  ;;  %6810 = vrcp.f32 %v4042_v7  ;;  %v4123_v4 = vpack.c.bf16 %v4110_v21, %v4109_v63  ;;  %v4111_v15 = vmul.f32 %v4095_v38, %v8471_v62  ;;  %v6747_v62 = vld [vmem:[%s8769_s9 + $0x220] sm:$0xff]   ;;  %vm4065_vm1 = vcmp.gt.f32.partialorder %v4042_v7, 0.0 }
 0xe85   :  { %v4096_v9 = vsel %vm4064_vm15, %v6809_v56, 0.0  ;;  %v4044_v53 = vpop.xlane.xlu1 %4043 }
 0xe86   :  { %v4112_v47 = vmul.f32 %v4096_v9, %v8477_v57  ;;  %6812 = vrcp.f32 %v4044_v53  ;;  %6436 = vmatprep.mubr.bf16.mxu1 %v4123_v4  ;;  %5922 = vmatpush3.bf16.msra.mxu1 %v6743_v11  ;;  %v6748_v57 = vld [vmem:[%s8769_s9 + $0x268] sm:$0xff]   ;;  %vm4066_vm11 = vcmp.gt.f32.partialorder %v4044_v53, 0.0 }
 0xe87   :  { %v4046_v35 = vpop.xlane.xlu0 %4045  ;;  %5923 = vmatprep.subr.bf16.mxu1 %v6744_v37 }
 0xe88   :  { %6814 = vrcp.f32 %v4046_v35  ;;  %v4124_v22 = vpack.c.bf16 %v4112_v47, %v4111_v15  ;;  %vm4067_vm12 = vcmp.gt.f32.partialorder %v4046_v35, 0.0 }
 0xe89   :  { %v4048_v60 = vpop.xlane.xlu1 %4047 }
 0xe8a   :  { %6816 = vrcp.f32 %v4048_v60  ;;  %6437 = vmatmul.mubr.bf16.gmra.mrb[212].mxu1 %v4124_v22  ;;  %vm4068_vm13 = vcmp.gt.f32.partialorder %v4048_v60, 0.0  ;;  %v6754_v60 = vld [vmem:[%s8771_s11] sm:$0xff]  }
 0xe8b   :  { %5924 = vmatpush3.bf16.msra.mxu1 %v6745_v14  ;;  %6480 = vmatprep.subr.bf16.mxu0 %v6754_v60 }
 0xe8c   :  { %5925 = vmatprep.subr.bf16.mxu1 %v6746_v39  ;;  %6481 = vmatpush3.bf16.msra.mxu0 %v6754_v60 }
 0xe8e   :  { %v6811_v49 = vpop.eup %6810 }
 0xe8f   :  { %v4097_v0 = vsel %vm4065_vm1, %v6811_v49, 0.0  ;;  %5926 = vmatpush3.bf16.msra.mxu1 %v6747_v62  ;;  %v6755_v62 = vld [vmem:[%s8771_s11 + $0x8] sm:$0xff]   ;;  %v6757_v49 = vld [vmem:[%s8771_s11 + $0x18] sm:$0xff]  }
 0xe90   :  { %v6813_v31 = vpop.eup %6812  ;;  %5927 = vmatprep.subr.bf16.mxu1 %v6748_v57  ;;  %v4113_v42 = vmul.f32 %v4097_v0, %v8483_v40  ;;  %6482 = vmatprep.subr.bf16.mxu0 %v6755_v62  ;;  %v6756_v57 = vld [vmem:[%s8771_s11 + $0x10] sm:$0xff]   ;;  %v5161_v0 = vld [vmem:[#allocation4 + $0x9] ss:$0 sm:$0xff] }
 0xe91   :  { %v4098_v30 = vsel %vm4066_vm11, %v6813_v31, 0.0  ;;  %6483 = vmatpush3.bf16.msra.mxu0 %v6755_v62 }
 0xe92   :  { %v6815_v12 = vpop.eup %6814  ;;  %v4114_v25 = vmul.f32 %v4098_v30, %v8489_v5  ;;  %6484 = vmatprep.subr.bf16.mxu0 %v6756_v57 }
 0xe93   :  { %v4099_v23 = vsel %vm4067_vm12, %v6815_v12, 0.0  ;;  %v4050_v59 = vpop.xlane.xlu0 %4049  ;;  %5928 = vmatpush3.bf16.msra.mxu1 %v6749_v33 }
 0xe94   :  { %v6817_v16 = vpop.eup %6816  ;;  %6818 = vrcp.f32 %v4050_v59  ;;  %v4125_v52 = vpack.c.bf16 %v4114_v25, %v4113_v42  ;;  %v4115_v43 = vmul.f32 %v4099_v23, %v8495_v58  ;;  %vm4069_vm0 = vcmp.gt.f32.partialorder %v4050_v59, 0.0 }
 0xe95   :  { %v4100_v26 = vsel %vm4068_vm13, %v6817_v16, 0.0  ;;  %v4052_v24 = vpop.xlane.xlu1 %4051  ;;  %6485 = vmatpush3.bf16.msra.mxu0 %v6756_v57 }
 0xe96   :  { %v4116_v27 = vmul.f32 %v4100_v26, %v8501_v28  ;;  %6820 = vrcp.f32 %v4052_v24  ;;  %6440 = vmatprep.mubr.bf16.mxu1 %v4125_v52  ;;  %vm4070_vm5 = vcmp.gt.f32.partialorder %v4052_v24, 0.0  ;;  %6486 = vmatprep.subr.bf16.mxu0 %v6757_v49 }
 0xe97   :  { %v4054_v50 = vpop.xlane.xlu0 %4053 }
 0xe98   :  { %6822 = vrcp.f32 %v4054_v50  ;;  %v4126_v40 = vpack.c.bf16 %v4116_v27, %v4115_v43  ;;  %vm4071_vm8 = vcmp.gt.f32.partialorder %v4054_v50, 0.0 }
 0xe99   :  { %v4056_v1 = vpop.xlane.xlu1 %4055  ;;  %6487 = vmatpush3.bf16.msra.mxu0 %v6757_v49 }
 0xe9a   :  { %6824 = vrcp.f32 %v4056_v1  ;;  %6441 = vmatmul.mubr.bf16.gmra.mrb[216].mxu1 %v4126_v40  ;;  %vm4072_vm9 = vcmp.gt.f32.partialorder %v4056_v1, 0.0 }
 0xe9e   :  { %v6819_v5 = vpop.eup %6818 }
 0xe9f   :  { %v4101_v51 = vsel %vm4069_vm0, %v6819_v5, 0.0 }
 0xea0   :  { %v6821_v41 = vpop.eup %6820  ;;  %v4117_v8 = vmul.f32 %v4101_v51, %v8513_v18  ;;  %v6750_v18 = vld [vmem:[%s8769_s9 + $0x270] sm:$0xff]  }
 0xea1   :  { %v4102_v44 = vsel %vm4070_vm5, %v6821_v41, 0.0  ;;  %5929 = vmatprep.subr.bf16.mxu1 %v6750_v18 }
 0xea2   :  { %v6823_v29 = vpop.eup %6822  ;;  %v4118_v58 = vmul.f32 %v4102_v44, %v8518_v3  ;;  %v6751_v3 = vld [vmem:[%s8769_s9 + $0x230] sm:$0xff]  }
 0xea3   :  { %v4103_v28 = vsel %vm4071_vm8, %v6823_v29, 0.0  ;;  %5930 = vmatpush3.bf16.msra.mxu1 %v6751_v3 }
 0xea4   :  { %v6825_v2 = vpop.eup %6824  ;;  %v4127_v45 = vpack.c.bf16 %v4118_v58, %v4117_v8  ;;  %v4119_v20 = vmul.f32 %v4103_v28, %v8523_v10  ;;  %5931 = vmatprep.subr.bf16.mxu1 %v6752_v36 }
 0xea5   :  { %v4104_v6 = vsel %vm4072_vm9, %v6825_v2, 0.0 }
 0xea6   :  { %v4120_v17 = vmul.f32 %v4104_v6, %v8528_v32  ;;  %6444 = vmatprep.mubr.bf16.mxu1 %v4127_v45 }
 0xea7   :  { %5932 = vmatpush3.bf16.msra.mxu1 %v6753_v54 }
 0xea8   :  { %v4128_v19 = vpack.c.bf16 %v4120_v17, %v4119_v20 }
 0xeaa   :  { %6445 = vmatmul.mubr.bf16.gmra.mrb[220].mxu1 %v4128_v19 }
 0xece   :  { %v8607_v55 = vpop.f32.mrb[212].mxu0 }
 0xecf   :  { %v4386_v10 = vpop.f32.mrb[213].mxu0 }
 0xed0   :  { %v8609_v32 = vpop.f32.mrb[214].mxu0 }
 0xed1   :  { %v4389_v61 = vpop.f32.mrb[215].mxu0  ;;  %v4450_v48 = vpack.c.bf16 %v8609_v32, %v8607_v55 }
 0xed2   :  { %v4449_v46 = vpack.c.bf16 %v4389_v61, %v4386_v10 }
 0xed6   :  { %v8619_v13 = vpop.f32.mrb[216].mxu0 }
 0xed7   :  { %v8621_v34 = vpop.f32.mrb[217].mxu0 }
 0xed8   :  { %v8623_v63 = vpop.f32.mrb[218].mxu0 }
 0xed9   :  { %v4452_v21 = vpack.c.bf16 %v8623_v63, %v8619_v13  ;;  %v4405_v11 = vpop.f32.mrb[219].mxu0 }
 0xeda   :  { %v4451_v38 = vpack.c.bf16 %v4405_v11, %v8621_v34 }
 0xede   :  { %v8628_v7 = vpop.f32.mrb[220].mxu0 }
 0xedf   :  { %v8630_v37 = vpop.f32.mrb[221].mxu0 }
 0xee0   :  { %v8632_v56 = vpop.f32.mrb[222].mxu0 }
 0xee1   :  { %v4454_v4 = vpack.c.bf16 %v8632_v56, %v8628_v7  ;;  %v8636_v9 = vpop.f32.mrb[223].mxu0  ;;  %v6759_v7 = vld [vmem:[%s8771_s11 + $0x28] sm:$0xff]   ;;  %v6760_v56 = vld [vmem:[%s8771_s11 + $0x30] sm:$0xff]  }
 0xee2   :  { %v4453_v53 = vpack.c.bf16 %v8636_v9, %v8630_v37  ;;  %v6758_v9 = vld [vmem:[%s8771_s11 + $0x20] sm:$0xff]  }
 0xee3   :  { %6488 = vmatprep.subr.bf16.mxu0 %v6758_v9 }
 0xee4   :  { %6489 = vmatpush3.bf16.msra.mxu0 %v6758_v9 }
 0xee5   :  { %6490 = vmatprep.subr.bf16.mxu0 %v6759_v7 }
 0xee6   :  { %v8640_v15 = vpop.f32.mrb[224].mxu0 }
 0xee7   :  { %v8642_v47 = vpop.f32.mrb[225].mxu0 }
 0xee8   :  { %v8644_v35 = vpop.f32.mrb[226].mxu0  ;;  %6491 = vmatpush3.bf16.msra.mxu0 %v6759_v7 }
 0xee9   :  { %v4456_v14 = vpack.c.bf16 %v8644_v35, %v8640_v15  ;;  %v8648_v22 = vpop.f32.mrb[227].mxu0  ;;  %6492 = vmatprep.subr.bf16.mxu0 %v6760_v56  ;;  %v8694_v15 = vld [vmem:[#allocation4 + $0x6] ss:$0 sm:$0xff] }
 0xeea   :  { %v4455_v39 = vpack.c.bf16 %v8648_v22, %v8642_v47 }
 0xeec   :  { %6493 = vmatpush3.bf16.msra.mxu0 %v6760_v56 }
 0xf50   :  { %v6434_v31 = vpop.f32.mrb[208].mxu1 }
 0xf51   :  { %v4184_v30 = vadd.f32 %v6434_v31, %v5161_v0  ;;  %v4175_v12 = vpop.f32.mrb[209].mxu1 }
 0xf52   :  { %v4176_v42 = vadd.f32 %v5161_v0, %v4175_v12  ;;  %v6435_v25 = vpop.f32.mrb[210].mxu1 }
 0xf53   :  { %v4187_v23 = vadd.f32 %v6435_v25, %v5161_v0  ;;  %v4178_v59 = vpop.f32.mrb[211].mxu1  ;;  %v4240_v52 = vmax.f32 %v4184_v30, 0.0 }
 0xf54   :  { %v4179_v16 = vadd.f32 %v5161_v0, %v4178_v59  ;;  %v4238_v24 = vmax.f32 %v4176_v42, 0.0 }
 0xf55   :  { %v4241_v26 = vmax.f32 %v4187_v23, 0.0 }
 0xf56   :  { %v4239_v43 = vmax.f32 %v4179_v16, 0.0 }
 0xf57   :  { %v4458_v27 = vpack.c.bf16 %v4241_v26, %v4240_v52 }
 0xf58   :  { %v4457_v50 = vpack.c.bf16 %v4239_v43, %v4238_v24 }
 0xf5a   :  { %4597 = vmatprep.mubr.bf16.mxu1 %v4457_v50 }
 0xf5b   :  { %4598 = vmatmul.mubr.bf16.vlgmr.msra.gmra.mrb[224].mxu1 %v4449_v46 }
 0xf5c   :  { %4605 = vmatprep.mubr.bf16.mxu1 %v4458_v27 }
 0xf5d   :  { %v6438_v40 = vpop.f32.mrb[212].mxu1 }
 0xf5e   :  { %v4200_v1 = vadd.f32 %v6438_v40, %v5161_v0  ;;  %v4191_v5 = vpop.f32.mrb[213].mxu1 }
 0xf5f   :  { %v4192_v51 = vadd.f32 %v5161_v0, %v4191_v5  ;;  %v6439_v41 = vpop.f32.mrb[214].mxu1 }
 0xf60   :  { %v4203_v44 = vadd.f32 %v6439_v41, %v5161_v0  ;;  %v4194_v29 = vpop.f32.mrb[215].mxu1  ;;  %v4244_v58 = vmax.f32 %v4200_v1, 0.0 }
 0xf61   :  { %v4195_v8 = vadd.f32 %v5161_v0, %v4194_v29  ;;  %v4242_v2 = vmax.f32 %v4192_v51, 0.0 }
 0xf62   :  { %v4245_v28 = vmax.f32 %v4203_v44, 0.0 }
 0xf63   :  { %v4243_v45 = vmax.f32 %v4195_v8, 0.0  ;;  %4606 = vmatmul.mubr.bf16.gmra.mrb[228].mxu1 %v4450_v48 }
 0xf64   :  { %v4460_v6 = vpack.c.bf16 %v4245_v28, %v4244_v58 }
 0xf65   :  { %v4459_v20 = vpack.c.bf16 %v4243_v45, %v4242_v2 }
 0xf67   :  { %4613 = vmatprep.mubr.bf16.mxu1 %v4459_v20 }
 0xf6b   :  { %4614 = vmatmul.mubr.bf16.gmra.mrb[232].mxu1 %v4451_v38 }
 0xf6c   :  { %4621 = vmatprep.mubr.bf16.mxu1 %v4460_v6 }
 0xf6d   :  { %v6442_v17 = vpop.f32.mrb[216].mxu1 }
 0xf6e   :  { %v4216_v19 = vadd.f32 %v6442_v17, %v5161_v0  ;;  %v4207_v33 = vpop.f32.mrb[217].mxu1 }
 0xf6f   :  { %v4208_v18 = vadd.f32 %v5161_v0, %v4207_v33  ;;  %v6443_v3 = vpop.f32.mrb[218].mxu1 }
 0xf70   :  { %v4219_v10 = vadd.f32 %v6443_v3, %v5161_v0  ;;  %v4210_v36 = vpop.f32.mrb[219].mxu1  ;;  %v4248_v46 = vmax.f32 %v4216_v19, 0.0 }
 0xf71   :  { %v4211_v61 = vadd.f32 %v5161_v0, %v4210_v36  ;;  %v4246_v34 = vmax.f32 %v4208_v18, 0.0 }
 0xf72   :  { %v4249_v54 = vmax.f32 %v4219_v10, 0.0 }
 0xf73   :  { %v4247_v11 = vmax.f32 %v4211_v61, 0.0  ;;  %4622 = vmatmul.mubr.bf16.gmra.mrb[236].mxu1 %v4452_v21 }
 0xf74   :  { %v4462_v55 = vpack.c.bf16 %v4249_v54, %v4248_v46 }
 0xf75   :  { %v4461_v32 = vpack.c.bf16 %v4247_v11, %v4246_v34 }
 0xf77   :  { %4629 = vmatprep.mubr.bf16.mxu1 %v4461_v32 }
 0xf7b   :  { %4630 = vmatmul.mubr.bf16.gmra.mrb[240].mxu1 %v4453_v53 }
 0xf7c   :  { %4637 = vmatprep.mubr.bf16.mxu1 %v4462_v55 }
 0xf7d   :  { %v6446_v48 = vpop.f32.mrb[220].mxu1 }
 0xf7e   :  { %v4232_v38 = vadd.f32 %v6446_v48, %v5161_v0  ;;  %v4223_v60 = vpop.f32.mrb[221].mxu1 }
 0xf7f   :  { %v4224_v62 = vadd.f32 %v5161_v0, %v4223_v60  ;;  %v6447_v57 = vpop.f32.mrb[222].mxu1 }
 0xf80   :  { %v4235_v49 = vadd.f32 %v6447_v57, %v5161_v0  ;;  %v4226_v31 = vpop.f32.mrb[223].mxu1  ;;  %v4252_v12 = vmax.f32 %v4232_v38, 0.0 }
 0xf81   :  { %v4227_v30 = vadd.f32 %v5161_v0, %v4226_v31  ;;  %v4250_v13 = vmax.f32 %v4224_v62, 0.0 }
 0xf82   :  { %v4253_v42 = vmax.f32 %v4235_v49, 0.0 }
 0xf83   :  { %v4251_v63 = vmax.f32 %v4227_v30, 0.0  ;;  %4638 = vmatmul.mubr.bf16.gmra.mrb[244].mxu1 %v4454_v4  ;;  %v6761_v4 = vld [vmem:[%s8771_s11 + $0x38] sm:$0xff]  }
 0xf84   :  { %v4464_v21 = vpack.c.bf16 %v4253_v42, %v4252_v12  ;;  %6494 = vmatprep.subr.bf16.mxu0 %v6761_v4 }
 0xf85   :  { %v4463_v37 = vpack.c.bf16 %v4251_v63, %v4250_v13  ;;  %6495 = vmatpush3.bf16.msra.mxu0 %v6761_v4 }
 0xf87   :  { %4645 = vmatprep.mubr.bf16.mxu1 %v4463_v37 }
 0xf8b   :  { %4646 = vmatmul.mubr.bf16.gmra.mrb[248].mxu1 %v4455_v39 }
 0xf8c   :  { %4653 = vmatprep.mubr.bf16.mxu1 %v4464_v21 }
 0xf93   :  { %4654 = vmatmul.mubr.bf16.gmra.mrb[252].mxu1 %v4456_v14 }
0x102e   :  { %v5933_v53 = vpop.f32.mrb[224].mxu1 }
0x102f   :  { %v5934_v47 = vpop.f32.mrb[225].mxu1 }
0x1030   :  { %v5935_v35 = vadd.f32 %v5934_v47, %v5933_v53  ;;  %v5936_v14 = vpop.f32.mrb[226].mxu1 }
0x1031   :  { %v5937_v22 = vpop.f32.mrb[227].mxu1 }
0x1032   :  { %v4600_v39 = vadd.f32 %v5935_v35, %v8694_v15  ;;  %v5938_v0 = vadd.f32 %v5937_v22, %v5936_v14 }
0x1034   :  { %v4603_v25 = vadd.f32 %v5938_v0, %v8694_v15  ;;  %v4662_v23 = vmax.f32 %v4600_v39, 0.0 }
0x1036   :  { %v4663_v59 = vmax.f32 %v4603_v25, 0.0  ;;  %v5939_v16 = vpop.f32.mrb[228].mxu1 }
0x1037   :  { %v5940_v52 = vpop.f32.mrb[229].mxu1 }
0x1038   :  { %v5941_v26 = vadd.f32 %v5940_v52, %v5939_v16  ;;  %v5942_v24 = vpop.f32.mrb[230].mxu1  ;;  %v4694_v43 = vpack.c.bf16 %v4663_v59, %v4662_v23 }
0x1039   :  { %v5943_v27 = vpop.f32.mrb[231].mxu1 }
0x103a   :  { %v4608_v50 = vadd.f32 %v5941_v26, %v8694_v15  ;;  %v5944_v40 = vadd.f32 %v5943_v27, %v5942_v24  ;;  %6496 = vmatprep.mubr.bf16.mxu0 %v4694_v43 }
0x103c   :  { %v4611_v1 = vadd.f32 %v5944_v40, %v8694_v15  ;;  %v4664_v5 = vmax.f32 %v4608_v50, 0.0 }
0x103e   :  { %v4665_v51 = vmax.f32 %v4611_v1, 0.0  ;;  %v5945_v41 = vpop.f32.mrb[232].mxu1 }
0x103f   :  { %v5946_v44 = vpop.f32.mrb[233].mxu1 }
0x1040   :  { %v4695_v29 = vpack.c.bf16 %v4665_v51, %v4664_v5  ;;  %v5947_v8 = vadd.f32 %v5946_v44, %v5945_v41  ;;  %v5948_v58 = vpop.f32.mrb[234].mxu1 }
0x1041   :  { %v5949_v28 = vpop.f32.mrb[235].mxu1 }
0x1042   :  { %6497 = vmatmul.mubr.bf16.vlgmr.msra.gmra.mrb[228].mxu0 %v4695_v29  ;;  %v4616_v2 = vadd.f32 %v5947_v8, %v8694_v15  ;;  %v5950_v45 = vadd.f32 %v5949_v28, %v5948_v58  ;;  %v5219_v58 = vld [vmem:[#allocation4 + $0xa] ss:$0 sm:$0xff] }
0x1044   :  { %v4619_v6 = vadd.f32 %v5950_v45, %v8694_v15  ;;  %v4666_v20 = vmax.f32 %v4616_v2, 0.0 }
0x1046   :  { %v4667_v17 = vmax.f32 %v4619_v6, 0.0  ;;  %v5951_v19 = vpop.f32.mrb[236].mxu1 }
0x1047   :  { %v5952_v33 = vpop.f32.mrb[237].mxu1 }
0x1048   :  { %v5953_v18 = vadd.f32 %v5952_v33, %v5951_v19  ;;  %v5954_v3 = vpop.f32.mrb[238].mxu1  ;;  %v4696_v10 = vpack.c.bf16 %v4667_v17, %v4666_v20 }
0x1049   :  { %v5955_v36 = vpop.f32.mrb[239].mxu1 }
0x104a   :  { %v4624_v61 = vadd.f32 %v5953_v18, %v8694_v15  ;;  %v5956_v46 = vadd.f32 %v5955_v36, %v5954_v3  ;;  %6500 = vmatprep.mubr.bf16.mxu0 %v4696_v10 }
0x104c   :  { %v4627_v54 = vadd.f32 %v5956_v46, %v8694_v15  ;;  %v4668_v34 = vmax.f32 %v4624_v61, 0.0 }
0x104e   :  { %v4669_v11 = vmax.f32 %v4627_v54, 0.0  ;;  %v5957_v55 = vpop.f32.mrb[240].mxu1 }
0x104f   :  { %v5958_v32 = vpop.f32.mrb[241].mxu1 }
0x1050   :  { %v4697_v48 = vpack.c.bf16 %v4669_v11, %v4668_v34  ;;  %v5959_v38 = vadd.f32 %v5958_v32, %v5957_v55  ;;  %v5960_v60 = vpop.f32.mrb[242].mxu1 }
0x1051   :  { %v5961_v62 = vpop.f32.mrb[243].mxu1 }
0x1052   :  { %6501 = vmatmul.mubr.bf16.gmra.mrb[232].mxu0 %v4697_v48  ;;  %v4632_v57 = vadd.f32 %v5959_v38, %v8694_v15  ;;  %v5962_v49 = vadd.f32 %v5961_v62, %v5960_v60 }
0x1054   :  { %v4635_v31 = vadd.f32 %v5962_v49, %v8694_v15  ;;  %v4670_v30 = vmax.f32 %v4632_v57, 0.0 }
0x1056   :  { %v4671_v12 = vmax.f32 %v4635_v31, 0.0  ;;  %v5963_v42 = vpop.f32.mrb[244].mxu1 }
0x1057   :  { %v5964_v13 = vpop.f32.mrb[245].mxu1 }
0x1058   :  { %v5965_v63 = vadd.f32 %v5964_v13, %v5963_v42  ;;  %v5966_v21 = vpop.f32.mrb[246].mxu1  ;;  %v4698_v37 = vpack.c.bf16 %v4671_v12, %v4670_v30 }
0x1059   :  { %v5967_v9 = vpop.f32.mrb[247].mxu1 }
0x105a   :  { %v4640_v7 = vadd.f32 %v5965_v63, %v8694_v15  ;;  %v5968_v56 = vadd.f32 %v5967_v9, %v5966_v21  ;;  %6504 = vmatprep.mubr.bf16.mxu0 %v4698_v37 }
0x105c   :  { %v4643_v4 = vadd.f32 %v5968_v56, %v8694_v15  ;;  %v4672_v53 = vmax.f32 %v4640_v7, 0.0 }
0x105e   :  { %v4673_v47 = vmax.f32 %v4643_v4, 0.0  ;;  %v5969_v35 = vpop.f32.mrb[248].mxu1 }
0x105f   :  { %v5970_v14 = vpop.f32.mrb[249].mxu1 }
0x1060   :  { %v4699_v22 = vpack.c.bf16 %v4673_v47, %v4672_v53  ;;  %v5971_v39 = vadd.f32 %v5970_v14, %v5969_v35  ;;  %v5972_v0 = vpop.f32.mrb[250].mxu1 }
0x1061   :  { %v5973_v25 = vpop.f32.mrb[251].mxu1 }
0x1062   :  { %6505 = vmatmul.mubr.bf16.gmra.mrb[236].mxu0 %v4699_v22  ;;  %v4648_v23 = vadd.f32 %v5971_v39, %v8694_v15  ;;  %v5974_v59 = vadd.f32 %v5973_v25, %v5972_v0 }
0x1064   :  { %v4651_v16 = vadd.f32 %v5974_v59, %v8694_v15  ;;  %v4674_v52 = vmax.f32 %v4648_v23, 0.0 }
0x1066   :  { %v4675_v26 = vmax.f32 %v4651_v16, 0.0  ;;  %v5975_v24 = vpop.f32.mrb[252].mxu1 }
0x1067   :  { %v5976_v43 = vpop.f32.mrb[253].mxu1 }
0x1068   :  { %v5977_v27 = vadd.f32 %v5976_v43, %v5975_v24  ;;  %v5978_v50 = vpop.f32.mrb[254].mxu1  ;;  %v4700_v40 = vpack.c.bf16 %v4675_v26, %v4674_v52 }
0x1069   :  { %v5979_v1 = vpop.f32.mrb[255].mxu1 }
0x106a   :  { %v4656_v5 = vadd.f32 %v5977_v27, %v8694_v15  ;;  %v5980_v51 = vadd.f32 %v5979_v1, %v5978_v50  ;;  %6508 = vmatprep.mubr.bf16.mxu0 %v4700_v40 }
0x106c   :  { %v4659_v41 = vadd.f32 %v5980_v51, %v8694_v15  ;;  %v4676_v44 = vmax.f32 %v4656_v5, 0.0 }
0x106e   :  { %v4677_v29 = vmax.f32 %v4659_v41, 0.0 }
0x1070   :  { %v4701_v8 = vpack.c.bf16 %v4677_v29, %v4676_v44 }
0x1072   :  { %6509 = vmatmul.mubr.bf16.gmra.mrb[240].mxu0 %v4701_v8 }
0x1115   :  { %v6498_v28 = vpop.f32.mrb[228].mxu0 }
0x1116   :  { %v4798_v2 = vadd.f32 %v6498_v28, %v5219_v58  ;;  %v4789_v45 = vpop.f32.mrb[229].mxu0 }
0x1117   :  { %v4790_v6 = vadd.f32 %v5219_v58, %v4789_v45  ;;  %v6499_v20 = vpop.f32.mrb[230].mxu0 }
0x1118   :  { %4854 = vst [vmem:[%s8773_s13 + $0x10] sm:$0xff] %v4798_v2  ;;  %v4801_v17 = vadd.f32 %v6499_v20, %v5219_v58  ;;  %v4792_v19 = vpop.f32.mrb[231].mxu0 }
0x1119   :  { %4852 = vst [vmem:[%s8773_s13] sm:$0xff] %v4790_v6  ;;  %v4793_v15 = vadd.f32 %v5219_v58, %v4792_v19 }
0x111a   :  { %4855 = vst [vmem:[%s8773_s13 + $0x18] sm:$0xff] %v4801_v17 }
0x111b   :  { %4853 = vst [vmem:[%s8773_s13 + $0x8] sm:$0xff] %v4793_v15 }
0x1125   :  { %v6502_v33 = vpop.f32.mrb[232].mxu0 }
0x1126   :  { %v4814_v18 = vadd.f32 %v6502_v33, %v5219_v58  ;;  %v4805_v3 = vpop.f32.mrb[233].mxu0 }
0x1127   :  { %v4806_v10 = vadd.f32 %v5219_v58, %v4805_v3  ;;  %v6503_v36 = vpop.f32.mrb[234].mxu0 }
0x1128   :  { %4858 = vst [vmem:[%s8773_s13 + $0x30] sm:$0xff] %v4814_v18  ;;  %v4817_v61 = vadd.f32 %v6503_v36, %v5219_v58  ;;  %v4808_v46 = vpop.f32.mrb[235].mxu0 }
0x1129   :  { %4856 = vst [vmem:[%s8773_s13 + $0x20] sm:$0xff] %v4806_v10  ;;  %v4809_v54 = vadd.f32 %v5219_v58, %v4808_v46 }
0x112a   :  { %4859 = vst [vmem:[%s8773_s13 + $0x38] sm:$0xff] %v4817_v61 }
0x112b   :  { %4857 = vst [vmem:[%s8773_s13 + $0x28] sm:$0xff] %v4809_v54 }
0x1135   :  { %v6506_v34 = vpop.f32.mrb[236].mxu0 }
0x1136   :  { %v4830_v11 = vadd.f32 %v6506_v34, %v5219_v58  ;;  %v4821_v55 = vpop.f32.mrb[237].mxu0 }
0x1137   :  { %v4822_v32 = vadd.f32 %v5219_v58, %v4821_v55  ;;  %v6507_v48 = vpop.f32.mrb[238].mxu0 }
0x1138   :  { %4862 = vst [vmem:[%s8773_s13 + $0x50] sm:$0xff] %v4830_v11  ;;  %v4833_v38 = vadd.f32 %v6507_v48, %v5219_v58  ;;  %v4824_v60 = vpop.f32.mrb[239].mxu0 }
0x1139   :  { %4860 = vst [vmem:[%s8773_s13 + $0x40] sm:$0xff] %v4822_v32  ;;  %v4825_v62 = vadd.f32 %v5219_v58, %v4824_v60 }
0x113a   :  { %4863 = vst [vmem:[%s8773_s13 + $0x58] sm:$0xff] %v4833_v38 }
0x113b   :  { %4861 = vst [vmem:[%s8773_s13 + $0x48] sm:$0xff] %v4825_v62 }
0x1145   :  { %v6510_v57 = vpop.f32.mrb[240].mxu0 }
0x1146   :  { %v4846_v49 = vadd.f32 %v6510_v57, %v5219_v58  ;;  %v4837_v31 = vpop.f32.mrb[241].mxu0 }
0x1147   :  { %v4838_v30 = vadd.f32 %v5219_v58, %v4837_v31  ;;  %v6511_v12 = vpop.f32.mrb[242].mxu0 }
0x1148   :  { %4866 = vst [vmem:[%s8773_s13 + $0x70] sm:$0xff] %v4846_v49  ;;  %v4849_v42 = vadd.f32 %v6511_v12, %v5219_v58  ;;  %v4840_v13 = vpop.f32.mrb[243].mxu0 }
0x1149   :  { %4864 = vst [vmem:[%s8773_s13 + $0x60] sm:$0xff] %v4838_v30  ;;  %v4841_v63 = vadd.f32 %v5219_v58, %v4840_v13 }
0x114a   :  { %4867 = vst [vmem:[%s8773_s13 + $0x78] sm:$0xff] %v4849_v42 }
0x114b   :  { %4865 = vst [vmem:[%s8773_s13 + $0x68] sm:$0xff] %v4841_v63 }
0x114c   :  { %4872 = vsyncpa [#allocation3], 1 }
0x114d   :  { %4873 = vsyncpa [#allocation5], 1 }

</bundles_post_ra>
